<compile_context>
chip_gen: v5e
topology: v5e:2x2
jax: 0.10.0
libtpu: 0.0.40
codegen_flags: <defaults>
</compile_context>

<pallas_src>
import math

import jax
import jax.numpy as jnp
from jax import lax
from jax.experimental import pallas as pl
from jax.experimental.pallas import tpu as pltpu


def build_pe_table(d_model: int, max_len: int = 3000, T: float = 10000.0) -> jnp.ndarray:
    """Reference construction of the (max_len+1, d_model) sin/cos table.

    Only used for the correctness check; the kernel never touches this table.
    NOTE: assumes even d_model (same limitation as the original torch code).
    """
    pe = jnp.zeros((max_len + 1, d_model), dtype=jnp.float32)
    position = jnp.arange(0, max_len, dtype=jnp.float32)[:, None]          # (max_len, 1)
    div_term = jnp.exp(
        jnp.arange(0, d_model, 2, dtype=jnp.float32) * -(math.log(T) / d_model)
    )                                                                       # (d_model//2,)
    pe = pe.at[1:, 0::2].set(jnp.sin(position * div_term))
    pe = pe.at[1:, 1::2].set(jnp.cos(position * div_term))
    # row 0 stays all-zeros, exactly like the torch buffer.
    return pe


def _doy_sincos_kernel(idx_ref, freq_ref, out_ref):
    # idx_ref : (1, TILE) int32  -- lane-dense DOY indices for this tile
    # freq_ref: (1, D)    f32    -- per-output-column frequency: [f0, f0, f1, f1, ...]
    # out_ref : (TILE, D) f32
    tile, d = out_ref.shape

    idx_row = idx_ref[...]                                   # (1, TILE) int32
    pos_row = (idx_row - 1).astype(jnp.float32)              # (1, TILE); doy==0 -> -1.0

    # Broadcast the per-row position across the D lanes with a K=1 transposed
    # matmul (pos_row^T @ ones(1, D)).  Keeps the index input lane-dense while
    # avoiding an explicit lane->sublane relayout; the MXU work is negligible
    # (TILE*D MACs) and multiplying by 1.0 is exact.
    ones_row = jnp.ones((1, d), dtype=jnp.float32)
    pos_b = lax.dot_general(
        pos_row, ones_row,
        dimension_numbers=(((0,), (0,)), ((), ())),
        preferred_element_type=jnp.float32,
    )                                                        # (TILE, D)

    ang = pos_b * freq_ref[...]                              # exact f32 VPU multiply
    col = lax.broadcasted_iota(jnp.int32, (tile, d), 1)
    val = jnp.where(col % 2 == 0, jnp.sin(ang), jnp.cos(ang))

    # Row 0 of the reference table is all zeros (doy == 0 padding); padded tail
    # rows also carry index 0.  pos_b < 0 exactly identifies those rows.
    out_ref[...] = jnp.where(pos_b >= 0.0, val, 0.0).astype(out_ref.dtype)


def positional_encoding_forward(doy: jnp.ndarray, d_model: int,
                                max_len: int = 3000, T: float = 10000.0) -> jnp.ndarray:
    """Equivalent of PositionalEncoding(d_model, max_len, T).forward(doy)."""
    assert d_model % 2 == 0, "d_model must be even (same limitation as the torch code)"
    B, N = doy.shape
    D = d_model
    R = B * N

    # NOTE: for a handful of rows a plain jnp.take would beat pallas_call
    # dispatch overhead; the kernel path is kept unconditionally so this
    # function always exercises the Pallas kernel.
    TILE = 512
    if R <= 1024:
        TILE = 256
    if R <= 256:
        TILE = 128                       # keeps >= 2 grid steps for moderate R
    n_tiles = pl.cdiv(R, TILE)
    R_pad = n_tiles * TILE

    # Clamp (torch would raise on out-of-range DOY; we clamp for safety).
    # Padded tail rows map to index 0 (the all-zero row) and are sliced off.
    idx = jnp.clip(doy.astype(jnp.int32).reshape(-1), 0, max_len)
    idx = jnp.pad(idx, (0, R_pad - R)).reshape(n_tiles, TILE)

    # Per-output-column frequency: freq[2k] = freq[2k+1] = div_term[k].
    div_term = jnp.exp(
        jnp.arange(0, D, 2, dtype=jnp.float32) * -(math.log(T) / D))
    freq = jnp.repeat(div_term, 2)[None, :]                  # (1, D)

    out = pl.pallas_call(
        _doy_sincos_kernel,
        out_shape=jax.ShapeDtypeStruct((R_pad, D), jnp.float32),
        grid_spec=pltpu.PrefetchScalarGridSpec(
            num_scalar_prefetch=0,
            grid=(n_tiles,),
            in_specs=[
                pl.BlockSpec((1, TILE), lambda i: (i, 0)),   # lane-dense DOY indices
                pl.BlockSpec((1, D), lambda i: (0, 0)),      # tiny resident freq row
            ],
            out_specs=pl.BlockSpec((TILE, D), lambda i: (i, 0)),
        ),
        compiler_params=pltpu.CompilerParams(
            dimension_semantics=("parallel",),               # independent tiles -> megacore
        ),
    )(idx, freq)

    # 'b n c -> b n c 1 1'
    return out[:R].reshape(B, N, D, 1, 1)


if __name__ == "__main__":
    # Small, module-consistent shapes.
    B, N = 2, 8            # batch, sequence length (number of observations)
    d_model = 32
    max_len = 64
    T = 10000.0

    key = jax.random.PRNGKey(0)
    # DOY indices in [0, max_len] (0 maps to the all-zero padding row).
    doy = jax.random.randint(key, (B, N), minval=0, maxval=max_len + 1, dtype=jnp.int32)

    out = positional_encoding_forward(doy, d_model, max_len=max_len, T=T)
    out = jax.block_until_ready(out)

    # Pure-JAX reference of the torch forward semantics (table gather).
    pe = build_pe_table(d_model, max_len=max_len, T=T)
    ref = jnp.take(pe, doy, axis=0).reshape(B, N, d_model, 1, 1)

    assert out.shape == (B, N, d_model, 1, 1), out.shape
    assert out.dtype == jnp.float32, out.dtype
    # sin/cos are recomputed in-kernel (Mosaic transcendentals) rather than
    # gathered from an XLA-built table, so allow a small transcendental tolerance.
    err = float(jnp.max(jnp.abs(out - ref)))
    assert jnp.allclose(out, ref, atol=1e-4, rtol=1e-5), f"max abs err {err}"

    print("KERNEL_OK")
</pallas_src>

<mosaic_0001>
module attributes {stable_mosaic.version = 11 : i64} {
  func.func @_doy_sincos_kernel(%arg0: i32, %arg1: memref<1x128xi32, #tpu.memory_space<vmem>>, %arg2: memref<1x32xf32, #tpu.memory_space<vmem>>, %arg3: memref<128x32xf32, #tpu.memory_space<vmem>>) attributes {dimension_semantics = [#tpu.dimension_semantics<parallel>], iteration_bounds = array<i64: 1>, scalar_prefetch = 0 : i64, scratch_operands = 0 : i64, tpu.core_type = #tpu.core_type<tc>, window_params = [{transform_indices = @transform_0, window_bounds = array<i64: 1, 128>}, {pipeline_mode = #tpu.pipeline_mode<synchronous>, transform_indices = @transform_1, window_bounds = array<i64: 1, 32>}, {transform_indices = @transform_2, window_bounds = array<i64: 128, 32>}]} {
    %c0 = arith.constant 0 : index
    %c0_0 = arith.constant 0 : index
    %0 = vector.load %arg1[%c0, %c0_0] : memref<1x128xi32, #tpu.memory_space<vmem>>, vector<1x128xi32>
    %c1_i32 = arith.constant 1 : i32
    %1 = vector.broadcast %c1_i32 : i32 to vector<1x128xi32>
    %2 = arith.subi %0, %1 : vector<1x128xi32>
    %3 = arith.sitofp %2 : vector<1x128xi32> to vector<1x128xf32>
    %cst = arith.constant 1.000000e+00 : f32
    %4 = vector.broadcast %cst : f32 to vector<1x32xf32>
    %cst_1 = arith.constant dense<0.000000e+00> : vector<128x32xf32>
    %5 = tpu.matmul %3, %4, %cst_1 {dimension_numbers = #tpu.dot_dimension_numbers<[0], [0], [1], [1], [0, 1, 1, 1], [], []>} : vector<1x128xf32>, vector<1x32xf32>, vector<128x32xf32> -> vector<128x32xf32>
    %c0_2 = arith.constant 0 : index
    %c0_3 = arith.constant 0 : index
    %6 = vector.load %arg2[%c0_2, %c0_3] : memref<1x32xf32, #tpu.memory_space<vmem>>, vector<1x32xf32>
    %7 = vector.broadcast %6 : vector<1x32xf32> to vector<128x32xf32>
    %8 = arith.mulf %5, %7 : vector<128x32xf32>
    %9 = tpu.iota {dimensions = array<i32: 1>} : vector<128x32xi32>
    %c2_i32 = arith.constant 2 : i32
    %c0_i32 = arith.constant 0 : i32
    %10 = arith.cmpi eq, %c2_i32, %c0_i32 : i32
    %c1_i32_4 = arith.constant 1 : i32
    %11 = arith.select %10, %c1_i32_4, %c2_i32 : i32
    %12 = vector.broadcast %11 : i32 to vector<128x32xi32>
    %13 = arith.remsi %9, %12 : vector<128x32xi32>
    %c0_i32_5 = arith.constant 0 : i32
    %14 = vector.broadcast %c0_i32_5 : i32 to vector<128x32xi32>
    %15 = arith.cmpi ne, %13, %14 : vector<128x32xi32>
    %c0_i32_6 = arith.constant 0 : i32
    %16 = vector.broadcast %c0_i32_6 : i32 to vector<128x32xi32>
    %17 = arith.cmpi slt, %13, %16 : vector<128x32xi32>
    %c0_i32_7 = arith.constant 0 : i32
    %18 = arith.cmpi slt, %11, %c0_i32_7 : i32
    %19 = vector.broadcast %18 : i1 to vector<128x32xi1>
    %20 = vector.broadcast %19 : vector<128x32xi1> to vector<128x32xi1>
    %21 = arith.xori %17, %20 : vector<128x32xi1>
    %22 = arith.andi %21, %15 : vector<128x32xi1>
    %23 = vector.broadcast %11 : i32 to vector<128x32xi32>
    %24 = arith.addi %13, %23 : vector<128x32xi32>
    %25 = arith.select %22, %24, %13 : vector<128x32xi1>, vector<128x32xi32>
    %c0_i32_8 = arith.constant 0 : i32
    %26 = vector.broadcast %c0_i32_8 : i32 to vector<128x32xi32>
    %27 = arith.cmpi eq, %25, %26 : vector<128x32xi32>
    %28 = math.sin %8 : vector<128x32xf32>
    %29 = math.cos %8 : vector<128x32xf32>
    %30 = arith.select %27, %28, %29 : vector<128x32xi1>, vector<128x32xf32>
    %cst_9 = arith.constant 0.000000e+00 : f32
    %31 = vector.broadcast %cst_9 : f32 to vector<128x32xf32>
    %32 = arith.cmpf oge, %5, %31 : vector<128x32xf32>
    %cst_10 = arith.constant 0.000000e+00 : f32
    %33 = vector.broadcast %cst_10 : f32 to vector<128x32xf32>
    %34 = arith.select %32, %30, %33 : vector<128x32xi1>, vector<128x32xf32>
    %c0_11 = arith.constant 0 : index
    %c0_12 = arith.constant 0 : index
    %35 = vector.load %arg3[%c0_11, %c0_12] : memref<128x32xf32, #tpu.memory_space<vmem>>, vector<128x32xf32>
    tpu.vector_store %arg3[%c0_11, %c0_12], %34 {strides = array<i32>} : memref<128x32xf32, #tpu.memory_space<vmem>>, vector<128x32xf32>,
    return
  }
  func.func @transform_0(%arg0: i32) -> (i32, i32) {
    %c0_i32 = arith.constant 0 : i32
    %c0_i32_0 = arith.constant 0 : i32
    return %arg0, %c0_i32 : i32, i32
  }
  func.func @transform_1(%arg0: i32) -> (i32, i32) {
    %c0_i32 = arith.constant 0 : i32
    %c0_i32_0 = arith.constant 0 : i32
    %c0_i32_1 = arith.constant 0 : i32
    return %c0_i32, %c0_i32_0 : i32, i32
  }
  func.func @transform_2(%arg0: i32) -> (i32, i32) {
    %c0_i32 = arith.constant 0 : i32
    %c0_i32_0 = arith.constant 0 : i32
    return %arg0, %c0_i32 : i32, i32
  }
}

</mosaic_0001>

<bundles_post_ra>
// kernel: tpu_custom_call.1
= control target key start
LH: loop header
LB: loop body
LE: loop exit
PB: predicated region body
PF: predicated region fallthrough
CT: control target
= control target key end

     0   :  { %7 = vsyncpa [#allocation3], 0  ;;  %s7604_s0 = inlined_call_operand.hbm [shape: s32[1,128], index: 0, kind: input, shape index: {}]   ;;  %s7605_s1 = inlined_call_operand.hbm [shape: f32[1,32], index: 1, kind: input, shape index: {}]   ;;  %s7606_s2 = inlined_call_operand.vmem [shape: f32[128,32], index: 2, kind: output, shape index: {}]  }
   0x1   :  { %s14_s11 = sshll.u32 %s7604_s0, 4  ;;  %s15_s11 = int_to_ptr.hbm [resolvable:$true] %s14_s11 }
   0x2   :  { %8 = vsyncpa [#allocation5], 0  ;;  %s5426_s12 = smov [#allocation2]   ;;  %s25_s16 = sshll.u32 %s7605_s1, 4  ;;  %s26_s16 = int_to_ptr.hbm [resolvable:$true] %s25_s16 }
   0x3   :  { %s16_s13 = sshll.u32 %s5426_s12, 4  ;;  %s5427_s17 = smov [#allocation4]   ;;  %s17_s13 = int_to_ptr.vmem [resolvable:$true] %s16_s13 }
   0x4   :  { %19 = dma.hbm_to_vmem [thread:$0]  %s15_s11, 16, %s17_s13, [#allocation3]  }
   0x5   :  { %s27_s18 = sshll.u32 %s5427_s17, 4  ;;  %s28_s18 = int_to_ptr.vmem [resolvable:$true] %s27_s18 }
   0x6   :  { %30 = dma.hbm_to_vmem [thread:$0]  %s26_s16, 16, %s28_s18, [#allocation5]  }
   0x7   :  { %5422 = dma.done.wait [#allocation3], 16  }
   0x8   :  { %5423 = vsyncadd [#allocation3], 4294967280 }
   0x9   :  { %5424 = dma.done.wait [#allocation5], 16  }
   0xa   :  { %5425 = vsyncadd [#allocation5], 4294967280  ;;  %vm123_vm0 = vcmask 1040384   ;;  %v5428_v0 = vmov 1.0   ;;  %v39_v1 = vld [vmem:[#allocation2] sm:$0x1] }
   0xb   :  { %5243 = vmatpush.msk.msra.mxu0 %vm123_vm0, %v5428_v0  ;;  %5356 = vmatpush.msk.msra.mxu1 %vm123_vm0, %v5428_v0  ;;  %v5242_v2 = vadd.s32 4294967295, %v39_v1  ;;  %vm74_vm1 = vcmask 7168   ;;  %v5473_v20 = vld [vmem:[#allocation4] ss:$0 sm:$0xff]  ;;  %v5429_v42 = vmov 683565275  }
   0xc   :  { %5357 = vmatpush.msk.msra.mxu2 %vm123_vm0, %v5428_v0  ;;  %5358 = vmatpush.msk.msra.mxu3 %vm123_vm0, %v5428_v0  ;;  %v5430_v44 = vmov 2475754826   ;;  %v5431_v48 = vmov 2131351028   ;;  %v5432_v51 = vmov 2102212464  }
   0xd   :  { %v41_v3 = vcvt.s32.f32 %v5242_v2  ;;  %v5433_v54 = vmov 920167782   ;;  %v5434_v57 = vmov 1326507024  }
   0xf   :  { %42 = vxpose.xlu0.b32.start.end [1/1] (short) %v41_v3, 128 }
  0xb3   :  { %v58_v4 = vpop.trf.xlu0 }
  0xb4   :  { %5244 = vmatmul.msk.f32.vlgmr.msra.gmra.mxu0 %vm74_vm1, %v58_v4 }
  0xbb   :  { %v59_v5 = vpop.trf.xlu0 }
  0xbc   :  { %5245 = vmatmul.msk.f32.gmra.mxu0 %vm74_vm1, %v59_v5 }
  0xc3   :  { %v60_v6 = vpop.trf.xlu0 }
  0xc4   :  { %5246 = vmatmul.msk.f32.gmra.mxu0 %vm74_vm1, %v60_v6 }
  0xcb   :  { %v61_v7 = vpop.trf.xlu0 }
  0xcc   :  { %5247 = vmatmul.msk.f32.gmra.mxu0 %vm74_vm1, %v61_v7 }
  0xd3   :  { %v62_v8 = vpop.trf.xlu0 }
  0xd4   :  { %5248 = vmatmul.msk.f32.vlgmr.msra.gmra.mxu1 %vm74_vm1, %v62_v8 }
  0xdb   :  { %v63_v9 = vpop.trf.xlu0 }
  0xdc   :  { %5249 = vmatmul.msk.f32.gmra.mxu1 %vm74_vm1, %v63_v9 }
  0xe3   :  { %v64_v10 = vpop.trf.xlu0 }
  0xe4   :  { %5250 = vmatmul.msk.f32.gmra.mxu1 %vm74_vm1, %v64_v10 }
  0xeb   :  { %v65_v11 = vpop.trf.xlu0 }
  0xec   :  { %5251 = vmatmul.msk.f32.gmra.mxu1 %vm74_vm1, %v65_v11 }
  0xf3   :  { %v66_v12 = vpop.trf.xlu0 }
  0xf4   :  { %5252 = vmatmul.msk.f32.vlgmr.msra.gmra.mxu2 %vm74_vm1, %v66_v12 }
  0xfb   :  { %v67_v13 = vpop.trf.xlu0 }
  0xfc   :  { %5253 = vmatmul.msk.f32.gmra.mxu2 %vm74_vm1, %v67_v13 }
 0x103   :  { %v68_v14 = vpop.trf.xlu0 }
 0x104   :  { %5254 = vmatmul.msk.f32.gmra.mxu2 %vm74_vm1, %v68_v14 }
 0x10b   :  { %v69_v15 = vpop.trf.xlu0 }
 0x10c   :  { %5255 = vmatmul.msk.f32.gmra.mxu2 %vm74_vm1, %v69_v15 }
 0x113   :  { %v70_v16 = vpop.trf.xlu0 }
 0x114   :  { %5256 = vmatmul.msk.f32.vlgmr.msra.gmra.mxu3 %vm74_vm1, %v70_v16 }
 0x11b   :  { %v71_v17 = vpop.trf.xlu0 }
 0x11c   :  { %5257 = vmatmul.msk.f32.gmra.mxu3 %vm74_vm1, %v71_v17 }
 0x123   :  { %v72_v18 = vpop.trf.xlu0 }
 0x124   :  { %5258 = vmatmul.msk.f32.gmra.mxu3 %vm74_vm1, %v72_v18 }
 0x12b   :  { %v73_v19 = vpop.trf.xlu0 }
 0x12c   :  { %5259 = vmatmul.msk.f32.gmra.mxu3 %vm74_vm1, %v73_v19 }
 0x131   :  { %v5475_v21 = vpop.f32.mrf.mxu0 }
 0x132   :  { %v5479_v22 = vmul.f32 %v5473_v20, %v5475_v21 }
 0x134   :  { %v227_v23 = vand.u32 2147483647, %v5479_v22  ;;  %v230_v24 = vand.u32 2139095040, %v5479_v22 }
 0x136   :  { %v231_v25 = vshrl.u32 %v230_v24, 23  ;;  %v234_v26 = vand.u32 8388607, %v227_v23 }
 0x138   :  { %v5260_v27 = vadd.s32 4294967169, %v231_v25  ;;  %v235_v28 = vor.u32 8388608, %v234_v26 }
 0x139   :  { %v5485_v29 = vpop.f32.mrf.mxu0 }
 0x13a   :  { %v237_v30 = vadd.s32 1, %v5260_v27  ;;  %v5489_v31 = vmul.f32 %v5473_v20, %v5485_v29  ;;  %v5491_v32 = vshll.u32 %v235_v28, 8 }
 0x13c   :  { %vm238_vm2 = vcmp.gt.s32.totalorder %v237_v30, 0  ;;  %v382_v34 = vand.u32 2147483647, %v5489_v31  ;;  %v385_v35 = vand.u32 2139095040, %v5489_v31  ;;  %v276_v38 = vand.u32 65535, %v5491_v32 }
 0x13d   :  { %v239_v33 = vsel %vm238_vm2, %v237_v30, 0  ;;  %v277_v39 = vshrl.u32 %v5491_v32, 16 }
 0x13e   :  { %v241_v36 = vand.u32 31, %v239_v33  ;;  %v386_v40 = vshrl.u32 %v385_v35, 23  ;;  %v240_v41 = vshrl.u32 %v239_v33, 5  ;;  %v5501_v46 = vand.u32 8388607, %v382_v34 }
 0x140   :  { %v242_v37 = vsub.s32 32, %v241_v36  ;;  %v244_v43 = vshll.u32 %v5429_v42, %v241_v36  ;;  %v247_v45 = vshll.u32 %v5430_v44, %v241_v36  ;;  %v250_v50 = vshll.u32 %v5431_v48, %v241_v36 }
 0x141   :  { %v253_v53 = vshll.u32 %v5432_v51, %v241_v36  ;;  %v256_v56 = vshll.u32 %v5433_v54, %v241_v36  ;;  %v5263_v62 = vadd.s32 4294967169, %v386_v40  ;;  %vm259_vm3 = vcmp.lt.s32.totalorder %v240_v41, 1 }
 0x142   :  { %v245_v47 = vshrl.u32 %v5430_v44, %v242_v37  ;;  %v248_v49 = vshrl.u32 %v5431_v48, %v242_v37  ;;  %v251_v52 = vshrl.u32 %v5432_v51, %v242_v37  ;;  %v254_v55 = vshrl.u32 %v5433_v54, %v242_v37 }
 0x143   :  { %v257_v58 = vshrl.u32 %v5434_v57, %v242_v37  ;;  %vm262_vm4 = vcmp.lt.s32.totalorder %v240_v41, 4  ;;  %v243_v1 = vshrl.u32 %v5429_v42, %v242_v37  ;;  %vm261_vm5 = vcmp.lt.s32.totalorder %v240_v41, 3 }
 0x144   :  { %v246_v59 = vor.u32 %v245_v47, %v244_v43  ;;  %v249_v60 = vor.u32 %v248_v49, %v247_v45  ;;  %v252_v61 = vor.u32 %v251_v52, %v250_v50  ;;  %v255_v63 = vor.u32 %v254_v55, %v253_v53 }
 0x145   :  { %v258_v0 = vor.u32 %v257_v58, %v256_v56  ;;  %v392_v7 = vadd.s32 1, %v5263_v62  ;;  %vm260_vm6 = vcmp.lt.s32.totalorder %v240_v41, 2  ;;  %v390_v18 = vor.u32 8388608, %v5501_v46 }
 0x146   :  { %v264_v2 = vsel %vm262_vm4, %v252_v61, 2102212464  ;;  %v267_v3 = vsel %vm259_vm3, %v246_v59, %v249_v60  ;;  %v271_v4 = vsel %vm259_vm3, %v249_v60, %v252_v61  ;;  %v268_v5 = vsel %vm262_vm4, %v255_v63, 920167782 }
 0x147   :  { %v272_v6 = vsel %vm262_vm4, %v258_v0, 1326507024  ;;  %v263_v8 = vsel %vm259_vm3, %v243_v1, %v246_v59  ;;  %v269_v9 = vsel %vm261_vm5, %v252_v61, %v268_v5  ;;  %v265_v11 = vsel %vm261_vm5, %v249_v60, %v264_v2 }
 0x148   :  { %v273_v10 = vsel %vm261_vm5, %v255_v63, %v272_v6  ;;  %v270_v12 = vsel %vm260_vm6, %v267_v3, %v269_v9  ;;  %vm393_vm7 = vcmp.gt.s32.totalorder %v392_v7, 0  ;;  %v5513_v19 = vsel %vm260_vm6, %v263_v8, %v265_v11 }
 0x149   :  { %v274_v13 = vsel %vm260_vm6, %v271_v4, %v273_v10  ;;  %v300_v16 = vand.u32 65535, %v270_v12  ;;  %v301_v17 = vshrl.u32 %v270_v12, 16  ;;  %v394_v26 = vsel %vm393_vm7, %v392_v7, 0 }
 0x14a   :  { %v278_v14 = vand.u32 65535, %v274_v13  ;;  %v279_v15 = vshrl.u32 %v274_v13, 16  ;;  %v396_v50 = vand.u32 31, %v394_v26  ;;  %v5435_v52 = vmov 0  }
 0x14b   :  { %v303_v30 = vmul.u32 %v301_v17, %v276_v38  ;;  %v304_v33 = vmul.u32 %v300_v16, %v277_v39  ;;  %v302_v37 = vmul.u32 %v300_v16, %v276_v38  ;;  %v305_v40 = vmul.u32 %v301_v17, %v277_v39 }
 0x14c   :  { %v281_v24 = vmul.u32 %v279_v15, %v276_v38  ;;  %v282_v25 = vmul.u32 %v278_v14, %v277_v39  ;;  %v280_v27 = vmul.u32 %v278_v14, %v276_v38  ;;  %v283_v28 = vmul.u32 %v279_v15, %v277_v39 }
 0x14d   :  { %v306_v45 = vshll.u32 %v303_v30, 16  ;;  %v307_v47 = vshrl.u32 %v303_v30, 16  ;;  %v308_v46 = vshll.u32 %v304_v33, 16  ;;  %v309_v55 = vshrl.u32 %v304_v33, 16 }
 0x14e   :  { %v284_v35 = vshll.u32 %v281_v24, 16  ;;  %v285_v36 = vshrl.u32 %v281_v24, 16  ;;  %v286_v41 = vshll.u32 %v282_v25, 16  ;;  %v287_v43 = vshrl.u32 %v282_v25, 16 }
 0x14f   :  { %vm310_vm9 = vc.u32 %v302_v37, %v306_v45  ;;  %v312_v56 = vadd.s32 %v306_v45, %v302_v37  ;;  %v5517_v38 = vsub.s32 32, %v396_v50  ;;  %v5520_v61 = vshrl.u32 %v394_v26, 5 }
 0x150   :  { %vm288_vm8 = vc.u32 %v280_v27, %v284_v35  ;;  %v290_v49 = vadd.s32 %v284_v35, %v280_v27  ;;  %v311_v59 = vsel %vm310_vm9, 1, %v5435_v52  ;;  %v399_v1 = vshll.u32 %v5429_v42, %v396_v50 }
 0x151   :  { %v289_v53 = vsel %vm288_vm8, 1, %v5435_v52  ;;  %v313_v60 = vadd.s32 %v311_v59, %v305_v40  ;;  %vm314_vm11 = vc.u32 %v312_v56, %v308_v46  ;;  %v5523_v0 = vadd.s32 %v312_v56, %v308_v46 }
 0x152   :  { %v291_v58 = vadd.s32 %v289_v53, %v283_v28  ;;  %vm292_vm10 = vc.u32 %v290_v49, %v286_v41  ;;  %v315_v63 = vsel %vm314_vm11, 1, %v5435_v52  ;;  %v400_v3 = vshrl.u32 %v5430_v44, %v5517_v38  ;;  %v5581_v53 = vpop.f32.mrf.mxu0 }
 0x153   :  { %v293_v39 = vsel %vm292_vm10, 1, %v5435_v52  ;;  %v317_v2 = vadd.s32 %v315_v63, %v313_v60  ;;  %v402_v4 = vshll.u32 %v5430_v44, %v396_v50  ;;  %v403_v5 = vshrl.u32 %v5431_v48, %v5517_v38 }
 0x154   :  { %v295_v62 = vadd.s32 %v293_v39, %v291_v58  ;;  %v405_v7 = vshll.u32 %v5431_v48, %v396_v50  ;;  %v406_v8 = vshrl.u32 %v5432_v51, %v5517_v38  ;;  %v408_v9 = vshll.u32 %v5432_v51, %v396_v50 }
 0x155   :  { %v318_v10 = vadd.s32 %v317_v2, %v307_v47  ;;  %v5535_v11 = vor.u32 %v400_v3, %v399_v1  ;;  %v5537_v12 = vor.u32 %v403_v5, %v402_v4  ;;  %v409_v13 = vshrl.u32 %v5433_v54, %v5517_v38 }
 0x156   :  { %v296_v6 = vadd.s32 %v295_v62, %v285_v36  ;;  %v5543_v15 = vor.u32 %v406_v8, %v405_v7  ;;  %v411_v16 = vshll.u32 %v5433_v54, %v396_v50  ;;  %v412_v17 = vshrl.u32 %v5434_v57, %v5517_v38 }
 0x157   :  { %v319_v24 = vadd.s32 %v318_v10, %v309_v55  ;;  %v410_v25 = vor.u32 %v409_v13, %v408_v9  ;;  %vm414_vm13 = vcmp.lt.s32.totalorder %v5520_v61, 1  ;;  %v5551_v27 = vshll.u32 %v390_v18, 8 }
 0x158   :  { %v5541_v14 = vadd.s32 %v296_v6, %v287_v43  ;;  %v413_v26 = vor.u32 %v412_v17, %v411_v16  ;;  %v320_v28 = vmul.u32 %v5491_v32, %v5513_v19  ;;  %vm417_vm14 = vcmp.lt.s32.totalorder %v5520_v61, 4 }
 0x159   :  { %v323_v30 = vadd.s32 1, %v319_v24  ;;  %v422_v33 = vsel %vm414_vm13, %v5535_v11, %v5537_v12  ;;  %vm416_vm15 = vcmp.lt.s32.totalorder %v5520_v61, 3  ;;  %v423_v35 = vsel %vm417_vm14, %v410_v25, 920167782 }
 0x15a   :  { %vm322_vm12 = vc.u32 %v5541_v14, %v5523_v0  ;;  %v426_v18 = vsel %vm414_vm13, %v5537_v12, %v5543_v15  ;;  %v427_v32 = vsel %vm417_vm14, %v413_v26, 1326507024  ;;  %vm415_vm0 = vcmp.lt.s32.totalorder %v5520_v61, 2 }
 0x15b   :  { %v324_v19 = vsel %vm322_vm12, %v323_v30, %v319_v24  ;;  %v424_v36 = vsel %vm416_vm15, %v5543_v15, %v423_v35  ;;  %v428_v37 = vsel %vm416_vm15, %v410_v25, %v427_v32  ;;  %v431_v45 = vand.u32 65535, %v5551_v27 }
 0x15c   :  { %v325_v40 = vadd.s32 %v324_v19, %v320_v28  ;;  %v425_v41 = vsel %vm415_vm0, %v422_v33, %v424_v36  ;;  %v429_v43 = vsel %vm415_vm0, %v426_v18, %v428_v37  ;;  %v432_v47 = vshrl.u32 %v5551_v27, 16 }
 0x15d   :  { %v433_v49 = vand.u32 65535, %v429_v43  ;;  %v434_v46 = vshrl.u32 %v429_v43, 16  ;;  %v456_v50 = vshrl.u32 %v425_v41, 16  ;;  %v455_v59 = vand.u32 65535, %v425_v41 }
 0x15e   :  { %v326_v55 = vadd.s32 536870912, %v325_v40  ;;  %v5587_v62 = vmul.f32 %v5473_v20, %v5581_v53  ;;  %v212_v30 = vlaneseq  ;;  %vm229_vm5 = vcmp.lt.s32.totalorder %v5479_v22, 0 }
 0x15f   :  { %v436_v56 = vmul.u32 %v434_v46, %v431_v45  ;;  %v437_v58 = vmul.u32 %v433_v49, %v432_v47  ;;  %v458_v60 = vmul.u32 %v456_v50, %v431_v45  ;;  %v435_v63 = vmul.u32 %v433_v49, %v431_v45 }
 0x160   :  { %v5583_v39 = vshrl.u32 %v326_v55, 30  ;;  %v438_v3 = vmul.u32 %v434_v46, %v432_v47  ;;  %v457_v7 = vmul.u32 %v455_v59, %v431_v45  ;;  %v459_v10 = vmul.u32 %v455_v59, %v432_v47 }
 0x161   :  { %v439_v1 = vshll.u32 %v436_v56, 16  ;;  %v461_v4 = vshll.u32 %v458_v60, 16  ;;  %v441_v5 = vshll.u32 %v437_v58, 16  ;;  %v540_v13 = vand.u32 2139095040, %v5587_v62 }
 0x162   :  { %v328_v2 = vshll.u32 %v5583_v39, 30  ;;  %v460_v25 = vmul.u32 %v456_v50, %v432_v47  ;;  %v463_v35 = vshll.u32 %v459_v10, 16  ;;  %v440_v19 = vshrl.u32 %v436_v56, 16 }
 0x163   :  { %vm443_vm1 = vc.u32 %v435_v63, %v439_v1  ;;  %v445_v6 = vadd.s32 %v439_v1, %v435_v63  ;;  %vm465_vm3 = vc.u32 %v457_v7, %v461_v4  ;;  %v467_v28 = vadd.s32 %v461_v4, %v457_v7 }
 0x164   :  { %v329_v8 = vsub.s32 %v325_v40, %v328_v2  ;;  %v444_v9 = vsel %vm443_vm1, 1, %v5435_v52  ;;  %v466_v26 = vsel %vm465_vm3, 1, %v5435_v52  ;;  %v541_v18 = vshrl.u32 %v540_v13, 23 }
 0x165   :  { %v446_v16 = vadd.s32 %v444_v9, %v438_v3  ;;  %vm447_vm2 = vc.u32 %v445_v6, %v441_v5  ;;  %v468_v37 = vadd.s32 %v466_v26, %v460_v25  ;;  %v398_v40 = vshrl.u32 %v5429_v42, %v5517_v38 }
 0x166   :  { %vm330_vm4 = vcmp.lt.s32.totalorder %v329_v8, 0  ;;  %v331_v17 = vsub.s32 0, %v329_v8  ;;  %v448_v24 = vsel %vm447_vm2, 1, %v5435_v52  ;;  %v419_v41 = vsel %vm417_vm14, %v5543_v15, 2102212464 }
 0x167   :  { %v450_v36 = vadd.s32 %v448_v24, %v446_v16  ;;  %vm469_vm6 = vc.u32 %v467_v28, %v463_v35  ;;  %v442_v45 = vshrl.u32 %v437_v58, 16  ;;  %v418_v46 = vsel %vm414_vm13, %v398_v40, %v5535_v11 }
 0x168   :  { %v332_v33 = vsel %vm330_vm4, %v331_v17, %v329_v8  ;;  %v470_v49 = vsel %vm469_vm6, 1, %v5435_v52  ;;  %v462_v50 = vshrl.u32 %v458_v60, 16  ;;  %v5266_v56 = vadd.s32 4294967169, %v541_v18 }
 0x169   :  { %v333_v32 = vclz %v332_v33  ;;  %v451_v47 = vadd.s32 %v450_v36, %v440_v19  ;;  %v472_v55 = vadd.s32 %v470_v49, %v468_v37  ;;  %v351_v38 = vsub.s32 4, %v5583_v39 }
 0x16a   :  { %v420_v15 = vsel %vm416_vm15, %v5537_v12, %v419_v41  ;;  %v464_v63 = vshrl.u32 %v459_v10, 16  ;;  %v547_v2 = vadd.s32 1, %v5266_v56  ;;  %v321_v3 = vadd.s32 %v5523_v0, %v5541_v14 }
 0x16b   :  { %v5261_v43 = vadd.s32 4294967294, %v333_v32  ;;  %v5608_v59 = vadd.s32 %v451_v47, %v442_v45  ;;  %v473_v1 = vadd.s32 %v472_v55, %v462_v50  ;;  %v5612_v4 = vadd.s32 %v467_v28, %v463_v35 }
 0x16c   :  { %v421_v6 = vsel %vm415_vm0, %v418_v46, %v420_v15  ;;  %vm548_vm8 = vcmp.gt.s32.totalorder %v547_v2, 0  ;;  %v352_v0 = vsel %vm229_vm5, %v351_v38, %v5583_v39  ;;  %v5621_v16 = vand.u32 127, %v212_v30 }
 0x16d   :  { %vm5262_vm7 = vcmp.lt.s32.totalorder %v5261_v43, 0  ;;  %v474_v7 = vadd.s32 %v473_v1, %v464_v63  ;;  %vm477_vm9 = vc.u32 %v5608_v59, %v5612_v4  ;;  %v549_v10 = vsel %vm548_vm8, %v547_v2, 0 }
 0x16e   :  { %v336_v58 = vsel %vm5262_vm7, 0, %v5261_v43  ;;  %v551_v13 = vand.u32 31, %v549_v10  ;;  %v475_v61 = vmul.u32 %v5551_v27, %v421_v6  ;;  %vm5626_vm10 = vcmp.le.f32.partialorder %v227_v23, 0.7853982  ;;  %v5666_v6 = vpop.f32.mrf.mxu0 }
 0x16f   :  { %v337_v11 = vsub.s32 32, %v336_v58  ;;  %v341_v60 = vsub.s32 4294967266, %v336_v58  ;;  %v338_v5 = vshll.u32 %v329_v8, %v336_v58  ;;  %v478_v14 = vadd.s32 1, %v474_v7 }
 0x170   :  { %v537_v26 = vand.u32 2147483647, %v5587_v62  ;;  %v5631_v28 = vsub.s32 32, %v551_v13  ;;  %v354_v30 = vsel %vm5626_vm10, 0, %v352_v0  ;;  %v218_v35 = vand.u32 1, %v5621_v16 }
 0x171   :  { %v339_v12 = vshrl.u32 %v321_v3, %v337_v11  ;;  %v342_v9 = vadd.s32 127, %v341_v60  ;;  %v479_v25 = vsel %vm477_vm9, %v478_v14, %v474_v7  ;;  %v371_v19 = vadd.s32 3, %v354_v30 }
 0x172   :  { %v480_v33 = vadd.s32 %v479_v25, %v475_v61  ;;  %v544_v23 = vand.u32 8388607, %v537_v26  ;;  %v555_v36 = vshrl.u32 %v5430_v44, %v5631_v28  ;;  %v564_v37 = vshrl.u32 %v5433_v54, %v5631_v28 }
 0x173   :  { %v340_v8 = vor.u32 %v339_v12, %v338_v5  ;;  %v343_v17 = vshll.u32 %v342_v9, 23  ;;  %v563_v43 = vshll.u32 %v5432_v51, %v551_v13  ;;  %v567_v45 = vshrl.u32 %v5434_v57, %v5631_v28 }
 0x174   :  { %v481_v32 = vadd.s32 536870912, %v480_v33  ;;  %v5647_v47 = vshrl.u32 %v549_v10, 5  ;;  %v554_v49 = vshll.u32 %v5429_v42, %v551_v13  ;;  %v558_v46 = vshrl.u32 %v5431_v48, %v5631_v28 }
 0x175   :  { %v344_v39 = vor.u32 4788187, %v343_v17  ;;  %v347_v27 = vcvt.s32.f32 %v340_v8  ;;  %v561_v50 = vshrl.u32 %v5432_v51, %v5631_v28  ;;  %v565_v38 = vor.u32 %v564_v37, %v563_v43 }
 0x176   :  { %v5642_v41 = vshrl.u32 %v481_v32, 30  ;;  %v566_v15 = vshll.u32 %v5433_v54, %v551_v13  ;;  %v5656_v58 = vand.u32 3, %v354_v30  ;;  %v545_v63 = vor.u32 8388608, %v544_v23 }
 0x177   :  { %v345_v18 = vand.u32 2147483647, %v344_v39  ;;  %v557_v1 = vshll.u32 %v5430_v44, %v551_v13  ;;  %v560_v2 = vshll.u32 %v5431_v48, %v551_v13  ;;  %v5664_v60 = vor.u32 %v555_v36, %v554_v49 }
 0x178   :  { %v483_v56 = vshll.u32 %v5642_v41, 30  ;;  %v568_v5 = vor.u32 %v567_v45, %v566_v15  ;;  %vm572_vm11 = vcmp.lt.s32.totalorder %v5647_v47, 4  ;;  %vm569_vm13 = vcmp.lt.s32.totalorder %v5647_v47, 1 }
 0x179   :  { %v348_v40 = vmul.f32 %v347_v27, %v345_v18  ;;  %v5673_v12 = vor.u32 %v558_v46, %v557_v1  ;;  %v5675_v9 = vor.u32 %v561_v50, %v560_v2  ;;  %v578_v14 = vsel %vm572_vm11, %v565_v38, 920167782 }
 0x17a   :  { %v5662_v11 = vsub.s32 %v480_v33, %v483_v56  ;;  %vm7608_vm14 = vcmp.lt.s32.totalorder %v5647_v47, 3  ;;  %v5686_v13 = vshll.u32 %v545_v63, 8  ;;  %v5690_v8 = vmul.f32 %v5473_v20, %v5666_v6 }
 0x17b   :  { %v349_v55 = vxor.u32 2147483648, %v348_v40  ;;  %v582_v25 = vsel %vm572_vm11, %v568_v5, 1326507024  ;;  %v577_v30 = vsel %vm569_vm13, %v5664_v60, %v5673_v12  ;;  %v579_v33 = vsel %vm7608_vm14, %v5675_v9, %v578_v14 }
 0x17c   :  { %vm485_vm12 = vcmp.lt.s32.totalorder %v5662_v11, 0  ;;  %v486_v0 = vsub.s32 0, %v5662_v11  ;;  %v581_v18 = vsel %vm569_vm13, %v5673_v12, %v5675_v9  ;;  %v5706_v23 = vand.u32 3, %v371_v19 }
 0x17d   :  { %v350_v3 = vsel %vm229_vm5, %v349_v55, %v348_v40  ;;  %v476_v36 = vadd.s32 %v5612_v4, %v5608_v59  ;;  %vm7607_vm15 = vcmp.lt.s32.totalorder %v5647_v47, 2  ;;  %v583_v40 = vsel %vm7608_vm14, %v565_v38, %v582_v25 }
 0x17e   :  { %v5671_v7 = vsel %vm5626_vm10, %v5479_v22, %v350_v3  ;;  %v487_v24 = vsel %vm485_vm12, %v486_v0, %v5662_v11  ;;  %v692_v43 = vand.u32 2147483647, %v5690_v8  ;;  %v5716_v46 = vsel %vm7607_vm15, %v577_v30, %v579_v33 }
 0x17f   :  { %v355_v10 = vmul.f32 %v5671_v7, %v5671_v7  ;;  %v488_v39 = vclz %v487_v24  ;;  %v584_v19 = vsel %vm7607_vm15, %v581_v18, %v583_v40  ;;  %v586_v59 = vand.u32 65535, %v5686_v13 }
 0x180   :  { %v588_v4 = vand.u32 65535, %v584_v19  ;;  %v589_v50 = vshrl.u32 %v584_v19, 16  ;;  %vm377_vm1 = vcmp.eq.s32.totalorder %v5706_v23, 2  ;;  %v587_v15 = vshrl.u32 %v5686_v13, 16 }
 0x181   :  { %v356_v17 = vmul.f32 -0.001358992, %v355_v10  ;;  %v363_v61 = vmul.f32 -0.00019511016, %v355_v10  ;;  %v5264_v37 = vadd.s32 4294967294, %v488_v39  ;;  %vm374_vm2 = vcmp.eq.s32.totalorder %v5706_v23, 0 }
 0x182   :  { %vm2853_vm3 = vcmp.eq.s32.totalorder %v5656_v58, 0  ;;  %vm2856_vm4 = vcmp.eq.s32.totalorder %v5656_v58, 2  ;;  %v506_v2 = vsub.s32 4, %v5642_v41  ;;  %v611_v3 = vshrl.u32 %v5716_v46, 16 }
 0x183   :  { %v357_v27 = vadd.f32 0.041655596, %v356_v17  ;;  %v364_v32 = vadd.f32 0.008332121, %v363_v61  ;;  %vm5265_vm0 = vcmp.lt.s32.totalorder %v5264_v37, 0  ;;  %vm5730_vm5 = vcmp.eq.s32.totalorder %v218_v35, 0 }
 0x184   :  { %v491_v38 = vsel %vm5265_vm0, 0, %v5264_v37  ;;  %vm373_vm6 = vcmp.lt.s32.totalorder %v5706_v23, 2  ;;  %vm2852_vm7 = vcmp.lt.s32.totalorder %v5656_v58, 2  ;;  %v591_v17 = vmul.u32 %v589_v50, %v586_v59 }
 0x185   :  { %v358_v45 = vmul.f32 %v357_v27, %v355_v10  ;;  %v365_v49 = vmul.f32 %v364_v32, %v355_v10  ;;  %v492_v63 = vsub.s32 32, %v491_v38  ;;  %v496_v1 = vsub.s32 4294967266, %v491_v38 }
 0x186   :  { %v610_v61 = vand.u32 65535, %v5716_v46  ;;  %vm370_vm8 = vweird.f32 %v5479_v22  ;;  %v493_v24 = vshll.u32 %v5662_v11, %v491_v38  ;;  %v5739_v16 = vmul.u32 %v588_v4, %v587_v15 }
 0x187   :  { %v359_v55 = vadd.f32 -0.4999988, %v358_v45  ;;  %v366_v56 = vadd.f32 -0.16666654, %v365_v49  ;;  %v494_v25 = vshrl.u32 %v476_v36, %v492_v63  ;;  %v497_v39 = vadd.s32 127, %v496_v1 }
 0x188   :  { %vm5219_vm9 = vcmask 261120   ;;  %v590_v33 = vmul.u32 %v588_v4, %v586_v59  ;;  %vm5187_vm10 = vcmp.ge.f32.partialorder %v5475_v21, 0.0  ;;  %v593_v32 = vmul.u32 %v589_v50, %v587_v15 }
 0x189   :  { %v360_v0 = vmul.f32 %v359_v55, %v355_v10  ;;  %v367_v14 = vmul.f32 %v366_v56, %v355_v10  ;;  %v594_v10 = vshll.u32 %v591_v17, 16  ;;  %v495_v18 = vor.u32 %v494_v25, %v493_v24 }
 0x18a   :  { %v498_v27 = vshll.u32 %v497_v39, 23  ;;  %v613_v37 = vmul.u32 %v611_v3, %v586_v59  ;;  %vm384_vm12 = vcmp.lt.s32.totalorder %v5489_v31, 0  ;;  %vm5746_vm15 = vcmp.le.f32.partialorder %v382_v34, 0.7853982 }
 0x18b   :  { %v361_v35 = vadd.f32 1.0, %v360_v0  ;;  %v368_v30 = vadd.f32 1.0, %v367_v14  ;;  %vm598_vm0 = vc.u32 %v590_v33, %v594_v10  ;;  %v600_v11 = vadd.s32 %v594_v10, %v590_v33 }
 0x18c   :  { %v499_v49 = vor.u32 4788187, %v498_v27  ;;  %v596_v46 = vshll.u32 %v5739_v16, 16  ;;  %v599_v19 = vsel %vm598_vm0, 1, %v5435_v52  ;;  %v612_v4 = vmul.u32 %v610_v61, %v586_v59 }
 0x18d   :  { %v369_v40 = vmul.f32 %v368_v30, %v5671_v7  ;;  %v378_v45 = vxor.u32 2147483648, %v361_v35  ;;  %v502_v55 = vcvt.s32.f32 %v495_v18  ;;  %v601_v7 = vadd.s32 %v599_v19, %v593_v32 }
 0x18e   :  { %v614_v56 = vmul.u32 %v610_v61, %v587_v15  ;;  %v500_v63 = vand.u32 2147483647, %v499_v49  ;;  %vm602_vm14 = vc.u32 %v600_v11, %v596_v46  ;;  %v616_v1 = vshll.u32 %v613_v37, 16 }
 0x18f   :  { %v375_v50 = vxor.u32 2147483648, %v369_v40  ;;  %v379_v38 = vsel %vm377_vm1, %v378_v45, %v369_v40  ;;  %v2858_v14 = vsel %vm2856_vm4, %v378_v45, %v369_v40  ;;  %v603_v59 = vsel %vm602_vm14, 1, %v5435_v52 }
 0x190   :  { %v503_v25 = vmul.f32 %v502_v55, %v500_v63  ;;  %v605_v39 = vadd.s32 %v603_v59, %v601_v7  ;;  %v595_v10 = vshrl.u32 %v591_v17, 16  ;;  %v615_v27 = vmul.u32 %v611_v3, %v587_v15 }
 0x191   :  { %v376_v34 = vsel %vm374_vm2, %v361_v35, %v375_v50  ;;  %v2855_v0 = vsel %vm2853_vm3, %v361_v35, %v375_v50  ;;  %v553_v35 = vshrl.u32 %v5429_v42, %v5631_v28  ;;  %vm620_vm14 = vc.u32 %v612_v4, %v616_v1 }
 0x192   :  { %v380_v61 = vsel %vm373_vm6, %v376_v34, %v379_v38  ;;  %v2859_v24 = vsel %vm2852_vm7, %v2855_v0, %v2858_v14  ;;  %v504_v23 = vxor.u32 2147483648, %v503_v25  ;;  %v618_v32 = vshll.u32 %v614_v56, 16 }
 0x193   :  { %v381_v30 = vsel %vm370_vm8, nan, %v380_v61  ;;  %v2860_v33 = vsel %vm370_vm8, nan, %v2859_v24  ;;  %v621_v40 = vsel %vm620_vm14, 1, %v5435_v52  ;;  %v622_v45 = vadd.s32 %v616_v1, %v612_v4 }
 0x194   :  { %v5171_v18 = vsel %vm5730_vm5, %v381_v30, %v2860_v33  ;;  %v505_v22 = vsel %vm384_vm12, %v504_v23, %v503_v25  ;;  %v507_v28 = vsel %vm384_vm12, %v506_v2, %v5642_v41  ;;  %v606_v21 = vadd.s32 %v605_v39, %v595_v10 }
 0x195   :  { %v5203_v58 = vsel %vm5187_vm10, %v5171_v18, 0.0  ;;  %v623_v15 = vadd.s32 %v621_v40, %v615_v27  ;;  %v508_v3 = vsel %vm5746_vm15, %v5489_v31, %v505_v22  ;;  %v574_v17 = vsel %vm572_vm11, %v5675_v9, 2102212464 }
 0x196   :  { %5220 = vst.msk [vmem:[%s7606_s2] sm:$0xff] %vm5219_vm9, %v5203_v58  ;;  %vm624_vm1 = vc.u32 %v622_v45, %v618_v32  ;;  %v695_v11 = vand.u32 2139095040, %v5690_v8  ;;  %v510_v49 = vmul.f32 %v508_v3, %v508_v3  ;;  %v573_v46 = vsel %vm569_vm13, %v553_v35, %v5664_v60 }
 0x197   :  { %v597_v41 = vshrl.u32 %v5739_v16, 16  ;;  %v625_v2 = vsel %vm624_vm1, 1, %v5435_v52  ;;  %v509_v19 = vsel %vm5746_vm15, 0, %v507_v28  ;;  %v617_v4 = vshrl.u32 %v613_v37, 16 }
 0x198   :  { %v627_v50 = vadd.s32 %v625_v2, %v623_v15  ;;  %v696_v55 = vshrl.u32 %v695_v11, 23  ;;  %v511_v7 = vmul.f32 -0.001358992, %v510_v49  ;;  %v518_v9 = vmul.f32 -0.00019511016, %v510_v49 }
 0x199   :  { %vm7616_vm11 = vcmp.lt.s32.totalorder %v5647_v47, 3  ;;  %v5804_v63 = vadd.s32 %v606_v21, %v597_v41  ;;  %v619_v1 = vshrl.u32 %v614_v56, 16  ;;  %v5806_v14 = vadd.s32 %v622_v45, %v618_v32  ;;  %v5815_v45 = vpop.f32.mrf.mxu1 }
 0x19a   :  { %v575_v38 = vsel %vm7616_vm11, %v5673_v12, %v574_v17  ;;  %v628_v60 = vadd.s32 %v627_v50, %v617_v4  ;;  %v5269_v34 = vadd.s32 4294967169, %v696_v55  ;;  %v512_v16 = vadd.f32 0.041655596, %v511_v7 }
 0x19b   :  { %v519_v0 = vadd.f32 0.008332121, %v518_v9  ;;  %v526_v36 = vadd.s32 3, %v509_v19  ;;  %vm7617_vm13 = vcmp.lt.s32.totalorder %v5647_v47, 2  ;;  %vm632_vm15 = vc.u32 %v5804_v63, %v5806_v14 }
 0x19c   :  { %v576_v37 = vsel %vm7617_vm13, %v573_v46, %v575_v38  ;;  %v629_v59 = vadd.s32 %v628_v60, %v619_v1  ;;  %v702_v61 = vadd.s32 1, %v5269_v34  ;;  %v513_v24 = vmul.f32 %v512_v16, %v510_v49 }
 0x19d   :  { %v520_v25 = vmul.f32 %v519_v0, %v510_v49  ;;  %v699_v12 = vand.u32 8388607, %v692_v43  ;;  %v3005_v56 = vand.u32 3, %v509_v19  ;;  %v630_v35 = vmul.u32 %v5686_v13, %v576_v37 }
 0x19e   :  { %v633_v39 = vadd.s32 1, %v629_v59  ;;  %vm703_vm2 = vcmp.gt.s32.totalorder %v702_v61, 0  ;;  %v514_v30 = vadd.f32 -0.4999988, %v513_v24  ;;  %v527_v47 = vand.u32 3, %v526_v36 }
 0x19f   :  { %v521_v33 = vadd.f32 -0.16666654, %v520_v25  ;;  %v704_v10 = vsel %vm703_vm2, %v702_v61, 0  ;;  %v700_v40 = vor.u32 8388608, %v699_v12  ;;  %vm525_vm3 = vweird.f32 %v5489_v31 }
 0x1a0   :  { %v634_v18 = vsel %vm632_vm15, %v633_v39, %v629_v59  ;;  %v706_v23 = vand.u32 31, %v704_v10  ;;  %v515_v27 = vmul.f32 %v514_v30, %v510_v49  ;;  %vm3006_vm4 = vcmp.lt.s32.totalorder %v3005_v56, 2 }
 0x1a1   :  { %v522_v58 = vmul.f32 %v521_v33, %v510_v49  ;;  %v635_v32 = vadd.s32 %v634_v18, %v630_v35  ;;  %vm3007_vm6 = vcmp.eq.s32.totalorder %v3005_v56, 0  ;;  %vm3010_vm7 = vcmp.eq.s32.totalorder %v3005_v56, 2 }
 0x1a2   :  { %v707_v22 = vsub.s32 32, %v706_v23  ;;  %v516_v28 = vadd.f32 1.0, %v515_v27  ;;  %vm528_vm8 = vcmp.lt.s32.totalorder %v527_v47, 2  ;;  %vm529_vm10 = vcmp.eq.s32.totalorder %v527_v47, 0 }
 0x1a3   :  { %v523_v21 = vadd.f32 1.0, %v522_v58  ;;  %v636_v15 = vadd.s32 536870912, %v635_v32  ;;  %vm532_vm12 = vcmp.eq.s32.totalorder %v527_v47, 2  ;;  %vm5188_vm0 = vcmp.ge.f32.partialorder %v5485_v29, 0.0 }
 0x1a4   :  { %v5821_v13 = vmul.f32 %v5473_v20, %v5815_v45  ;;  %v533_v11 = vxor.u32 2147483648, %v516_v28  ;;  %v5823_v46 = vshll.u32 %v700_v40, 8  ;;  %v5825_v41 = vshrl.u32 %v704_v10, 5 }
 0x1a5   :  { %v524_v17 = vmul.f32 %v523_v21, %v508_v3  ;;  %v637_v49 = vshrl.u32 %v636_v15, 30  ;;  %v709_v2 = vshll.u32 %v5429_v42, %v706_v23  ;;  %v710_v19 = vshrl.u32 %v5430_v44, %v707_v22 }
 0x1a6   :  { %v712_v4 = vshll.u32 %v5430_v44, %v706_v23  ;;  %v715_v7 = vshll.u32 %v5431_v48, %v706_v23  ;;  %v718_v20 = vshll.u32 %v5432_v51, %v706_v23  ;;  %v713_v3 = vshrl.u32 %v5431_v48, %v707_v22 }
 0x1a7   :  { %v530_v50 = vxor.u32 2147483648, %v524_v17  ;;  %v638_v55 = vshll.u32 %v637_v49, 30  ;;  %v534_v9 = vsel %vm532_vm12, %v533_v11, %v524_v17  ;;  %v716_v38 = vshrl.u32 %v5432_v51, %v707_v22 }
 0x1a8   :  { %v719_v1 = vshrl.u32 %v5433_v54, %v707_v22  ;;  %v3012_v16 = vsel %vm3010_vm7, %v533_v11, %v524_v17  ;;  %v711_v59 = vor.u32 %v710_v19, %v709_v2  ;;  %v722_v61 = vshrl.u32 %v5434_v57, %v707_v22 }
 0x1a9   :  { %v531_v60 = vsel %vm529_vm10, %v516_v28, %v530_v50  ;;  %v3009_v34 = vsel %vm3007_vm6, %v516_v28, %v530_v50  ;;  %v639_v0 = vsub.s32 %v635_v32, %v638_v55  ;;  %v714_v30 = vor.u32 %v713_v3, %v712_v4 }
 0x1aa   :  { %v535_v36 = vsel %vm528_vm8, %v531_v60, %v534_v9  ;;  %v3013_v37 = vsel %vm3006_vm4, %v3009_v34, %v3012_v16  ;;  %v720_v33 = vor.u32 %v719_v1, %v718_v20  ;;  %v721_v35 = vshll.u32 %v5433_v54, %v706_v23 }
 0x1ab   :  { %v536_v24 = vsel %vm525_vm3, nan, %v535_v36  ;;  %v3014_v25 = vsel %vm525_vm3, nan, %v3013_v37  ;;  %vm640_vm14 = vcmp.lt.s32.totalorder %v639_v0, 0  ;;  %v641_v12 = vsub.s32 0, %v639_v0 }
 0x1ac   :  { %v5172_v39 = vsel %vm5730_vm5, %v536_v24, %v3014_v25  ;;  %v717_v47 = vor.u32 %v716_v38, %v715_v7  ;;  %v850_v18 = vand.u32 2139095040, %v5821_v13  ;;  %vm5857_vm1 = vcmp.le.f32.partialorder %v537_v26, 0.7853982 }
 0x1ad   :  { %v5204_v56 = vsel %vm5188_vm0, %v5172_v39, 0.0  ;;  %v642_v10 = vsel %vm640_vm14, %v641_v12, %v639_v0  ;;  %vm539_vm11 = vcmp.lt.s32.totalorder %v5587_v62, 0  ;;  %v631_v29 = vadd.s32 %v5806_v14, %v5804_v63 }
 0x1ae   :  { %5221 = vst.msk [vmem:[%s7606_s2 + $0x8] sm:$0xff] %vm5219_vm9, %v5204_v56  ;;  %v643_v23 = vclz %v642_v10  ;;  %v723_v27 = vor.u32 %v722_v61, %v721_v35  ;;  %v661_v58 = vsub.s32 4, %v637_v49  ;;  %vm724_vm13 = vcmp.lt.s32.totalorder %v5825_v41, 1 }
 0x1af   :  { %vm727_vm15 = vcmp.lt.s32.totalorder %v5825_v41, 4  ;;  %v741_v32 = vand.u32 65535, %v5823_v46  ;;  %v732_v26 = vsel %vm724_vm13, %v711_v59, %v714_v30  ;;  %v742_v21 = vshrl.u32 %v5823_v46, 16 }
 0x1b0   :  { %v5267_v40 = vadd.s32 4294967294, %v643_v23  ;;  %v733_v28 = vsel %vm727_vm15, %v720_v33, 920167782  ;;  %v708_v63 = vshrl.u32 %v5429_v42, %v707_v22  ;;  %vm726_vm2 = vcmp.lt.s32.totalorder %v5825_v41, 3 }
 0x1b1   :  { %v736_v14 = vsel %vm724_vm13, %v714_v30, %v717_v47  ;;  %v851_v15 = vshrl.u32 %v850_v18, 23  ;;  %vm725_vm4 = vcmp.lt.s32.totalorder %v5825_v41, 2  ;;  %v734_v17 = vsel %vm726_vm2, %v717_v47, %v733_v28 }
 0x1b2   :  { %vm5268_vm3 = vcmp.lt.s32.totalorder %v5267_v40, 0  ;;  %v737_v11 = vsel %vm727_vm15, %v723_v27, 1326507024  ;;  %v662_v19 = vsel %vm539_vm11, %v661_v58, %v637_v49  ;;  %v735_v22 = vsel %vm725_vm4, %v732_v26, %v734_v17 }
 0x1b3   :  { %v646_v2 = vsel %vm5268_vm3, 0, %v5267_v40  ;;  %v738_v4 = vsel %vm726_vm2, %v720_v33, %v737_v11  ;;  %v729_v7 = vsel %vm727_vm15, %v717_v47, 2102212464  ;;  %v766_v38 = vshrl.u32 %v735_v22, 16 }
 0x1b4   :  { %v647_v50 = vsub.s32 32, %v646_v2  ;;  %v651_v55 = vsub.s32 4294967266, %v646_v2  ;;  %v739_v20 = vsel %vm725_vm4, %v736_v14, %v738_v4  ;;  %v5272_v1 = vadd.s32 4294967169, %v851_v15 }
 0x1b5   :  { %v743_v9 = vand.u32 65535, %v739_v20  ;;  %v744_v3 = vshrl.u32 %v739_v20, 16  ;;  %v648_v60 = vshll.u32 %v639_v0, %v646_v2  ;;  %v765_v16 = vand.u32 65535, %v735_v22 }
 0x1b6   :  { %v649_v49 = vshrl.u32 %v631_v29, %v647_v50  ;;  %v652_v34 = vadd.s32 127, %v651_v55  ;;  %v5893_v36 = vsel %vm5857_vm1, 0, %v662_v19  ;;  %v728_v37 = vsel %vm724_vm13, %v708_v63, %v711_v59 }
 0x1b7   :  { %v746_v61 = vmul.u32 %v744_v3, %v741_v32  ;;  %v747_v24 = vmul.u32 %v743_v9, %v742_v21  ;;  %v730_v39 = vsel %vm726_vm2, %v714_v30, %v729_v7  ;;  %v768_v33 = vmul.u32 %v766_v38, %v741_v32 }
 0x1b8   :  { %v650_v25 = vor.u32 %v649_v49, %v648_v60  ;;  %v653_v12 = vshll.u32 %v652_v34, 23  ;;  %v745_v35 = vmul.u32 %v743_v9, %v741_v32  ;;  %v748_v0 = vmul.u32 %v744_v3, %v742_v21 }
 0x1b9   :  { %v749_v56 = vshll.u32 %v746_v61, 16  ;;  %v857_v10 = vadd.s32 1, %v5272_v1  ;;  %v751_v18 = vshll.u32 %v747_v24, 16  ;;  %v767_v29 = vmul.u32 %v765_v16, %v741_v32 }
 0x1ba   :  { %v654_v47 = vor.u32 4788187, %v653_v12  ;;  %v769_v23 = vmul.u32 %v765_v16, %v742_v21  ;;  %v657_v27 = vcvt.s32.f32 %v650_v25  ;;  %v771_v59 = vshll.u32 %v768_v33, 16 }
 0x1bb   :  { %vm753_vm6 = vc.u32 %v745_v35, %v749_v56  ;;  %v755_v58 = vadd.s32 %v749_v56, %v745_v35  ;;  %v770_v28 = vmul.u32 %v766_v38, %v742_v21  ;;  %vm858_vm10 = vcmp.gt.s32.totalorder %v857_v10, 0 }
 0x1bc   :  { %v655_v40 = vand.u32 2147483647, %v654_v47  ;;  %v754_v26 = vsel %vm753_vm6, 1, %v5435_v52  ;;  %v773_v63 = vshll.u32 %v769_v23, 16  ;;  %vm775_vm8 = vc.u32 %v767_v29, %v771_v59 }
 0x1bd   :  { %v756_v14 = vadd.s32 %v754_v26, %v748_v0  ;;  %vm757_vm7 = vc.u32 %v755_v58, %v751_v18  ;;  %v777_v30 = vadd.s32 %v771_v59, %v767_v29  ;;  %v776_v11 = vsel %vm775_vm8, 1, %v5435_v52 }
 0x1be   :  { %v658_v15 = vmul.f32 %v657_v27, %v655_v40  ;;  %v758_v17 = vsel %vm757_vm7, 1, %v5435_v52  ;;  %v750_v32 = vshrl.u32 %v746_v61, 16  ;;  %v778_v19 = vadd.s32 %v776_v11, %v770_v28 }
 0x1bf   :  { %v760_v2 = vadd.s32 %v758_v17, %v756_v14  ;;  %vm779_vm12 = vc.u32 %v777_v30, %v773_v63  ;;  %v752_v4 = vshrl.u32 %v747_v24, 16  ;;  %v859_v21 = vsel %vm858_vm10, %v857_v10, 0 }
 0x1c0   :  { %v659_v22 = vxor.u32 2147483648, %v658_v15  ;;  %v780_v50 = vsel %vm779_vm12, 1, %v5435_v52  ;;  %v772_v7 = vshrl.u32 %v768_v33, 16  ;;  %v861_v9 = vand.u32 31, %v859_v21 }
 0x1c1   :  { %v761_v55 = vadd.s32 %v760_v2, %v750_v32  ;;  %v782_v20 = vadd.s32 %v780_v50, %v778_v19  ;;  %v731_v38 = vsel %vm725_vm4, %v728_v37, %v730_v39  ;;  %v774_v1 = vshrl.u32 %v769_v23, 16 }
 0x1c2   :  { %v660_v3 = vsel %vm539_vm11, %v659_v22, %v658_v15  ;;  %v5907_v60 = vadd.s32 %v777_v30, %v773_v63  ;;  %v5914_v61 = vsub.s32 32, %v861_v9  ;;  %v681_v25 = vadd.s32 3, %v5893_v36 }
 0x1c3   :  { %v663_v49 = vsel %vm5857_vm1, %v5587_v62, %v660_v3  ;;  %v5912_v34 = vadd.s32 %v761_v55, %v752_v4  ;;  %v783_v16 = vadd.s32 %v782_v20, %v772_v7  ;;  %v847_v12 = vand.u32 2147483647, %v5821_v13 }
 0x1c4   :  { %v665_v24 = vmul.f32 %v663_v49, %v663_v49  ;;  %v785_v41 = vmul.u32 %v5823_v46, %v731_v38  ;;  %v5921_v37 = vshrl.u32 %v859_v21, 5  ;;  %v865_v35 = vshrl.u32 %v5430_v44, %v5914_v61 }
 0x1c5   :  { %v784_v33 = vadd.s32 %v783_v16, %v774_v1  ;;  %vm787_vm0 = vc.u32 %v5912_v34, %v5907_v60  ;;  %v868_v0 = vshrl.u32 %v5431_v48, %v5914_v61  ;;  %v871_v10 = vshrl.u32 %v5432_v51, %v5914_v61 }
 0x1c6   :  { %v666_v31 = vmul.f32 -0.001358992, %v665_v24  ;;  %v673_v39 = vmul.f32 -0.00019511016, %v665_v24  ;;  %v873_v47 = vshll.u32 %v5432_v51, %v861_v9  ;;  %v874_v46 = vshrl.u32 %v5433_v54, %v5914_v61 }
 0x1c7   :  { %v788_v56 = vadd.s32 1, %v784_v33  ;;  %v864_v23 = vshll.u32 %v5429_v42, %v861_v9  ;;  %v867_v27 = vshll.u32 %v5430_v44, %v861_v9  ;;  %v870_v59 = vshll.u32 %v5431_v48, %v861_v9 }
 0x1c8   :  { %v667_v18 = vadd.f32 0.041655596, %v666_v31  ;;  %v674_v29 = vadd.f32 0.008332121, %v673_v39  ;;  %v875_v40 = vor.u32 %v874_v46, %v873_v47  ;;  %v876_v26 = vshll.u32 %v5433_v54, %v861_v9 }
 0x1c9   :  { %v789_v58 = vsel %vm787_vm0, %v788_v56, %v784_v33  ;;  %v877_v30 = vshrl.u32 %v5434_v57, %v5914_v61  ;;  %v5938_v15 = vor.u32 %v865_v35, %v864_v23  ;;  %v5940_v17 = vor.u32 %v868_v0, %v867_v27 }
 0x1ca   :  { %v668_v28 = vmul.f32 %v667_v18, %v665_v24  ;;  %v675_v63 = vmul.f32 %v674_v29, %v665_v24  ;;  %v790_v14 = vadd.s32 %v789_v58, %v785_v41  ;;  %v5942_v11 = vor.u32 %v871_v10, %v870_v59 }
 0x1cb   :  { %vm882_vm14 = vcmp.lt.s32.totalorder %v5921_v37, 4  ;;  %v878_v22 = vor.u32 %v877_v30, %v876_v26  ;;  %v3159_v4 = vand.u32 3, %v5893_v36  ;;  %v854_v50 = vand.u32 8388607, %v847_v12 }
 0x1cc   :  { %v669_v32 = vadd.f32 -0.4999988, %v668_v28  ;;  %v676_v2 = vadd.f32 -0.16666654, %v675_v63  ;;  %v791_v19 = vadd.s32 536870912, %v790_v14  ;;  %vm879_vm1 = vcmp.lt.s32.totalorder %v5921_v37, 1 }
 0x1cd   :  { %v888_v21 = vsel %vm882_vm14, %v875_v40, 920167782  ;;  %vm881_vm11 = vcmp.lt.s32.totalorder %v5921_v37, 3  ;;  %vm680_vm13 = vweird.f32 %v5587_v62  ;;  %v682_v9 = vand.u32 3, %v681_v25 }
 0x1ce   :  { %v670_v55 = vmul.f32 %v669_v32, %v665_v24  ;;  %v677_v7 = vmul.f32 %v676_v2, %v665_v24  ;;  %v5951_v20 = vshrl.u32 %v791_v19, 30  ;;  %v887_v36 = vsel %vm879_vm1, %v5938_v15, %v5940_v17 }
 0x1cf   :  { %v889_v3 = vsel %vm881_vm11, %v5942_v11, %v888_v21  ;;  %v892_v38 = vsel %vm882_vm14, %v878_v22, 1326507024  ;;  %v891_v25 = vsel %vm879_vm1, %v5940_v17, %v5942_v11  ;;  %vm3160_vm15 = vcmp.lt.s32.totalorder %v3159_v4, 2 }
 0x1d0   :  { %v671_v1 = vadd.f32 1.0, %v670_v55  ;;  %v678_v16 = vadd.f32 1.0, %v677_v7  ;;  %v793_v24 = vshll.u32 %v5951_v20, 30  ;;  %v855_v33 = vor.u32 8388608, %v854_v50 }
 0x1d1   :  { %vm880_vm2 = vcmp.lt.s32.totalorder %v5921_v37, 2  ;;  %v893_v41 = vsel %vm881_vm11, %v875_v40, %v892_v38  ;;  %vm683_vm3 = vcmp.lt.s32.totalorder %v682_v9, 2  ;;  %vm3161_vm4 = vcmp.eq.s32.totalorder %v3159_v4, 0 }
 0x1d2   :  { %v679_v31 = vmul.f32 %v678_v16, %v663_v49  ;;  %v688_v39 = vxor.u32 2147483648, %v671_v1  ;;  %v5972_v35 = vsub.s32 %v790_v14, %v793_v24  ;;  %v890_v0 = vsel %vm880_vm2, %v887_v36, %v889_v3 }
 0x1d3   :  { %vm3164_vm6 = vcmp.eq.s32.totalorder %v3159_v4, 2  ;;  %v894_v56 = vsel %vm880_vm2, %v891_v25, %v893_v41  ;;  %vm684_vm7 = vcmp.eq.s32.totalorder %v682_v9, 0  ;;  %vm687_vm8 = vcmp.eq.s32.totalorder %v682_v9, 2 }
 0x1d4   :  { %v685_v10 = vxor.u32 2147483648, %v679_v31  ;;  %vm795_vm10 = vcmp.lt.s32.totalorder %v5972_v35, 0  ;;  %v689_v47 = vsel %vm687_vm8, %v688_v39, %v679_v31  ;;  %v796_v49 = vsub.s32 0, %v5972_v35 }
 0x1d5   :  { %v5980_v46 = vshll.u32 %v855_v33, 8  ;;  %v920_v18 = vand.u32 65535, %v890_v0  ;;  %v3166_v27 = vsel %vm3164_vm6, %v688_v39, %v679_v31  ;;  %v898_v58 = vand.u32 65535, %v894_v56 }
 0x1d6   :  { %v686_v29 = vsel %vm684_vm7, %v671_v1, %v685_v10  ;;  %v3163_v23 = vsel %vm3161_vm4, %v671_v1, %v685_v10  ;;  %v797_v26 = vsel %vm795_vm10, %v796_v49, %v5972_v35  ;;  %v899_v28 = vshrl.u32 %v894_v56, 16 }
 0x1d7   :  { %v690_v59 = vsel %vm683_vm3, %v686_v29, %v689_v47  ;;  %v3167_v40 = vsel %vm3160_vm15, %v3163_v23, %v3166_v27  ;;  %v798_v30 = vclz %v797_v26  ;;  %v921_v32 = vshrl.u32 %v890_v0, 16  ;;  %v6005_v47 = vpop.f32.mrf.mxu1 }
 0x1d8   :  { %v691_v63 = vsel %vm680_vm13, nan, %v690_v59  ;;  %v3168_v14 = vsel %vm680_vm13, nan, %v3167_v40  ;;  %vm5189_vm12 = vcmp.ge.f32.partialorder %v5581_v53, 0.0  ;;  %v896_v19 = vand.u32 65535, %v5980_v46 }
 0x1d9   :  { %v5173_v2 = vsel %vm5730_vm5, %v691_v63, %v3168_v14  ;;  %v897_v22 = vshrl.u32 %v5980_v46, 16  ;;  %v786_v50 = vadd.s32 %v5907_v60, %v5912_v34  ;;  %v5270_v21 = vadd.s32 4294967294, %v798_v30 }
 0x1da   :  { %v5205_v4 = vsel %vm5189_vm12, %v5173_v2, 0.0  ;;  %v816_v62 = vsub.s32 4, %v5951_v20  ;;  %v863_v55 = vshrl.u32 %v5429_v42, %v5914_v61  ;;  %v901_v53 = vmul.u32 %v899_v28, %v896_v19 }
 0x1db   :  { %5222 = vst.msk [vmem:[%s7606_s2 + $0x10] sm:$0xff] %vm5219_vm9, %v5205_v4  ;;  %v902_v7 = vmul.u32 %v898_v58, %v897_v22  ;;  %vm5271_vm0 = vcmp.lt.s32.totalorder %v5270_v21, 0  ;;  %v900_v9 = vmul.u32 %v898_v58, %v896_v19  ;;  %v922_v36 = vmul.u32 %v920_v18, %v896_v19 }
 0x1dc   :  { %v923_v3 = vmul.u32 %v921_v32, %v896_v19  ;;  %v801_v38 = vsel %vm5271_vm0, 0, %v5270_v21  ;;  %v903_v1 = vmul.u32 %v899_v28, %v897_v22  ;;  %v904_v60 = vshll.u32 %v901_v53, 16 }
 0x1dd   :  { %v924_v34 = vmul.u32 %v920_v18, %v897_v22  ;;  %v802_v16 = vsub.s32 32, %v801_v38  ;;  %v806_v24 = vsub.s32 4294967266, %v801_v38  ;;  %v905_v25 = vshrl.u32 %v901_v53, 16 }
 0x1de   :  { %v925_v33 = vmul.u32 %v921_v32, %v897_v22  ;;  %v906_v41 = vshll.u32 %v902_v7, 16  ;;  %vm908_vm13 = vc.u32 %v900_v9, %v904_v60  ;;  %v910_v31 = vadd.s32 %v904_v60, %v900_v9 }
 0x1df   :  { %v926_v39 = vshll.u32 %v923_v3, 16  ;;  %v803_v61 = vshll.u32 %v5972_v35, %v801_v38  ;;  %v804_v0 = vshrl.u32 %v786_v50, %v802_v16  ;;  %v807_v56 = vadd.s32 127, %v806_v24  ;;  %v6009_v35 = vld [vmem:[#allocation4] ss:$0 sm:$0xff] }
 0x1e0   :  { %v909_v10 = vsel %vm908_vm13, 1, %v5435_v52  ;;  %vm912_vm15 = vc.u32 %v910_v31, %v906_v41  ;;  %v928_v29 = vshll.u32 %v924_v34, 16  ;;  %v6013_v28 = vmul.f32 %v6009_v35, %v6005_v47 }
 0x1e1   :  { %v911_v49 = vadd.s32 %v909_v10, %v903_v1  ;;  %vm930_vm3 = vc.u32 %v922_v36, %v926_v39  ;;  %v805_v18 = vor.u32 %v804_v0, %v803_v61  ;;  %v808_v23 = vshll.u32 %v807_v56, 23 }
 0x1e2   :  { %v913_v27 = vsel %vm912_vm15, 1, %v5435_v52  ;;  %v931_v58 = vsel %vm930_vm3, 1, %v5435_v52  ;;  %v932_v40 = vadd.s32 %v926_v39, %v922_v36  ;;  %vm694_vm4 = vcmp.lt.s32.totalorder %v5690_v8, 0 }
 0x1e3   :  { %v915_v59 = vadd.s32 %v913_v27, %v911_v49  ;;  %v933_v26 = vadd.s32 %v931_v58, %v925_v33  ;;  %v809_v63 = vor.u32 4788187, %v808_v23  ;;  %v884_v14 = vsel %vm882_vm14, %v5942_v11, 2102212464 }
 0x1e4   :  { %v883_v30 = vsel %vm879_vm1, %v863_v55, %v5938_v15  ;;  %v907_v32 = vshrl.u32 %v902_v7, 16  ;;  %vm934_vm6 = vc.u32 %v932_v40, %v928_v29  ;;  %v812_v22 = vcvt.s32.f32 %v805_v18 }
 0x1e5   :  { %v916_v2 = vadd.s32 %v915_v59, %v905_v25  ;;  %v810_v19 = vand.u32 2147483647, %v809_v63  ;;  %v935_v4 = vsel %vm934_vm6, 1, %v5435_v52  ;;  %v1005_v50 = vand.u32 2139095040, %v6013_v28 }
 0x1e6   :  { %v817_v21 = vsel %vm694_vm4, %v816_v62, %v5951_v20  ;;  %v885_v11 = vsel %vm881_vm11, %v5940_v17, %v884_v14  ;;  %v927_v53 = vshrl.u32 %v923_v3, 16  ;;  %v937_v9 = vadd.s32 %v935_v4, %v933_v26  ;;  %v6033_v20 = vpop.f32.mrf.mxu1 }
 0x1e7   :  { %v813_v15 = vmul.f32 %v812_v22, %v810_v19  ;;  %v917_v55 = vadd.s32 %v916_v2, %v907_v32  ;;  %v1002_v7 = vand.u32 2147483647, %v6013_v28  ;;  %v1006_v36 = vshrl.u32 %v1005_v50, 23 }
 0x1e8   :  { %v929_v38 = vshrl.u32 %v924_v34, 16  ;;  %v938_v1 = vadd.s32 %v937_v9, %v927_v53  ;;  %vm693_vm14 = vcmp.le.f32.partialorder %v692_v43, 0.7853982  ;;  %v936_v16 = vadd.s32 %v932_v40, %v928_v29 }
 0x1e9   :  { %v814_v60 = vxor.u32 2147483648, %v813_v15  ;;  %v5275_v24 = vadd.s32 4294967169, %v1006_v36  ;;  %v819_v62 = vsel %vm693_vm14, 0, %v817_v21  ;;  %v886_v17 = vsel %vm880_vm2, %v883_v30, %v885_v11 }
 0x1ea   :  { %v939_v3 = vadd.s32 %v938_v1, %v929_v38  ;;  %vm942_vm1 = vc.u32 %v917_v55, %v936_v16  ;;  %v1009_v34 = vand.u32 8388607, %v1002_v7  ;;  %v6044_v31 = vmul.f32 %v6009_v35, %v6033_v20 }
 0x1eb   :  { %v815_v25 = vsel %vm694_vm4, %v814_v60, %v813_v15  ;;  %v1012_v33 = vadd.s32 1, %v5275_v24  ;;  %v940_v37 = vmul.u32 %v5980_v46, %v886_v17  ;;  %v836_v61 = vadd.s32 3, %v819_v62 }
 0x1ec   :  { %v818_v43 = vsel %vm693_vm14, %v5690_v8, %v815_v25  ;;  %v943_v41 = vadd.s32 1, %v939_v3  ;;  %v1010_v18 = vor.u32 8388608, %v1009_v34  ;;  %v1160_v27 = vand.u32 2139095040, %v6044_v31 }
 0x1ed   :  { %v820_v39 = vmul.f32 %v818_v43, %v818_v43  ;;  %vm1013_vm11 = vcmp.gt.s32.totalorder %v1012_v33, 0  ;;  %v6048_v26 = vand.u32 3, %v836_v61  ;;  %v6050_v63 = vand.u32 3, %v819_v62 }
 0x1ee   :  { %v944_v0 = vsel %vm942_vm1, %v943_v41, %v939_v3  ;;  %v1014_v56 = vsel %vm1013_vm11, %v1012_v33, 0  ;;  %v6054_v32 = vshll.u32 %v1010_v18, 8  ;;  %v1161_v19 = vshrl.u32 %v1160_v27, 23 }
 0x1ef   :  { %v821_v10 = vmul.f32 -0.001358992, %v820_v39  ;;  %v828_v49 = vmul.f32 -0.00019511016, %v820_v39  ;;  %v945_v29 = vadd.s32 %v944_v0, %v940_v37  ;;  %v1016_v23 = vand.u32 31, %v1014_v56 }
 0x1f0   :  { %vm839_vm2 = vcmp.eq.s32.totalorder %v6048_v26, 0  ;;  %vm842_vm7 = vcmp.eq.s32.totalorder %v6048_v26, 2  ;;  %vm3315_vm8 = vcmp.eq.s32.totalorder %v6050_v63, 0  ;;  %vm3318_vm10 = vcmp.eq.s32.totalorder %v6050_v63, 2 }
 0x1f1   :  { %v822_v58 = vadd.f32 0.041655596, %v821_v10  ;;  %v829_v59 = vadd.f32 0.008332121, %v828_v49  ;;  %v946_v40 = vadd.s32 536870912, %v945_v29  ;;  %v6056_v2 = vsub.s32 32, %v1016_v23 }
 0x1f2   :  { %v6063_v21 = vadd.s32 %v936_v16, %v917_v55  ;;  %v6065_v11 = vshrl.u32 %v1014_v56, 5  ;;  %v1157_v53 = vand.u32 2147483647, %v6044_v31  ;;  %vm838_vm12 = vcmp.lt.s32.totalorder %v6048_v26, 2 }
 0x1f3   :  { %v823_v14 = vmul.f32 %v822_v58, %v820_v39  ;;  %v830_v46 = vmul.f32 %v829_v59, %v820_v39  ;;  %v6052_v30 = vshrl.u32 %v946_v40, 30  ;;  %vm3314_vm0 = vcmp.lt.s32.totalorder %v6050_v63, 2 }
 0x1f4   :  { %v6073_v38 = vand.u32 65535, %v6054_v32  ;;  %vm835_vm13 = vweird.f32 %v5690_v8  ;;  %v1020_v55 = vshrl.u32 %v5430_v44, %v6056_v2  ;;  %v1023_v1 = vshrl.u32 %v5431_v48, %v6056_v2 }
 0x1f5   :  { %v824_v22 = vadd.f32 -0.4999988, %v823_v14  ;;  %v831_v4 = vadd.f32 -0.16666654, %v830_v46  ;;  %v948_v50 = vshll.u32 %v6052_v30, 30  ;;  %v6081_v60 = vshrl.u32 %v6054_v32, 16 }
 0x1f6   :  { %v6083_v16 = vadd.s32 4294967169, %v1161_v19  ;;  %vm5190_vm3 = vcmp.ge.f32.partialorder %v5666_v6, 0.0  ;;  %v1019_v3 = vshll.u32 %v5429_v42, %v1016_v23  ;;  %v1026_v25 = vshrl.u32 %v5432_v51, %v6056_v2 }
 0x1f7   :  { %v825_v9 = vmul.f32 %v824_v22, %v820_v39  ;;  %v832_v15 = vmul.f32 %v831_v4, %v820_v39  ;;  %v6070_v36 = vsub.s32 %v945_v29, %v948_v50  ;;  %v1029_v34 = vshrl.u32 %v5433_v54, %v6056_v2 }
 0x1f8   :  { %v1032_v33 = vshrl.u32 %v5434_v57, %v6056_v2  ;;  %vm1034_vm4 = vcmp.lt.s32.totalorder %v6065_v11, 1  ;;  %v1022_v61 = vshll.u32 %v5430_v44, %v1016_v23  ;;  %vm849_vm6 = vcmp.lt.s32.totalorder %v5821_v13, 0 }
 0x1f9   :  { %v826_v24 = vadd.f32 1.0, %v825_v9  ;;  %v833_v62 = vadd.f32 1.0, %v832_v15  ;;  %vm950_vm15 = vcmp.lt.s32.totalorder %v6070_v36, 0  ;;  %v951_v17 = vsub.s32 0, %v6070_v36 }
 0x1fa   :  { %v1025_v56 = vshll.u32 %v5431_v48, %v1016_v23  ;;  %v1028_v10 = vshll.u32 %v5432_v51, %v1016_v23  ;;  %v1031_v49 = vshll.u32 %v5433_v54, %v1016_v23  ;;  %v971_v18 = vsub.s32 4, %v6052_v30 }
 0x1fb   :  { %v834_v41 = vmul.f32 %v833_v62, %v818_v43  ;;  %v843_v39 = vxor.u32 2147483648, %v826_v24  ;;  %v952_v37 = vsel %vm950_vm15, %v951_v17, %v6070_v36  ;;  %v1021_v27 = vor.u32 %v1020_v55, %v1019_v3 }
 0x1fc   :  { %v953_v0 = vclz %v952_v37  ;;  %v1024_v58 = vor.u32 %v1023_v1, %v1022_v61  ;;  %v1027_v59 = vor.u32 %v1026_v25, %v1025_v56  ;;  %v1030_v40 = vor.u32 %v1029_v34, %v1028_v10 }
 0x1fd   :  { %v840_v29 = vxor.u32 2147483648, %v834_v41  ;;  %v1033_v14 = vor.u32 %v1032_v33, %v1031_v49  ;;  %v844_v19 = vsel %vm842_vm7, %v843_v39, %v834_v41  ;;  %v3320_v23 = vsel %vm3318_vm10, %v843_v39, %v834_v41 }
 0x1fe   :  { %v5273_v43 = vadd.s32 4294967294, %v953_v0  ;;  %vm6113_vm14 = vcmp.le.f32.partialorder %v847_v12, 0.7853982  ;;  %vm1035_vm11 = vcmp.lt.s32.totalorder %v6065_v11, 2  ;;  %vm1037_vm7 = vcmp.lt.s32.totalorder %v6065_v11, 4 }
 0x1ff   :  { %v841_v46 = vsel %vm839_vm2, %v826_v24, %v840_v29  ;;  %v3317_v22 = vsel %vm3315_vm8, %v826_v24, %v840_v29  ;;  %vm1036_vm2 = vcmp.lt.s32.totalorder %v6065_v11, 3  ;;  %v1042_v17 = vsel %vm1034_vm4, %v1021_v27, %v1024_v58 }
 0x200   :  { %v845_v50 = vsel %vm838_vm12, %v841_v46, %v844_v19  ;;  %v3321_v9 = vsel %vm3314_vm0, %v3317_v22, %v3320_v23  ;;  %vm5274_vm1 = vcmp.lt.s32.totalorder %v5273_v43, 0  ;;  %v1043_v8 = vsel %vm1037_vm7, %v1030_v40, 920167782 }
 0x201   :  { %v846_v15 = vsel %vm835_vm13, nan, %v845_v50  ;;  %v3322_v55 = vsel %vm835_vm13, nan, %v3321_v9  ;;  %v956_v1 = vsel %vm5274_vm1, 0, %v5273_v43  ;;  %v1044_v34 = vsel %vm1036_vm2, %v1027_v59, %v1043_v8 }
 0x202   :  { %v5174_v12 = vsel %vm5730_vm5, %v846_v15, %v3322_v55  ;;  %v957_v26 = vsub.s32 32, %v956_v1  ;;  %v961_v24 = vsub.s32 4294967266, %v956_v1  ;;  %v958_v62 = vshll.u32 %v6070_v36, %v956_v1 }
 0x203   :  { %v5206_v63 = vsel %vm5190_vm3, %v5174_v12, 0.0  ;;  %v1046_v6 = vsel %vm1034_vm4, %v1024_v58, %v1027_v59  ;;  %v972_v36 = vsel %vm849_vm6, %v971_v18, %v6052_v30  ;;  %v1039_v33 = vsel %vm1037_vm7, %v1027_v59, 2102212464 }
 0x204   :  { %5223 = vst.msk [vmem:[%s7606_s2 + $0x18] sm:$0xff] %vm5219_vm9, %v5206_v63  ;;  %v959_v3 = vshrl.u32 %v6063_v21, %v957_v26  ;;  %v962_v25 = vadd.s32 127, %v961_v24  ;;  %v1045_v41 = vsel %vm1035_vm11, %v1042_v17, %v1044_v34  ;;  %v1047_v39 = vsel %vm1037_vm7, %v1033_v14, 1326507024 }
 0x205   :  { %v1048_v21 = vsel %vm1036_vm2, %v1030_v40, %v1047_v39  ;;  %v1075_v0 = vand.u32 65535, %v1045_v41  ;;  %v1018_v56 = vshrl.u32 %v5429_v42, %v6056_v2  ;;  %v1076_v49 = vshrl.u32 %v1045_v41, 16 }
 0x206   :  { %v960_v37 = vor.u32 %v959_v3, %v958_v62  ;;  %v963_v61 = vshll.u32 %v962_v25, 23  ;;  %v1049_v10 = vsel %vm1035_vm11, %v1046_v6, %v1048_v21  ;;  %v1167_v30 = vadd.s32 1, %v6083_v16 }
 0x207   :  { %v974_v18 = vsel %vm6113_vm14, 0, %v972_v36  ;;  %v1053_v43 = vand.u32 65535, %v1049_v10  ;;  %v1054_v59 = vshrl.u32 %v1049_v10, 16  ;;  %v1038_v14 = vsel %vm1034_vm4, %v1018_v56, %v1021_v27 }
 0x208   :  { %v964_v29 = vor.u32 4788187, %v963_v61  ;;  %v1040_v40 = vsel %vm1036_vm2, %v1024_v58, %v1039_v33  ;;  %v1078_v2 = vmul.u32 %v1076_v49, %v6073_v38  ;;  %v1079_v46 = vmul.u32 %v1075_v0, %v6081_v60 }
 0x209   :  { %v967_v22 = vcvt.s32.f32 %v960_v37  ;;  %v1056_v16 = vmul.u32 %v1054_v59, %v6073_v38  ;;  %v1057_v23 = vmul.u32 %v1053_v43, %v6081_v60  ;;  %v1077_v50 = vmul.u32 %v1075_v0, %v6073_v38 }
 0x20a   :  { %v965_v19 = vand.u32 2147483647, %v964_v29  ;;  %v1080_v9 = vmul.u32 %v1076_v49, %v6081_v60  ;;  %v1081_v15 = vshll.u32 %v1078_v2, 16  ;;  %vm1168_vm8 = vcmp.gt.s32.totalorder %v1167_v30, 0 }
 0x20b   :  { %v1055_v55 = vmul.u32 %v1053_v43, %v6073_v38  ;;  %v1058_v58 = vmul.u32 %v1054_v59, %v6081_v60  ;;  %v1059_v1 = vshll.u32 %v1056_v16, 16  ;;  %v1061_v12 = vshll.u32 %v1057_v23, 16 }
 0x20c   :  { %v968_v27 = vmul.f32 %v967_v22, %v965_v19  ;;  %v1083_v26 = vshll.u32 %v1079_v46, 16  ;;  %vm1085_vm10 = vc.u32 %v1077_v50, %v1081_v15  ;;  %v1087_v24 = vadd.s32 %v1081_v15, %v1077_v50 }
 0x20d   :  { %vm1063_vm12 = vc.u32 %v1055_v55, %v1059_v1  ;;  %v1065_v62 = vadd.s32 %v1059_v1, %v1055_v55  ;;  %v1086_v17 = vsel %vm1085_vm10, 1, %v5435_v52  ;;  %v1082_v3 = vshrl.u32 %v1078_v2, 16 }
 0x20e   :  { %v969_v63 = vxor.u32 2147483648, %v968_v27  ;;  %v1064_v8 = vsel %vm1063_vm12, 1, %v5435_v52  ;;  %v1088_v25 = vadd.s32 %v1086_v17, %v1080_v9  ;;  %vm1089_vm0 = vc.u32 %v1087_v24, %v1083_v26 }
 0x20f   :  { %v1066_v34 = vadd.s32 %v1064_v8, %v1058_v58  ;;  %vm1067_vm13 = vc.u32 %v1065_v62, %v1061_v12  ;;  %v1090_v60 = vsel %vm1089_vm0, 1, %v5435_v52  ;;  %v1169_v41 = vsel %vm1168_vm8, %v1167_v30, 0 }
 0x210   :  { %v970_v38 = vsel %vm849_vm6, %v969_v63, %v968_v27  ;;  %v1068_v36 = vsel %vm1067_vm13, 1, %v5435_v52  ;;  %v1092_v33 = vadd.s32 %v1090_v60, %v1088_v25  ;;  %v1060_v37 = vshrl.u32 %v1056_v16, 16 }
 0x211   :  { %v6178_v6 = vsel %vm6113_vm14, %v5821_v13, %v970_v38  ;;  %v1070_v61 = vadd.s32 %v1068_v36, %v1066_v34  ;;  %v1171_v21 = vand.u32 31, %v1169_v41  ;;  %v991_v0 = vadd.s32 3, %v974_v18 }
 0x212   :  { %v975_v39 = vmul.f32 %v6178_v6, %v6178_v6  ;;  %v1084_v56 = vshrl.u32 %v1079_v46, 16  ;;  %v1093_v10 = vadd.s32 %v1092_v33, %v1082_v3  ;;  %v1164_v49 = vand.u32 8388607, %v1157_v53 }
 0x213   :  { %v1062_v43 = vshrl.u32 %v1057_v23, 16  ;;  %v1071_v59 = vadd.s32 %v1070_v61, %v1060_v37  ;;  %v6186_v2 = vand.u32 3, %v974_v18  ;;  %v1041_v30 = vsel %vm1035_vm11, %v1038_v14, %v1040_v40 }
 0x214   :  { %v976_v4 = vmul.f32 -0.001358992, %v975_v39  ;;  %v983_v29 = vmul.f32 -0.00019511016, %v975_v39  ;;  %v1094_v19 = vadd.s32 %v1093_v10, %v1084_v56  ;;  %v6190_v22 = vsub.s32 32, %v1171_v21 }
 0x215   :  { %v6192_v9 = vadd.s32 %v1071_v59, %v1062_v43  ;;  %v6194_v46 = vadd.s32 %v1087_v24, %v1083_v26  ;;  %v992_v15 = vand.u32 3, %v991_v0  ;;  %v1095_v23 = vmul.u32 %v6054_v32, %v1041_v30 }
 0x216   :  { %v977_v16 = vadd.f32 0.041655596, %v976_v4  ;;  %v984_v50 = vadd.f32 0.008332121, %v983_v29  ;;  %v1098_v27 = vadd.s32 1, %v1094_v19  ;;  %v1165_v18 = vor.u32 8388608, %v1164_v49 }
 0x217   :  { %vm1097_vm15 = vc.u32 %v6192_v9, %v6194_v46  ;;  %v6199_v14 = vshrl.u32 %v1169_v41, 5  ;;  %v1178_v40 = vshrl.u32 %v5431_v48, %v6190_v22  ;;  %vm3472_vm3 = vcmp.eq.s32.totalorder %v6186_v2, 2 }
 0x218   :  { %v978_v55 = vmul.f32 %v977_v16, %v975_v39  ;;  %v985_v58 = vmul.f32 %v984_v50, %v975_v39  ;;  %v1099_v11 = vsel %vm1097_vm15, %v1098_v27, %v1094_v19  ;;  %v1181_v24 = vshrl.u32 %v5432_v51, %v6190_v22 }
 0x219   :  { %v1100_v26 = vadd.s32 %v1099_v11, %v1095_v23  ;;  %vm994_vm4 = vcmp.eq.s32.totalorder %v992_v15, 0  ;;  %vm3469_vm6 = vcmp.eq.s32.totalorder %v6186_v2, 0  ;;  %v1177_v32 = vshll.u32 %v5430_v44, %v1171_v21 }
 0x21a   :  { %v979_v1 = vadd.f32 -0.4999988, %v978_v55  ;;  %v986_v12 = vadd.f32 -0.16666654, %v985_v58  ;;  %v1184_v63 = vshrl.u32 %v5433_v54, %v6190_v22  ;;  %v1186_v62 = vshll.u32 %v5433_v54, %v1171_v21 }
 0x21b   :  { %v1187_v17 = vshrl.u32 %v5434_v57, %v6190_v22  ;;  %vm993_vm14 = vcmp.lt.s32.totalorder %v992_v15, 2  ;;  %vm3468_vm1 = vcmp.lt.s32.totalorder %v6186_v2, 2  ;;  %v1101_v25 = vadd.s32 536870912, %v1100_v26 }
 0x21c   :  { %v980_v8 = vmul.f32 %v979_v1, %v975_v39  ;;  %v987_v3 = vmul.f32 %v986_v12, %v975_v39  ;;  %v1180_v38 = vshll.u32 %v5431_v48, %v1171_v21  ;;  %vm990_vm11 = vweird.f32 %v5821_v13 }
 0x21d   :  { %v1175_v34 = vshrl.u32 %v5430_v44, %v6190_v22  ;;  %v6218_v60 = vor.u32 %v1178_v40, %v1177_v32  ;;  %v1183_v36 = vshll.u32 %v5432_v51, %v1171_v21  ;;  %v1188_v33 = vor.u32 %v1187_v17, %v1186_v62 }
 0x21e   :  { %v981_v41 = vadd.f32 1.0, %v980_v8  ;;  %v988_v37 = vadd.f32 1.0, %v987_v3  ;;  %v6221_v61 = vshrl.u32 %v1101_v25, 30  ;;  %v1182_v39 = vor.u32 %v1181_v24, %v1180_v38 }
 0x21f   :  { %vm997_vm2 = vcmp.eq.s32.totalorder %v992_v15, 2  ;;  %v1174_v0 = vshll.u32 %v5429_v42, %v1171_v21  ;;  %v1185_v56 = vor.u32 %v1184_v63, %v1183_v36  ;;  %v6224_v10 = vshll.u32 %v1165_v18, 8 }
 0x220   :  { %v989_v49 = vmul.f32 %v988_v37, %v6178_v6  ;;  %v998_v4 = vxor.u32 2147483648, %v981_v41  ;;  %v1103_v29 = vshll.u32 %v6221_v61, 30  ;;  %vm1192_vm7 = vcmp.lt.s32.totalorder %v6199_v14, 4 }
 0x221   :  { %v6229_v43 = vor.u32 %v1175_v34, %v1174_v0  ;;  %vm1189_vm8 = vcmp.lt.s32.totalorder %v6199_v14, 1  ;;  %vm1190_vm10 = vcmp.lt.s32.totalorder %v6199_v14, 2  ;;  %v1202_v59 = vsel %vm1192_vm7, %v1188_v33, 1326507024 }
 0x222   :  { %v995_v21 = vxor.u32 2147483648, %v989_v49  ;;  %v1104_v30 = vsub.s32 %v1100_v26, %v1103_v29  ;;  %vm1191_vm12 = vcmp.lt.s32.totalorder %v6199_v14, 3  ;;  %v1201_v6 = vsel %vm1189_vm8, %v6218_v60, %v1182_v39 }
 0x223   :  { %v999_v19 = vsel %vm997_vm2, %v998_v4, %v989_v49  ;;  %v3474_v16 = vsel %vm3472_vm3, %v998_v4, %v989_v49  ;;  %v1198_v50 = vsel %vm1192_vm7, %v1185_v56, 920167782  ;;  %v1203_v27 = vsel %vm1191_vm12, %v1185_v56, %v1202_v59 }
 0x224   :  { %v996_v55 = vsel %vm994_vm4, %v981_v41, %v995_v21  ;;  %v3471_v58 = vsel %vm3469_vm6, %v981_v41, %v995_v21  ;;  %vm1105_vm0 = vcmp.lt.s32.totalorder %v1104_v30, 0  ;;  %v1106_v23 = vsub.s32 0, %v1104_v30 }
 0x225   :  { %v1000_v11 = vsel %vm993_vm14, %v996_v55, %v999_v19  ;;  %v3475_v18 = vsel %vm3468_vm1, %v3471_v58, %v3474_v16  ;;  %v1197_v40 = vsel %vm1189_vm8, %v6229_v43, %v6218_v60  ;;  %v1204_v1 = vsel %vm1190_vm10, %v1201_v6, %v1203_v27 }
 0x226   :  { %v1001_v12 = vsel %vm990_vm11, nan, %v1000_v11  ;;  %v3476_v26 = vsel %vm990_vm11, nan, %v3475_v18  ;;  %v1107_v24 = vsel %vm1105_vm0, %v1106_v23, %v1104_v30  ;;  %v1199_v15 = vsel %vm1191_vm12, %v1182_v39, %v1198_v50  ;;  %v6282_v11 = vpop.f32.mrf.mxu1 }
 0x227   :  { %v5175_v2 = vsel %vm5730_vm5, %v1001_v12, %v3476_v26  ;;  %vm5191_vm13 = vcmp.ge.f32.partialorder %v5815_v45, 0.0  ;;  %v1108_v32 = vclz %v1107_v24  ;;  %v1208_v63 = vand.u32 65535, %v1204_v1 }
 0x228   :  { %v5207_v62 = vsel %vm5191_vm13, %v5175_v2, 0.0  ;;  %v1209_v17 = vshrl.u32 %v1204_v1, 16  ;;  %v1200_v8 = vsel %vm1190_vm10, %v1197_v40, %v1199_v15  ;;  %v1206_v3 = vand.u32 65535, %v6224_v10 }
 0x229   :  { %5224 = vst.msk [vmem:[%s7606_s2 + $0x20] sm:$0xff] %vm5219_vm9, %v5207_v62  ;;  %v5276_v13 = vadd.s32 4294967294, %v1108_v32  ;;  %v1207_v25 = vshrl.u32 %v6224_v10, 16  ;;  %v1173_v45 = vshrl.u32 %v5429_v42, %v6190_v22  ;;  %v1096_v38 = vadd.s32 %v6194_v46, %v6192_v9 }
 0x22a   :  { %v1211_v34 = vmul.u32 %v1209_v17, %v1206_v3  ;;  %v1194_v41 = vsel %vm1192_vm7, %v1182_v39, 2102212464  ;;  %v1230_v37 = vand.u32 65535, %v1200_v8  ;;  %v1231_v0 = vshrl.u32 %v1200_v8, 16 }
 0x22b   :  { %vm5277_vm15 = vcmp.lt.s32.totalorder %v5276_v13, 0  ;;  %v1212_v36 = vmul.u32 %v1208_v63, %v1207_v25  ;;  %v1210_v4 = vmul.u32 %v1208_v63, %v1206_v3  ;;  %v1213_v21 = vmul.u32 %v1209_v17, %v1207_v25 }
 0x22c   :  { %v1111_v33 = vsel %vm5277_vm15, 0, %v5276_v13  ;;  %v1214_v29 = vshll.u32 %v1211_v34, 16  ;;  %v1233_v22 = vmul.u32 %v1231_v0, %v1206_v3  ;;  %v1232_v50 = vmul.u32 %v1230_v37, %v1206_v3 }
 0x22d   :  { %v1112_v56 = vsub.s32 32, %v1111_v33  ;;  %v1116_v49 = vsub.s32 4294967266, %v1111_v33  ;;  %v1113_v59 = vshll.u32 %v1104_v30, %v1111_v33  ;;  %v1216_v6 = vshll.u32 %v1212_v36, 16 }
 0x22e   :  { %vm1218_vm3 = vc.u32 %v1210_v4, %v1214_v29  ;;  %v1220_v9 = vadd.s32 %v1214_v29, %v1210_v4  ;;  %v1234_v27 = vmul.u32 %v1230_v37, %v1207_v25  ;;  %v1236_v55 = vshll.u32 %v1233_v22, 16 }
 0x22f   :  { %v1114_v19 = vshrl.u32 %v1096_v38, %v1112_v56  ;;  %v1117_v16 = vadd.s32 127, %v1116_v49  ;;  %v1219_v46 = vsel %vm1218_vm3, 1, %v5435_v52  ;;  %v1126_v30 = vsub.s32 4, %v6221_v61 }
 0x230   :  { %v1221_v23 = vadd.s32 %v1219_v46, %v1213_v21  ;;  %vm1222_vm4 = vc.u32 %v1220_v9, %v1216_v6  ;;  %v1235_v40 = vmul.u32 %v1231_v0, %v1207_v25  ;;  %vm1240_vm6 = vc.u32 %v1232_v50, %v1236_v55  ;;  %v6298_v25 = vpop.f32.mrf.mxu2 }
 0x231   :  { %v1115_v39 = vor.u32 %v1114_v19, %v1113_v59  ;;  %v1118_v58 = vshll.u32 %v1117_v16, 23  ;;  %v1223_v18 = vsel %vm1222_vm4, 1, %v5435_v52  ;;  %v1215_v12 = vshrl.u32 %v1211_v34, 16 }
 0x232   :  { %v1225_v26 = vadd.s32 %v1223_v18, %v1221_v23  ;;  %v1241_v24 = vsel %vm1240_vm6, 1, %v5435_v52  ;;  %v1238_v15 = vshll.u32 %v1234_v27, 16  ;;  %v1242_v2 = vadd.s32 %v1236_v55, %v1232_v50 }
 0x233   :  { %v1119_v1 = vor.u32 4788187, %v1118_v58  ;;  %v1243_v32 = vadd.s32 %v1241_v24, %v1235_v40  ;;  %v6289_v63 = vmul.f32 %v6009_v35, %v6282_v11  ;;  %v1122_v17 = vcvt.s32.f32 %v1115_v39 }
 0x234   :  { %v1226_v13 = vadd.s32 %v1225_v26, %v1215_v12  ;;  %vm1004_vm14 = vcmp.lt.s32.totalorder %v6013_v28, 0  ;;  %v1193_v8 = vsel %vm1189_vm8, %v1173_v45, %v6229_v43  ;;  %v1195_v3 = vsel %vm1191_vm12, %v6218_v60, %v1194_v41 }
 0x235   :  { %v1120_v62 = vand.u32 2147483647, %v1119_v1  ;;  %vm1244_vm1 = vc.u32 %v1242_v2, %v1238_v15  ;;  %v1217_v34 = vshrl.u32 %v1212_v36, 16  ;;  %v1315_v37 = vand.u32 2139095040, %v6289_v63 }
 0x236   :  { %v1245_v33 = vsel %vm1244_vm1, 1, %v5435_v52  ;;  %v1127_v0 = vsel %vm1004_vm14, %v1126_v30, %v6221_v61  ;;  %v1237_v56 = vshrl.u32 %v1233_v22, 16  ;;  %v1312_v43 = vand.u32 2147483647, %v6289_v63 }
 0x237   :  { %v1123_v38 = vmul.f32 %v1122_v17, %v1120_v62  ;;  %v1247_v49 = vadd.s32 %v1245_v33, %v1243_v32  ;;  %v1227_v4 = vadd.s32 %v1226_v13, %v1217_v34  ;;  %v1316_v60 = vshrl.u32 %v1315_v37, 23 }
 0x238   :  { %v6308_v41 = vmul.f32 %v6009_v35, %v6298_v25  ;;  %vm1003_vm11 = vcmp.le.f32.partialorder %v1002_v7, 0.7853982  ;;  %v1239_v36 = vshrl.u32 %v1234_v27, 16  ;;  %v1246_v21 = vadd.s32 %v1242_v2, %v1238_v15 }
 0x239   :  { %v1124_v45 = vxor.u32 2147483648, %v1123_v38  ;;  %v1248_v29 = vadd.s32 %v1247_v49, %v1237_v56  ;;  %v1129_v61 = vsel %vm1003_vm11, 0, %v1127_v0  ;;  %v5281_v6 = vadd.s32 4294967169, %v1316_v60 }
 0x23a   :  { %v1196_v19 = vsel %vm1190_vm10, %v1193_v8, %v1195_v3  ;;  %v1319_v35 = vand.u32 8388607, %v1312_v43  ;;  %vm1252_vm2 = vc.u32 %v1227_v4, %v1246_v21  ;;  %v1470_v46 = vand.u32 2139095040, %v6308_v41 }
 0x23b   :  { %v1125_v59 = vsel %vm1004_vm14, %v1124_v45, %v1123_v38  ;;  %v1249_v16 = vadd.s32 %v1248_v29, %v1239_v36  ;;  %v1322_v7 = vadd.s32 1, %v5281_v6  ;;  %v1146_v50 = vadd.s32 3, %v1129_v61 }
 0x23c   :  { %v1128_v22 = vsel %vm1003_vm11, %v6013_v28, %v1125_v59  ;;  %v1250_v58 = vmul.u32 %v6224_v10, %v1196_v19  ;;  %v1320_v30 = vor.u32 8388608, %v1319_v35  ;;  %v1471_v12 = vshrl.u32 %v1470_v46, 23 }
 0x23d   :  { %v1130_v9 = vmul.f32 %v1128_v22, %v1128_v22  ;;  %v1253_v27 = vadd.s32 1, %v1249_v16  ;;  %vm1323_vm7 = vcmp.gt.s32.totalorder %v1322_v7, 0  ;;  %v6321_v26 = vand.u32 3, %v1146_v50 }
 0x23e   :  { %v1324_v14 = vsel %vm1323_vm7, %v1322_v7, 0  ;;  %v6323_v24 = vand.u32 3, %v1129_v61  ;;  %v1467_v2 = vand.u32 2147483647, %v6308_v41  ;;  %vm1159_vm8 = vcmp.lt.s32.totalorder %v6044_v31, 0 }
 0x23f   :  { %v1131_v55 = vmul.f32 -0.001358992, %v1130_v9  ;;  %v1138_v39 = vmul.f32 -0.00019511016, %v1130_v9  ;;  %v1254_v23 = vsel %vm1252_vm2, %v1253_v27, %v1249_v16  ;;  %v1326_v15 = vand.u32 31, %v1324_v14 }
 0x240   :  { %v1255_v1 = vadd.s32 %v1254_v23, %v1250_v58  ;;  %v6329_v13 = vshll.u32 %v1320_v30, 8  ;;  %vm6333_vm10 = vcmp.le.f32.partialorder %v1157_v53, 0.7853982  ;;  %v5284_v33 = vadd.s32 4294967169, %v1471_v12 }
 0x241   :  { %v1132_v18 = vadd.f32 0.041655596, %v1131_v55  ;;  %v1139_v40 = vadd.f32 0.008332121, %v1138_v39  ;;  %v6327_v10 = vsub.s32 32, %v1326_v15  ;;  %vm1149_vm12 = vcmp.eq.s32.totalorder %v6321_v26, 0 }
 0x242   :  { %v1256_v17 = vadd.s32 536870912, %v1255_v1  ;;  %vm1152_vm0 = vcmp.eq.s32.totalorder %v6321_v26, 2  ;;  %vm3623_vm13 = vcmp.eq.s32.totalorder %v6323_v24, 0  ;;  %vm3626_vm15 = vcmp.eq.s32.totalorder %v6323_v24, 2 }
 0x243   :  { %v1133_v32 = vmul.f32 %v1132_v18, %v1130_v9  ;;  %v1140_v62 = vmul.f32 %v1139_v40, %v1130_v9  ;;  %v6341_v37 = vadd.s32 %v1246_v21, %v1227_v4  ;;  %v6345_v0 = vand.u32 8388607, %v1467_v2 }
 0x244   :  { %v1257_v34 = vshrl.u32 %v1256_v17, 30  ;;  %vm1148_vm3 = vcmp.lt.s32.totalorder %v6321_v26, 2  ;;  %vm3622_vm4 = vcmp.lt.s32.totalorder %v6323_v24, 2  ;;  %vm1145_vm6 = vweird.f32 %v6013_v28 }
 0x245   :  { %v1134_v8 = vadd.f32 -0.4999988, %v1133_v32  ;;  %v1141_v3 = vadd.f32 -0.16666654, %v1140_v62  ;;  %v6350_v60 = vshrl.u32 %v1324_v14, 5  ;;  %v1330_v4 = vshrl.u32 %v5430_v44, %v6327_v10 }
 0x246   :  { %v1258_v49 = vshll.u32 %v1257_v34, 30  ;;  %v1281_v45 = vsub.s32 4, %v1257_v34  ;;  %v6355_v36 = vand.u32 65535, %v6329_v13  ;;  %v6358_v29 = vshrl.u32 %v6329_v13, 16 }
 0x247   :  { %v1135_v53 = vmul.f32 %v1134_v8, %v1130_v9  ;;  %v1142_v56 = vmul.f32 %v1141_v3, %v1130_v9  ;;  %v6360_v6 = vadd.s32 1, %v5284_v33  ;;  %vm5192_vm14 = vcmp.ge.f32.partialorder %v6005_v47, 0.0 }
 0x248   :  { %v1259_v21 = vsub.s32 %v1255_v1, %v1258_v49  ;;  %v1282_v19 = vsel %vm1159_vm8, %v1281_v45, %v1257_v34  ;;  %v1329_v16 = vshll.u32 %v5429_v42, %v1326_v15  ;;  %v1332_v35 = vshll.u32 %v5430_v44, %v1326_v15 }
 0x249   :  { %v1136_v59 = vadd.f32 1.0, %v1135_v53  ;;  %v1143_v61 = vadd.f32 1.0, %v1142_v56  ;;  %v1333_v9 = vshrl.u32 %v5431_v48, %v6327_v10  ;;  %v1335_v55 = vshll.u32 %v5431_v48, %v1326_v15 }
 0x24a   :  { %vm1260_vm1 = vcmp.lt.s32.totalorder %v1259_v21, 0  ;;  %v1261_v50 = vsub.s32 0, %v1259_v21  ;;  %v1331_v27 = vor.u32 %v1330_v4, %v1329_v16  ;;  %v1336_v39 = vshrl.u32 %v5432_v51, %v6327_v10 }
 0x24b   :  { %v1144_v7 = vmul.f32 %v1143_v61, %v1128_v22  ;;  %v1153_v46 = vxor.u32 2147483648, %v1136_v59  ;;  %v1338_v58 = vshll.u32 %v5432_v51, %v1326_v15  ;;  %v1339_v14 = vshrl.u32 %v5433_v54, %v6327_v10 }
 0x24c   :  { %v1262_v30 = vsel %vm1260_vm1, %v1261_v50, %v1259_v21  ;;  %v1342_v18 = vshrl.u32 %v5434_v57, %v6327_v10  ;;  %v1284_v40 = vsel %vm6333_vm10, 0, %v1282_v19  ;;  %v1334_v1 = vor.u32 %v1333_v9, %v1332_v35 }
 0x24d   :  { %v1150_v23 = vxor.u32 2147483648, %v1144_v7  ;;  %v1263_v22 = vclz %v1262_v30  ;;  %v1341_v12 = vshll.u32 %v5433_v54, %v1326_v15  ;;  %v1154_v62 = vsel %vm1152_vm0, %v1153_v46, %v1144_v7 }
 0x24e   :  { %v3628_v8 = vsel %vm3626_vm15, %v1153_v46, %v1144_v7  ;;  %v1337_v15 = vor.u32 %v1336_v39, %v1335_v55  ;;  %v1340_v49 = vor.u32 %v1339_v14, %v1338_v58  ;;  %vm1344_vm2 = vcmp.lt.s32.totalorder %v6350_v60, 1 }
 0x24f   :  { %v1151_v32 = vsel %vm1149_vm12, %v1136_v59, %v1150_v23  ;;  %v3625_v17 = vsel %vm3623_vm13, %v1136_v59, %v1150_v23  ;;  %v5279_v33 = vadd.s32 4294967294, %v1263_v22  ;;  %v1343_v45 = vor.u32 %v1342_v18, %v1341_v12 }
 0x250   :  { %v1155_v3 = vsel %vm1148_vm3, %v1151_v32, %v1154_v62  ;;  %v3629_v34 = vsel %vm3622_vm4, %v3625_v17, %v3628_v8  ;;  %v1301_v59 = vadd.s32 3, %v1284_v40  ;;  %vm1345_vm7 = vcmp.lt.s32.totalorder %v6350_v60, 2 }
 0x251   :  { %v1156_v53 = vsel %vm1145_vm6, nan, %v1155_v3  ;;  %v3630_v56 = vsel %vm1145_vm6, nan, %v3629_v34  ;;  %vm5280_vm11 = vcmp.lt.s32.totalorder %v5279_v33, 0  ;;  %vm1346_vm12 = vcmp.lt.s32.totalorder %v6350_v60, 3 }
 0x252   :  { %v5176_v4 = vsel %vm5730_vm5, %v1156_v53, %v3630_v56  ;;  %v1266_v24 = vsel %vm5280_vm11, 0, %v5279_v33  ;;  %vm1347_vm0 = vcmp.lt.s32.totalorder %v6350_v60, 4  ;;  %v1352_v19 = vsel %vm1344_vm2, %v1331_v27, %v1334_v1 }
 0x253   :  { %v5208_v26 = vsel %vm5192_vm14, %v5176_v4, 0.0  ;;  %v1267_v28 = vsub.s32 32, %v1266_v24  ;;  %v1271_v61 = vsub.s32 4294967266, %v1266_v24  ;;  %v1268_v16 = vshll.u32 %v1259_v21, %v1266_v24 }
 0x254   :  { %5225 = vst.msk [vmem:[%s7606_s2 + $0x28] sm:$0xff] %vm5219_vm9, %v5208_v26  ;;  %v1353_v47 = vsel %vm1347_vm0, %v1340_v49, 920167782  ;;  %v1356_v35 = vsel %vm1344_vm2, %v1334_v1, %v1337_v15  ;;  %v1357_v9 = vsel %vm1347_vm0, %v1343_v45, 1326507024  ;;  %v1328_v39 = vshrl.u32 %v5429_v42, %v6327_v10 }
 0x255   :  { %v1269_v7 = vshrl.u32 %v6341_v37, %v1267_v28  ;;  %v1272_v46 = vadd.s32 127, %v1271_v61  ;;  %v1354_v50 = vsel %vm1346_vm12, %v1337_v15, %v1353_v47  ;;  %v1358_v55 = vsel %vm1346_vm12, %v1340_v49, %v1357_v9 }
 0x256   :  { %v1349_v58 = vsel %vm1347_vm0, %v1337_v15, 2102212464  ;;  %v1355_v21 = vsel %vm1345_vm7, %v1352_v19, %v1354_v50  ;;  %v1359_v23 = vsel %vm1345_vm7, %v1356_v35, %v1358_v55  ;;  %v6423_v22 = vand.u32 3, %v1284_v40 }
 0x257   :  { %v1270_v30 = vor.u32 %v1269_v7, %v1268_v16  ;;  %v1273_v14 = vshll.u32 %v1272_v46, 23  ;;  %v1363_v37 = vand.u32 65535, %v1359_v23  ;;  %v1364_v18 = vshrl.u32 %v1359_v23, 16 }
 0x258   :  { %v1385_v12 = vand.u32 65535, %v1355_v21  ;;  %v1386_v32 = vshrl.u32 %v1355_v21, 16  ;;  %v1475_v62 = vor.u32 8388608, %v6345_v0  ;;  %v6426_v8 = vand.u32 3, %v1301_v59 }
 0x259   :  { %v1274_v17 = vor.u32 4788187, %v1273_v14  ;;  %v1348_v10 = vsel %vm1344_vm2, %v1328_v39, %v1331_v27  ;;  %v1366_v3 = vmul.u32 %v1364_v18, %v6355_v36  ;;  %v1350_v34 = vsel %vm1346_vm12, %v1334_v1, %v1349_v58 }
 0x25a   :  { %v1367_v33 = vmul.u32 %v1363_v37, %v6358_v29  ;;  %v1388_v40 = vmul.u32 %v1386_v32, %v6355_v36  ;;  %vm1478_vm13 = vcmp.gt.s32.totalorder %v6360_v6, 0  ;;  %v1277_v53 = vcvt.s32.f32 %v1270_v30 }
 0x25b   :  { %v1275_v15 = vand.u32 2147483647, %v1274_v17  ;;  %v1365_v56 = vmul.u32 %v1363_v37, %v6355_v36  ;;  %v1369_v49 = vshll.u32 %v1366_v3, 16  ;;  %v1368_v45 = vmul.u32 %v1364_v18, %v6358_v29 }
 0x25c   :  { %v1387_v27 = vmul.u32 %v1385_v12, %v6355_v36  ;;  %v1389_v4 = vmul.u32 %v1385_v12, %v6358_v29  ;;  %v1391_v59 = vshll.u32 %v1388_v40, 16  ;;  %v1371_v1 = vshll.u32 %v1367_v33, 16 }
 0x25d   :  { %v1278_v26 = vmul.f32 %v1277_v53, %v1275_v15  ;;  %vm1373_vm15 = vc.u32 %v1365_v56, %v1369_v49  ;;  %v1375_v24 = vadd.s32 %v1369_v49, %v1365_v56  ;;  %v1390_v61 = vmul.u32 %v1386_v32, %v6358_v29 }
 0x25e   :  { %v1374_v28 = vsel %vm1373_vm15, 1, %v5435_v52  ;;  %vm1395_vm3 = vc.u32 %v1387_v27, %v1391_v59  ;;  %v1479_v19 = vsel %vm1478_vm13, %v6360_v6, 0  ;;  %v1393_v9 = vshll.u32 %v1389_v4, 16 }
 0x25f   :  { %v1279_v16 = vxor.u32 2147483648, %v1278_v26  ;;  %v1376_v47 = vadd.s32 %v1374_v28, %v1368_v45  ;;  %vm1377_vm4 = vc.u32 %v1375_v24, %v1371_v1  ;;  %v1396_v36 = vsel %vm1395_vm3, 1, %v5435_v52 }
 0x260   :  { %v1378_v35 = vsel %vm1377_vm4, 1, %v5435_v52  ;;  %v1397_v7 = vadd.s32 %v1391_v59, %v1387_v27  ;;  %v1398_v46 = vadd.s32 %v1396_v36, %v1390_v61  ;;  %v1370_v55 = vshrl.u32 %v1366_v3, 16 }
 0x261   :  { %v1280_v50 = vsel %vm1159_vm8, %v1279_v16, %v1278_v26  ;;  %v1380_v29 = vadd.s32 %v1378_v35, %v1376_v47  ;;  %v1481_v39 = vand.u32 31, %v1479_v19  ;;  %v1351_v58 = vsel %vm1345_vm7, %v1348_v10, %v1350_v34 }
 0x262   :  { %v1283_v6 = vsel %vm6333_vm10, %v6044_v31, %v1280_v50  ;;  %v1372_v21 = vshrl.u32 %v1367_v33, 16  ;;  %vm1399_vm6 = vc.u32 %v1397_v7, %v1393_v9  ;;  %v1392_v18 = vshrl.u32 %v1388_v40, 16 }
 0x263   :  { %v1285_v23 = vmul.f32 %v1283_v6, %v1283_v6  ;;  %v1381_v30 = vadd.s32 %v1380_v29, %v1370_v55  ;;  %v1400_v14 = vsel %vm1399_vm6, 1, %v5435_v52  ;;  %v6455_v37 = vsub.s32 32, %v1481_v39 }
 0x264   :  { %v1394_v12 = vshrl.u32 %v1389_v4, 16  ;;  %v1402_v32 = vadd.s32 %v1400_v14, %v1398_v46  ;;  %v6457_v17 = vshrl.u32 %v1479_v19, 5  ;;  %v6461_v53 = vadd.s32 %v1397_v7, %v1393_v9 }
 0x265   :  { %v1286_v3 = vmul.f32 -0.001358992, %v1285_v23  ;;  %v1293_v15 = vmul.f32 -0.00019511016, %v1285_v23  ;;  %v6459_v38 = vadd.s32 %v1381_v30, %v1372_v21  ;;  %v1484_v10 = vshll.u32 %v5429_v42, %v1481_v39 }
 0x266   :  { %v1403_v60 = vadd.s32 %v1402_v32, %v1392_v18  ;;  %v1485_v34 = vshrl.u32 %v5430_v44, %v6455_v37  ;;  %v1488_v33 = vshrl.u32 %v5431_v48, %v6455_v37  ;;  %v1487_v49 = vshll.u32 %v5430_v44, %v1481_v39 }
 0x267   :  { %v1287_v40 = vadd.f32 0.041655596, %v1286_v3  ;;  %v1294_v56 = vadd.f32 0.008332121, %v1293_v15  ;;  %v1490_v45 = vshll.u32 %v5431_v48, %v1481_v39  ;;  %vm1407_vm8 = vc.u32 %v6459_v38, %v6461_v53 }
 0x268   :  { %v1404_v27 = vadd.s32 %v1403_v60, %v1394_v12  ;;  %v6472_v4 = vor.u32 %v1485_v34, %v1484_v10  ;;  %v1491_v59 = vshrl.u32 %v5432_v51, %v6455_v37  ;;  %v1493_v24 = vshll.u32 %v5432_v51, %v1481_v39 }
 0x269   :  { %v1288_v26 = vmul.f32 %v1287_v40, %v1285_v23  ;;  %v1295_v1 = vmul.f32 %v1294_v56, %v1285_v23  ;;  %v1494_v28 = vshrl.u32 %v5433_v54, %v6455_v37  ;;  %v6479_v19 = vor.u32 %v1488_v33, %v1487_v49 }
 0x26a   :  { %v1408_v61 = vadd.s32 1, %v1404_v27  ;;  %v1496_v16 = vshll.u32 %v5433_v54, %v1481_v39  ;;  %v1497_v47 = vshrl.u32 %v5434_v57, %v6455_v37  ;;  %v1405_v9 = vmul.u32 %v6329_v13, %v1351_v58 }
 0x26b   :  { %v1289_v36 = vadd.f32 -0.4999988, %v1288_v26  ;;  %v1296_v35 = vadd.f32 -0.16666654, %v1295_v1  ;;  %v1495_v7 = vor.u32 %v1494_v28, %v1493_v24  ;;  %v6485_v50 = vor.u32 %v1491_v59, %v1490_v45 }
 0x26c   :  { %v1409_v46 = vsel %vm1407_vm8, %v1408_v61, %v1404_v27  ;;  %v1498_v55 = vor.u32 %v1497_v47, %v1496_v16  ;;  %vm1499_vm10 = vcmp.lt.s32.totalorder %v6457_v17, 1  ;;  %vm1502_vm14 = vcmp.lt.s32.totalorder %v6457_v17, 4 }
 0x26d   :  { %v1290_v29 = vmul.f32 %v1289_v36, %v1285_v23  ;;  %v1297_v21 = vmul.f32 %v1296_v35, %v1285_v23  ;;  %v1410_v30 = vadd.s32 %v1409_v46, %v1405_v9  ;;  %vm1300_vm1 = vweird.f32 %v6044_v31 }
 0x26e   :  { %vm3776_vm11 = vcmp.lt.s32.totalorder %v6423_v22, 2  ;;  %v1507_v13 = vsel %vm1499_vm10, %v6472_v4, %v6479_v19  ;;  %v1508_v39 = vsel %vm1502_vm14, %v1495_v7, 920167782  ;;  %v6499_v58 = vshll.u32 %v1475_v62, 8 }
 0x26f   :  { %v1291_v23 = vadd.f32 1.0, %v1290_v29  ;;  %v1298_v14 = vadd.f32 1.0, %v1297_v21  ;;  %v1411_v18 = vadd.s32 536870912, %v1410_v30  ;;  %vm1501_vm2 = vcmp.lt.s32.totalorder %v6457_v17, 3 }
 0x270   :  { %vm1500_vm7 = vcmp.lt.s32.totalorder %v6457_v17, 2  ;;  %v1509_v12 = vsel %vm1501_vm2, %v6485_v50, %v1508_v39  ;;  %v1511_v32 = vsel %vm1499_vm10, %v6479_v19, %v6485_v50  ;;  %v1512_v0 = vsel %vm1502_vm14, %v1498_v55, 1326507024 }
 0x271   :  { %v1299_v62 = vmul.f32 %v1298_v14, %v1283_v6  ;;  %v1308_v3 = vxor.u32 2147483648, %v1291_v23  ;;  %v6512_v15 = vshrl.u32 %v1411_v18, 30  ;;  %v1510_v60 = vsel %vm1500_vm7, %v1507_v13, %v1509_v12  ;;  %v6551_v12 = vpop.f32.mrf.mxu2 }
 0x272   :  { %vm1303_vm12 = vcmp.lt.s32.totalorder %v6426_v8, 2  ;;  %vm3777_vm0 = vcmp.eq.s32.totalorder %v6423_v22, 0  ;;  %vm3780_vm13 = vcmp.eq.s32.totalorder %v6423_v22, 2  ;;  %v1513_v10 = vsel %vm1501_vm2, %v1495_v7, %v1512_v0 }
 0x273   :  { %vm1304_vm15 = vcmp.eq.s32.totalorder %v6426_v8, 0  ;;  %v1305_v34 = vxor.u32 2147483648, %v1299_v62  ;;  %vm1307_vm3 = vcmp.eq.s32.totalorder %v6426_v8, 2  ;;  %v1413_v6 = vshll.u32 %v6512_v15, 30 }
 0x274   :  { %v1309_v33 = vsel %vm1307_vm3, %v1308_v3, %v1299_v62  ;;  %v1514_v40 = vsel %vm1500_vm7, %v1511_v32, %v1513_v10  ;;  %v1516_v56 = vand.u32 65535, %v6499_v58  ;;  %v1541_v49 = vshrl.u32 %v1510_v60, 16 }
 0x275   :  { %v1306_v45 = vsel %vm1304_vm15, %v1291_v23, %v1305_v34  ;;  %v3779_v27 = vsel %vm3777_vm0, %v1291_v23, %v1305_v34  ;;  %v3782_v59 = vsel %vm3780_vm13, %v1308_v3, %v1299_v62  ;;  %v1414_v26 = vsub.s32 %v1410_v30, %v1413_v6 }
 0x276   :  { %v1310_v1 = vsel %vm1303_vm12, %v1306_v45, %v1309_v33  ;;  %v3783_v24 = vsel %vm3776_vm11, %v3779_v27, %v3782_v59  ;;  %v1518_v28 = vand.u32 65535, %v1514_v40  ;;  %v1519_v61 = vshrl.u32 %v1514_v40, 16 }
 0x277   :  { %v1311_v16 = vsel %vm1300_vm1, nan, %v1310_v1  ;;  %v3784_v47 = vsel %vm1300_vm1, nan, %v3783_v24  ;;  %vm1415_vm4 = vcmp.lt.s32.totalorder %v1414_v26, 0  ;;  %v1416_v36 = vsub.s32 0, %v1414_v26 }
 0x278   :  { %v5177_v35 = vsel %vm5730_vm5, %v1311_v16, %v3784_v47  ;;  %vm5193_vm6 = vcmp.ge.f32.partialorder %v6033_v20, 0.0  ;;  %v1517_v8 = vshrl.u32 %v6499_v58, 16  ;;  %v1521_v9 = vmul.u32 %v1519_v61, %v1516_v56 }
 0x279   :  { %v5209_v22 = vsel %vm5193_vm6, %v5177_v35, 0.0  ;;  %v1417_v7 = vsel %vm1415_vm4, %v1416_v36, %v1414_v26  ;;  %v1520_v29 = vmul.u32 %v1518_v28, %v1516_v56  ;;  %v1540_v21 = vand.u32 65535, %v1510_v60 }
 0x27a   :  { %5226 = vst.msk [vmem:[%s7606_s2 + $0x30] sm:$0xff] %vm5219_vm9, %v5209_v22  ;;  %v1418_v46 = vclz %v1417_v7  ;;  %v1522_v31 = vmul.u32 %v1518_v28, %v1517_v8  ;;  %v1524_v55 = vshll.u32 %v1521_v9, 16  ;;  %v1543_v30 = vmul.u32 %v1541_v49, %v1516_v56 }
 0x27b   :  { %v1406_v13 = vadd.s32 %v6461_v53, %v6459_v38  ;;  %v1483_v39 = vshrl.u32 %v5429_v42, %v6455_v37  ;;  %v1436_v23 = vsub.s32 4, %v6512_v15  ;;  %v1504_v14 = vsel %vm1502_vm14, %v6485_v50, 2102212464 }
 0x27c   :  { %v5282_v20 = vadd.s32 4294967294, %v1418_v46  ;;  %v1523_v18 = vmul.u32 %v1519_v61, %v1517_v8  ;;  %vm1528_vm8 = vc.u32 %v1520_v29, %v1524_v55  ;;  %v1526_v32 = vshll.u32 %v1522_v31, 16  ;;  %v6556_v61 = vld [vmem:[#allocation4] ss:$0 sm:$0xff] }
 0x27d   :  { %v1529_v0 = vsel %vm1528_vm8, 1, %v5435_v52  ;;  %v1530_v62 = vadd.s32 %v1524_v55, %v1520_v29  ;;  %v1544_v3 = vmul.u32 %v1540_v21, %v1517_v8  ;;  %v1546_v60 = vshll.u32 %v1543_v30, 16 }
 0x27e   :  { %vm5283_vm1 = vcmp.lt.s32.totalorder %v5282_v20, 0  ;;  %v1531_v53 = vadd.s32 %v1529_v0, %v1523_v18  ;;  %v1542_v34 = vmul.u32 %v1540_v21, %v1516_v56  ;;  %v1525_v33 = vshrl.u32 %v1521_v9, 16  ;;  %v6572_v21 = vpop.f32.mrf.mxu2 }
 0x27f   :  { %v1421_v38 = vsel %vm5283_vm1, 0, %v5282_v20  ;;  %vm1532_vm11 = vc.u32 %v1530_v62, %v1526_v32  ;;  %v1545_v40 = vmul.u32 %v1541_v49, %v1517_v8  ;;  %v1548_v1 = vshll.u32 %v1544_v3, 16 }
 0x280   :  { %v1422_v37 = vsub.s32 32, %v1421_v38  ;;  %v1426_v10 = vsub.s32 4294967266, %v1421_v38  ;;  %v1423_v6 = vshll.u32 %v1414_v26, %v1421_v38  ;;  %v1533_v50 = vsel %vm1532_vm11, 1, %v5435_v52 }
 0x281   :  { %v1535_v59 = vadd.s32 %v1533_v50, %v1531_v53  ;;  %vm1550_vm14 = vc.u32 %v1542_v34, %v1546_v60  ;;  %v1552_v28 = vadd.s32 %v1546_v60, %v1542_v34  ;;  %v6560_v16 = vmul.f32 %v6556_v61, %v6551_v12 }
 0x282   :  { %v1424_v45 = vshrl.u32 %v1406_v13, %v1422_v37  ;;  %v1427_v27 = vadd.s32 127, %v1426_v10  ;;  %v1551_v24 = vsel %vm1550_vm14, 1, %v5435_v52  ;;  %vm1314_vm12 = vcmp.lt.s32.totalorder %v6289_v63, 0 }
 0x283   :  { %v1536_v47 = vadd.s32 %v1535_v59, %v1525_v33  ;;  %v1553_v36 = vadd.s32 %v1551_v24, %v1545_v40  ;;  %v1503_v49 = vsel %vm1499_vm10, %v1483_v39, %v6472_v4  ;;  %vm1554_vm0 = vc.u32 %v1552_v28, %v1548_v1 }
 0x284   :  { %v1425_v56 = vor.u32 %v1424_v45, %v1423_v6  ;;  %v1428_v26 = vshll.u32 %v1427_v27, 23  ;;  %v1505_v8 = vsel %vm1501_vm2, %v6479_v19, %v1504_v14  ;;  %v1527_v9 = vshrl.u32 %v1522_v31, 16 }
 0x285   :  { %v1555_v22 = vsel %vm1554_vm0, 1, %v5435_v52  ;;  %v1547_v7 = vshrl.u32 %v1543_v30, 16  ;;  %v1622_v55 = vand.u32 2147483647, %v6560_v16  ;;  %v1625_v29 = vand.u32 2139095040, %v6560_v16 }
 0x286   :  { %v1429_v35 = vor.u32 4788187, %v1428_v26  ;;  %v1557_v46 = vadd.s32 %v1555_v22, %v1553_v36  ;;  %v1432_v20 = vcvt.s32.f32 %v1425_v56  ;;  %v1437_v4 = vsel %vm1314_vm12, %v1436_v23, %v6512_v15 }
 0x287   :  { %v1537_v39 = vadd.s32 %v1536_v47, %v1527_v9  ;;  %vm6579_vm10 = vcmp.le.f32.partialorder %v1312_v43, 0.7853982  ;;  %v1549_v31 = vshrl.u32 %v1544_v3, 16  ;;  %v1626_v14 = vshrl.u32 %v1625_v29, 23 }
 0x288   :  { %v1430_v13 = vand.u32 2147483647, %v1429_v35  ;;  %v1558_v30 = vadd.s32 %v1557_v46, %v1547_v7  ;;  %v1506_v32 = vsel %vm1500_vm7, %v1503_v49, %v1505_v8  ;;  %v1556_v0 = vadd.s32 %v1552_v28, %v1548_v1 }
 0x289   :  { %v6587_v62 = vmul.f32 %v6556_v61, %v6572_v21  ;;  %v1439_v15 = vsel %vm6579_vm10, 0, %v1437_v4  ;;  %v5287_v43 = vadd.s32 4294967169, %v1626_v14  ;;  %v1629_v38 = vand.u32 8388607, %v1622_v55 }
 0x28a   :  { %v1433_v18 = vmul.f32 %v1432_v20, %v1430_v13  ;;  %v1559_v23 = vadd.s32 %v1558_v30, %v1549_v31  ;;  %vm1562_vm2 = vc.u32 %v1537_v39, %v1556_v0  ;;  %v1456_v10 = vadd.s32 3, %v1439_v15 }
 0x28b   :  { %v1780_v3 = vand.u32 2139095040, %v6587_v62  ;;  %v1632_v17 = vadd.s32 1, %v5287_v43  ;;  %v1560_v34 = vmul.u32 %v6499_v58, %v1506_v32  ;;  %v1630_v50 = vor.u32 8388608, %v1629_v38 }
 0x28c   :  { %v1434_v53 = vxor.u32 2147483648, %v1433_v18  ;;  %v1563_v60 = vadd.s32 1, %v1559_v23  ;;  %v6604_v26 = vand.u32 3, %v1456_v10  ;;  %v6606_v58 = vand.u32 3, %v1439_v15 }
 0x28d   :  { %vm1633_vm7 = vcmp.gt.s32.totalorder %v1632_v17, 0  ;;  %v1781_v59 = vshrl.u32 %v1780_v3, 23  ;;  %v6608_v47 = vshll.u32 %v1630_v50, 8  ;;  %vm7609_vm13 = vcmp.lt.s32.totalorder %v6308_v41, 0 }
 0x28e   :  { %v1435_v37 = vsel %vm1314_vm12, %v1434_v53, %v1433_v18  ;;  %v1564_v33 = vsel %vm1562_vm2, %v1563_v60, %v1559_v23  ;;  %v1634_v27 = vsel %vm1633_vm7, %v1632_v17, 0  ;;  %v6611_v9 = vadd.s32 %v1556_v0, %v1537_v39 }
 0x28f   :  { %v6600_v6 = vsel %vm6579_vm10, %v6289_v63, %v1435_v37  ;;  %v1565_v45 = vadd.s32 %v1564_v33, %v1560_v34  ;;  %v1636_v1 = vand.u32 31, %v1634_v27  ;;  %v5290_v8 = vadd.s32 4294967169, %v1781_v59 }
 0x290   :  { %v1440_v40 = vmul.f32 %v6600_v6, %v6600_v6  ;;  %vm6615_vm15 = vcmp.le.f32.partialorder %v1467_v2, 0.7853982  ;;  %v1777_v20 = vand.u32 2147483647, %v6587_v62  ;;  %v6620_v19 = vshrl.u32 %v1634_v27, 5 }
 0x291   :  { %v1566_v56 = vadd.s32 536870912, %v1565_v45  ;;  %v1637_v22 = vsub.s32 32, %v1636_v1  ;;  %v6623_v31 = vand.u32 65535, %v6608_v47  ;;  %v6626_v39 = vshrl.u32 %v6608_v47, 16 }
 0x292   :  { %v1441_v24 = vmul.f32 -0.001358992, %v1440_v40  ;;  %v1448_v28 = vmul.f32 -0.00019511016, %v1440_v40  ;;  %vm1462_vm3 = vcmp.eq.s32.totalorder %v6604_v26, 2  ;;  %vm3934_vm4 = vcmp.eq.s32.totalorder %v6606_v58, 2 }
 0x293   :  { %v1567_v35 = vshrl.u32 %v1566_v56, 30  ;;  %v6632_v18 = vadd.s32 1, %v5290_v8  ;;  %vm1459_vm6 = vcmp.eq.s32.totalorder %v6604_v26, 0  ;;  %vm3931_vm8 = vcmp.eq.s32.totalorder %v6606_v58, 0 }
 0x294   :  { %v1442_v36 = vadd.f32 0.041655596, %v1441_v24  ;;  %v1449_v49 = vadd.f32 0.008332121, %v1448_v28  ;;  %v1639_v32 = vshll.u32 %v5429_v42, %v1636_v1  ;;  %v1640_v0 = vshrl.u32 %v5430_v44, %v1637_v22 }
 0x295   :  { %v1568_v13 = vshll.u32 %v1567_v35, 30  ;;  %v1591_v4 = vsub.s32 4, %v1567_v35  ;;  %v1642_v15 = vshll.u32 %v5430_v44, %v1636_v1  ;;  %v1643_v23 = vshrl.u32 %v5431_v48, %v1637_v22 }
 0x296   :  { %v1443_v7 = vmul.f32 %v1442_v36, %v1440_v40  ;;  %v1450_v46 = vmul.f32 %v1449_v49, %v1440_v40  ;;  %vm1458_vm1 = vcmp.lt.s32.totalorder %v6604_v26, 2  ;;  %vm3930_vm11 = vcmp.lt.s32.totalorder %v6606_v58, 2 }
 0x297   :  { %v6630_v2 = vsub.s32 %v1565_v45, %v1568_v13  ;;  %vm1455_vm12 = vweird.f32 %v6289_v63  ;;  %v1592_v3 = vsel %vm7609_vm13, %v1591_v4, %v1567_v35  ;;  %v1645_v60 = vshll.u32 %v5431_v48, %v1636_v1 }
 0x298   :  { %v1444_v30 = vadd.f32 -0.4999988, %v1443_v7  ;;  %v1451_v14 = vadd.f32 -0.16666654, %v1450_v46  ;;  %v1646_v17 = vshrl.u32 %v5432_v51, %v1637_v22  ;;  %v1649_v37 = vshrl.u32 %v5433_v54, %v1637_v22 }
 0x299   :  { %vm1570_vm14 = vcmp.lt.s32.totalorder %v6630_v2, 0  ;;  %v1571_v53 = vsub.s32 0, %v6630_v2  ;;  %v1652_v50 = vshrl.u32 %v5434_v57, %v1637_v22  ;;  %vm5194_vm0 = vcmp.ge.f32.partialorder %v6282_v11, 0.0 }
 0x29a   :  { %v1445_v43 = vmul.f32 %v1444_v30, %v1440_v40  ;;  %v1452_v38 = vmul.f32 %v1451_v14, %v1440_v40  ;;  %v1638_v45 = vshrl.u32 %v5429_v42, %v1637_v22  ;;  %v1641_v27 = vor.u32 %v1640_v0, %v1639_v32 }
 0x29b   :  { %v1572_v33 = vsel %vm1570_vm14, %v1571_v53, %v6630_v2  ;;  %v1648_v59 = vshll.u32 %v5432_v51, %v1636_v1  ;;  %v1644_v56 = vor.u32 %v1643_v23, %v1642_v15  ;;  %v1651_v36 = vshll.u32 %v5433_v54, %v1636_v1 }
 0x29c   :  { %v1446_v10 = vadd.f32 1.0, %v1445_v43  ;;  %v1453_v34 = vadd.f32 1.0, %v1452_v38  ;;  %v1573_v40 = vclz %v1572_v33  ;;  %v6659_v35 = vsel %vm6615_vm15, 0, %v1592_v3 }
 0x29d   :  { %v1647_v8 = vor.u32 %v1646_v17, %v1645_v60  ;;  %v1650_v7 = vor.u32 %v1649_v37, %v1648_v59  ;;  %v1653_v13 = vor.u32 %v1652_v50, %v1651_v36  ;;  %vm1654_vm10 = vcmp.lt.s32.totalorder %v6620_v19, 1 }
 0x29e   :  { %v1454_v24 = vmul.f32 %v1453_v34, %v6600_v6  ;;  %v1463_v28 = vxor.u32 2147483648, %v1446_v10  ;;  %v5285_v49 = vadd.s32 4294967294, %v1573_v40  ;;  %vm1655_vm2 = vcmp.lt.s32.totalorder %v6620_v19, 2 }
 0x29f   :  { %vm1656_vm14 = vcmp.lt.s32.totalorder %v6620_v19, 3  ;;  %vm1657_vm13 = vcmp.lt.s32.totalorder %v6620_v19, 4  ;;  %v1662_v15 = vsel %vm1654_vm10, %v1641_v27, %v1644_v56  ;;  %v1666_v60 = vsel %vm1654_vm10, %v1644_v56, %v1647_v8 }
 0x2a0   :  { %v1460_v46 = vxor.u32 2147483648, %v1454_v24  ;;  %v1464_v6 = vsel %vm1462_vm3, %v1463_v28, %v1454_v24  ;;  %v3936_v22 = vsel %vm3934_vm4, %v1463_v28, %v1454_v24  ;;  %vm5286_vm7 = vcmp.lt.s32.totalorder %v5285_v49, 0 }
 0x2a1   :  { %v1576_v30 = vsel %vm5286_vm7, 0, %v5285_v49  ;;  %v1663_v58 = vsel %vm1657_vm13, %v1650_v7, 920167782  ;;  %v1611_v24 = vadd.s32 3, %v6659_v35  ;;  %v6712_v49 = vand.u32 8388607, %v1777_v20 }
 0x2a2   :  { %v1461_v1 = vsel %vm1459_vm6, %v1446_v10, %v1460_v46  ;;  %v3933_v4 = vsel %vm3931_vm8, %v1446_v10, %v1460_v46  ;;  %v1577_v0 = vsub.s32 32, %v1576_v30  ;;  %v1578_v38 = vshll.u32 %v6630_v2, %v1576_v30 }
 0x2a3   :  { %v1465_v14 = vsel %vm1458_vm1, %v1461_v1, %v1464_v6  ;;  %v3937_v32 = vsel %vm3930_vm11, %v3933_v4, %v3936_v22  ;;  %v1581_v53 = vsub.s32 4294967266, %v1576_v30  ;;  %v1664_v63 = vsel %vm1656_vm14, %v1647_v8, %v1663_v58 }
 0x2a4   :  { %v1466_v23 = vsel %vm1455_vm12, nan, %v1465_v14  ;;  %v3938_v43 = vsel %vm1455_vm12, nan, %v3937_v32  ;;  %v1579_v3 = vshrl.u32 %v6611_v9, %v1577_v0  ;;  %v1667_v2 = vsel %vm1657_vm13, %v1653_v13, 1326507024 }
 0x2a5   :  { %v5178_v26 = vsel %vm5730_vm5, %v1466_v23, %v3938_v43  ;;  %v1582_v37 = vadd.s32 127, %v1581_v53  ;;  %v1659_v10 = vsel %vm1657_vm13, %v1647_v8, 2102212464  ;;  %v1665_v11 = vsel %vm1655_vm2, %v1662_v15, %v1664_v63 }
 0x2a6   :  { %v5210_v17 = vsel %vm5194_vm0, %v5178_v26, 0.0  ;;  %v1580_v9 = vor.u32 %v1579_v3, %v1578_v38  ;;  %v1668_v34 = vsel %vm1656_vm14, %v1650_v7, %v1667_v2  ;;  %v1695_v40 = vand.u32 65535, %v1665_v11 }
 0x2a7   :  { %5227 = vst.msk [vmem:[%s7606_s2 + $0x38] sm:$0xff] %vm5219_vm9, %v5210_v17  ;;  %v1583_v33 = vshll.u32 %v1582_v37, 23  ;;  %v1669_v50 = vsel %vm1655_vm2, %v1666_v60, %v1668_v34  ;;  %v1696_v59 = vshrl.u32 %v1665_v11, 16  ;;  %v1658_v46 = vsel %vm1654_vm10, %v1638_v45, %v1641_v27 }
 0x2a8   :  { %v1673_v28 = vand.u32 65535, %v1669_v50  ;;  %v1674_v36 = vshrl.u32 %v1669_v50, 16  ;;  %v1699_v13 = vmul.u32 %v1695_v40, %v6626_v39  ;;  %v1587_v6 = vcvt.s32.f32 %v1580_v9 }
 0x2a9   :  { %v1584_v8 = vor.u32 4788187, %v1583_v33  ;;  %v1698_v7 = vmul.u32 %v1696_v59, %v6623_v31  ;;  %v1660_v22 = vsel %vm1656_vm14, %v1644_v56, %v1659_v10  ;;  %v1697_v14 = vmul.u32 %v1695_v40, %v6623_v31 }
 0x2aa   :  { %v1676_v1 = vmul.u32 %v1674_v36, %v6623_v31  ;;  %v1677_v4 = vmul.u32 %v1673_v28, %v6626_v39  ;;  %vm1788_vm13 = vcmp.gt.s32.totalorder %v6632_v18, 0  ;;  %v1675_v45 = vmul.u32 %v1673_v28, %v6623_v31 }
 0x2ab   :  { %v1585_v30 = vand.u32 2147483647, %v1584_v8  ;;  %v1701_v32 = vshll.u32 %v1698_v7, 16  ;;  %v1678_v27 = vmul.u32 %v1674_v36, %v6626_v39  ;;  %v1700_v15 = vmul.u32 %v1696_v59, %v6626_v39 }
 0x2ac   :  { %v1679_v0 = vshll.u32 %v1676_v1, 16  ;;  %v1681_v43 = vshll.u32 %v1677_v4, 16  ;;  %v1703_v56 = vshll.u32 %v1699_v13, 16  ;;  %v1789_v31 = vsel %vm1788_vm13, %v6632_v18, 0 }
 0x2ad   :  { %v1588_v23 = vmul.f32 %v1587_v6, %v1585_v30  ;;  %vm1705_vm3 = vc.u32 %v1697_v14, %v1701_v32  ;;  %v1707_v26 = vadd.s32 %v1701_v32, %v1697_v14  ;;  %v1702_v39 = vshrl.u32 %v1698_v7, 16 }
 0x2ae   :  { %vm1683_vm4 = vc.u32 %v1675_v45, %v1679_v0  ;;  %v1685_v38 = vadd.s32 %v1679_v0, %v1675_v45  ;;  %v1706_v53 = vsel %vm1705_vm3, 1, %v5435_v52  ;;  %vm7628_vm1 = vcmp.lt.s32.totalorder %v6308_v41, 0 }
 0x2af   :  { %v1589_v3 = vxor.u32 2147483648, %v1588_v23  ;;  %v1684_v58 = vsel %vm1683_vm4, 1, %v5435_v52  ;;  %v1708_v60 = vadd.s32 %v1706_v53, %v1700_v15  ;;  %vm1709_vm8 = vc.u32 %v1707_v26, %v1703_v56 }
 0x2b0   :  { %v1686_v17 = vadd.s32 %v1684_v58, %v1678_v27  ;;  %vm1687_vm6 = vc.u32 %v1685_v38, %v1681_v43  ;;  %v1680_v63 = vshrl.u32 %v1676_v1, 16  ;;  %v1710_v9 = vsel %vm1709_vm8, 1, %v5435_v52 }
 0x2b1   :  { %v1590_v37 = vsel %vm7628_vm1, %v1589_v3, %v1588_v23  ;;  %v1688_v2 = vsel %vm1687_vm6, 1, %v5435_v52  ;;  %v1712_v34 = vadd.s32 %v1710_v9, %v1708_v60  ;;  %v1791_v33 = vand.u32 31, %v1789_v31 }
 0x2b2   :  { %v1593_v10 = vsel %vm6615_vm15, %v6308_v41, %v1590_v37  ;;  %v1690_v11 = vadd.s32 %v1688_v2, %v1686_v17  ;;  %v1661_v50 = vsel %vm1655_vm2, %v1658_v46, %v1660_v22  ;;  %v1682_v40 = vshrl.u32 %v1677_v4, 16 }
 0x2b3   :  { %v1595_v18 = vmul.f32 %v1593_v10, %v1593_v10  ;;  %v1785_v59 = vor.u32 8388608, %v6712_v49  ;;  %v1704_v36 = vshrl.u32 %v1699_v13, 16  ;;  %v1713_v8 = vadd.s32 %v1712_v34, %v1702_v39 }
 0x2b4   :  { %v1691_v28 = vadd.s32 %v1690_v11, %v1680_v63  ;;  %v6742_v7 = vsub.s32 32, %v1791_v33  ;;  %v6744_v30 = vand.u32 3, %v1611_v24  ;;  %v6747_v29 = vand.u32 3, %v6659_v35 }
 0x2b5   :  { %v1596_v6 = vmul.f32 -0.001358992, %v1595_v18  ;;  %v1603_v1 = vmul.f32 -0.00019511016, %v1595_v18  ;;  %v6751_v32 = vadd.s32 %v1707_v26, %v1703_v56  ;;  %v1714_v19 = vadd.s32 %v1713_v8, %v1704_v36 }
 0x2b6   :  { %v6749_v14 = vadd.s32 %v1691_v28, %v1682_v40  ;;  %v1715_v46 = vmul.u32 %v6608_v47, %v1661_v50  ;;  %v6754_v13 = vshrl.u32 %v1789_v31, 5  ;;  %v1797_v45 = vshll.u32 %v5430_v44, %v1791_v33 }
 0x2b7   :  { %v1597_v22 = vadd.f32 0.041655596, %v1596_v6  ;;  %v1604_v4 = vadd.f32 0.008332121, %v1603_v1  ;;  %v1718_v24 = vadd.s32 1, %v1714_v19  ;;  %v1798_v35 = vshrl.u32 %v5431_v48, %v6742_v7 }
 0x2b8   :  { %vm1717_vm15 = vc.u32 %v6749_v14, %v6751_v32  ;;  %v1801_v27 = vshrl.u32 %v5432_v51, %v6742_v7  ;;  %v1795_v47 = vshrl.u32 %v5430_v44, %v6742_v7  ;;  %v1800_v23 = vshll.u32 %v5431_v48, %v1791_v33 }
 0x2b9   :  { %v1598_v0 = vmul.f32 %v1597_v22, %v1595_v18  ;;  %v1605_v15 = vmul.f32 %v1604_v4, %v1595_v18  ;;  %v1719_v43 = vsel %vm1717_vm15, %v1718_v24, %v1714_v19  ;;  %v1803_v56 = vshll.u32 %v5432_v51, %v1791_v33 }
 0x2ba   :  { %v1804_v38 = vshrl.u32 %v5433_v54, %v6742_v7  ;;  %v1806_v53 = vshll.u32 %v5433_v54, %v1791_v33  ;;  %v1720_v58 = vadd.s32 %v1719_v43, %v1715_v46  ;;  %v1807_v60 = vshrl.u32 %v5434_v57, %v6742_v7 }
 0x2bb   :  { %v1599_v26 = vadd.f32 -0.4999988, %v1598_v0  ;;  %v1606_v3 = vadd.f32 -0.16666654, %v1605_v15  ;;  %v1794_v31 = vshll.u32 %v5429_v42, %v1791_v33  ;;  %v6773_v17 = vor.u32 %v1798_v35, %v1797_v45 }
 0x2bc   :  { %v6775_v39 = vor.u32 %v1801_v27, %v1800_v23  ;;  %v1805_v37 = vor.u32 %v1804_v38, %v1803_v56  ;;  %vm4084_vm11 = vcmp.lt.s32.totalorder %v6747_v29, 2  ;;  %v1721_v9 = vadd.s32 536870912, %v1720_v58 }
 0x2bd   :  { %v1600_v63 = vmul.f32 %v1599_v26, %v1595_v18  ;;  %v1607_v2 = vmul.f32 %v1606_v3, %v1595_v18  ;;  %v1808_v11 = vor.u32 %v1807_v60, %v1806_v53  ;;  %vm1610_vm12 = vweird.f32 %v6308_v41 }
 0x2be   :  { %vm1613_vm0 = vcmp.lt.s32.totalorder %v6744_v30, 2  ;;  %vm4085_vm10 = vcmp.eq.s32.totalorder %v6747_v29, 0  ;;  %vm4088_vm2 = vcmp.eq.s32.totalorder %v6747_v29, 2  ;;  %v6782_v34 = vor.u32 %v1795_v47, %v1794_v31 }
 0x2bf   :  { %v1601_v33 = vadd.f32 1.0, %v1600_v63  ;;  %v1608_v50 = vadd.f32 1.0, %v1607_v2  ;;  %v6784_v40 = vshrl.u32 %v1721_v9, 30  ;;  %vm1812_vm7 = vcmp.lt.s32.totalorder %v6754_v13, 4 }
 0x2c0   :  { %vm1809_vm14 = vcmp.lt.s32.totalorder %v6754_v13, 1  ;;  %vm1811_vm13 = vcmp.lt.s32.totalorder %v6754_v13, 3  ;;  %v1818_v18 = vsel %vm1812_vm7, %v1805_v37, 920167782  ;;  %v1822_v28 = vsel %vm1812_vm7, %v1808_v11, 1326507024 }
 0x2c1   :  { %v1609_v36 = vmul.f32 %v1608_v50, %v1593_v10  ;;  %v1618_v8 = vxor.u32 2147483648, %v1601_v33  ;;  %v1723_v6 = vshll.u32 %v6784_v40, 30  ;;  %v1821_v1 = vsel %vm1809_vm14, %v6773_v17, %v6775_v39 }
 0x2c2   :  { %vm1614_vm3 = vcmp.eq.s32.totalorder %v6744_v30, 0  ;;  %vm1617_vm4 = vcmp.eq.s32.totalorder %v6744_v30, 2  ;;  %vm1810_vm6 = vcmp.lt.s32.totalorder %v6754_v13, 2  ;;  %v1823_v19 = vsel %vm1811_vm13, %v1805_v37, %v1822_v28 }
 0x2c3   :  { %v1615_v46 = vxor.u32 2147483648, %v1609_v36  ;;  %v1724_v22 = vsub.s32 %v1720_v58, %v1723_v6  ;;  %v1817_v10 = vsel %vm1809_vm14, %v6782_v34, %v6773_v17  ;;  %v6809_v4 = vshll.u32 %v1785_v59, 8 }
 0x2c4   :  { %v1619_v45 = vsel %vm1617_vm4, %v1618_v8, %v1609_v36  ;;  %v4090_v24 = vsel %vm4088_vm2, %v1618_v8, %v1609_v36  ;;  %v1819_v35 = vsel %vm1811_vm13, %v6775_v39, %v1818_v18  ;;  %v1824_v27 = vsel %vm1810_vm6, %v1821_v1, %v1823_v19 }
 0x2c5   :  { %v1616_v0 = vsel %vm1614_vm3, %v1601_v33, %v1615_v46  ;;  %v4087_v15 = vsel %vm4085_vm10, %v1601_v33, %v1615_v46  ;;  %vm1725_vm8 = vcmp.lt.s32.totalorder %v1724_v22, 0  ;;  %v1726_v47 = vsub.s32 0, %v1724_v22 }
 0x2c6   :  { %v1620_v49 = vsel %vm1613_vm0, %v1616_v0, %v1619_v45  ;;  %v4091_v59 = vsel %vm4084_vm11, %v4087_v15, %v4090_v24  ;;  %vm5195_vm1 = vcmp.ge.f32.partialorder %v6298_v25, 0.0  ;;  %v1828_v23 = vand.u32 65535, %v1824_v27 }
 0x2c7   :  { %v1621_v43 = vsel %vm1610_vm12, nan, %v1620_v49  ;;  %v4092_v56 = vsel %vm1610_vm12, nan, %v4091_v59  ;;  %v1727_v38 = vsel %vm1725_vm8, %v1726_v47, %v1724_v22  ;;  %v1820_v53 = vsel %vm1810_vm6, %v1817_v10, %v1819_v35 }
 0x2c8   :  { %v5179_v30 = vsel %vm5730_vm5, %v1621_v43, %v4092_v56  ;;  %v1728_v26 = vclz %v1727_v38  ;;  %v1827_v29 = vshrl.u32 %v6809_v4, 16  ;;  %v1829_v3 = vshrl.u32 %v1824_v27, 16  ;;  %v6847_v43 = vpop.f32.mrf.mxu2 }
 0x2c9   :  { %v5211_v58 = vsel %vm5195_vm1, %v5179_v30, 0.0  ;;  %v1826_v25 = vand.u32 65535, %v6809_v4  ;;  %v1851_v31 = vshrl.u32 %v1820_v53, 16  ;;  %v1850_v63 = vand.u32 65535, %v1820_v53 }
 0x2ca   :  { %5228 = vst.msk [vmem:[%s7606_s2 + $0x40] sm:$0xff] %vm5219_vm9, %v5211_v58  ;;  %v5288_v41 = vadd.s32 4294967294, %v1728_v26  ;;  %v1832_v60 = vmul.u32 %v1828_v23, %v1827_v29  ;;  %v1716_v2 = vadd.s32 %v6751_v32, %v6749_v14  ;;  %v1746_v9 = vsub.s32 4, %v6784_v40 }
 0x2cb   :  { %v1831_v37 = vmul.u32 %v1829_v3, %v1826_v25  ;;  %v1793_v11 = vshrl.u32 %v5429_v42, %v6742_v7  ;;  %v1830_v50 = vmul.u32 %v1828_v23, %v1826_v25  ;;  %v1833_v18 = vmul.u32 %v1829_v3, %v1827_v29 }
 0x2cc   :  { %vm5289_vm15 = vcmp.lt.s32.totalorder %v5288_v41, 0  ;;  %vm1624_vm11 = vcmp.lt.s32.totalorder %v6560_v16, 0  ;;  %v1836_v6 = vshll.u32 %v1832_v60, 16  ;;  %v1853_v1 = vmul.u32 %v1851_v31, %v1826_v25 }
 0x2cd   :  { %v1731_v33 = vsel %vm5289_vm15, 0, %v5288_v41  ;;  %v1834_v28 = vshll.u32 %v1831_v37, 16  ;;  %v1854_v14 = vmul.u32 %v1850_v63, %v1827_v29  ;;  %v1835_v7 = vshrl.u32 %v1831_v37, 16 }
 0x2ce   :  { %v1732_v36 = vsub.s32 32, %v1731_v33  ;;  %v1736_v8 = vsub.s32 4294967266, %v1731_v33  ;;  %v1733_v19 = vshll.u32 %v1724_v22, %v1731_v33  ;;  %v1856_v24 = vshll.u32 %v1853_v1, 16 }
 0x2cf   :  { %vm1838_vm12 = vc.u32 %v1830_v50, %v1834_v28  ;;  %v1840_v46 = vadd.s32 %v1834_v28, %v1830_v50  ;;  %v1852_v27 = vmul.u32 %v1850_v63, %v1826_v25  ;;  %v1855_v49 = vmul.u32 %v1851_v31, %v1827_v29  ;;  %v6869_v50 = vpop.f32.mrf.mxu3 }
 0x2d0   :  { %v1734_v32 = vshrl.u32 %v1716_v2, %v1732_v36  ;;  %v1737_v10 = vadd.s32 127, %v1736_v8  ;;  %v1839_v45 = vsel %vm1838_vm12, 1, %v5435_v52  ;;  %v1858_v23 = vshll.u32 %v1854_v14, 16 }
 0x2d1   :  { %v1841_v35 = vadd.s32 %v1839_v45, %v1833_v18  ;;  %vm1842_vm0 = vc.u32 %v1840_v46, %v1836_v6  ;;  %vm1860_vm10 = vc.u32 %v1852_v27, %v1856_v24  ;;  %v1862_v22 = vadd.s32 %v1856_v24, %v1852_v27 }
 0x2d2   :  { %v1735_v0 = vor.u32 %v1734_v32, %v1733_v19  ;;  %v1738_v15 = vshll.u32 %v1737_v10, 23  ;;  %v1843_v47 = vsel %vm1842_vm0, 1, %v5435_v52  ;;  %v1813_v38 = vsel %vm1809_vm14, %v1793_v11, %v6782_v34 }
 0x2d3   :  { %v1845_v59 = vadd.s32 %v1843_v47, %v1841_v35  ;;  %v1814_v53 = vsel %vm1812_vm7, %v6775_v39, 2102212464  ;;  %v1861_v30 = vsel %vm1860_vm10, 1, %v5435_v52  ;;  %v1837_v26 = vshrl.u32 %v1832_v60, 16 }
 0x2d4   :  { %v1739_v56 = vor.u32 4788187, %v1738_v15  ;;  %v1863_v29 = vadd.s32 %v1861_v30, %v1855_v49  ;;  %vm1864_vm2 = vc.u32 %v1862_v22, %v1858_v23  ;;  %v1742_v25 = vcvt.s32.f32 %v1735_v0 }
 0x2d5   :  { %v1846_v3 = vadd.s32 %v1845_v59, %v1835_v7  ;;  %v1865_v41 = vsel %vm1864_vm2, 1, %v5435_v52  ;;  %v6859_v31 = vmul.f32 %v6556_v61, %v6847_v43  ;;  %v1747_v34 = vsel %vm1624_vm11, %v1746_v9, %v6784_v40 }
 0x2d6   :  { %v1740_v58 = vand.u32 2147483647, %v1739_v56  ;;  %v1815_v39 = vsel %vm1811_vm13, %v6773_v17, %v1814_v53  ;;  %v1857_v60 = vshrl.u32 %v1853_v1, 16  ;;  %v1867_v37 = vadd.s32 %v1865_v41, %v1863_v29 }
 0x2d7   :  { %v1847_v2 = vadd.s32 %v1846_v3, %v1837_v26  ;;  %v1932_v11 = vand.u32 2147483647, %v6859_v31  ;;  %v1935_v33 = vand.u32 2139095040, %v6859_v31  ;;  %vm1623_vm7 = vcmp.le.f32.partialorder %v1622_v55, 0.7853982 }
 0x2d8   :  { %v1743_v63 = vmul.f32 %v1742_v25, %v1740_v58  ;;  %v1859_v18 = vshrl.u32 %v1854_v14, 16  ;;  %v1868_v28 = vadd.s32 %v1867_v37, %v1857_v60  ;;  %v1816_v9 = vsel %vm1810_vm6, %v1813_v38, %v1815_v39 }
 0x2d9   :  { %v1866_v17 = vadd.s32 %v1862_v22, %v1858_v23  ;;  %v1936_v36 = vshrl.u32 %v1935_v33, 23  ;;  %v1749_v8 = vsel %vm1623_vm7, 0, %v1747_v34  ;;  %v1939_v1 = vand.u32 8388607, %v1932_v11 }
 0x2da   :  { %v1744_v40 = vxor.u32 2147483648, %v1743_v63  ;;  %v1869_v6 = vadd.s32 %v1868_v28, %v1859_v18  ;;  %v6879_v19 = vmul.f32 %v6556_v61, %v6869_v50  ;;  %v1766_v10 = vadd.s32 3, %v1749_v8 }
 0x2db   :  { %vm1872_vm14 = vc.u32 %v1847_v2, %v1866_v17  ;;  %v5293_v46 = vadd.s32 4294967169, %v1936_v36  ;;  %v1870_v45 = vmul.u32 %v6809_v4, %v1816_v9  ;;  %v1940_v35 = vor.u32 8388608, %v1939_v1 }
 0x2dc   :  { %v1745_v55 = vsel %vm1624_vm11, %v1744_v40, %v1743_v63  ;;  %v1873_v13 = vadd.s32 1, %v1869_v6  ;;  %v2090_v27 = vand.u32 2139095040, %v6879_v19  ;;  %v6886_v47 = vand.u32 3, %v1749_v8 }
 0x2dd   :  { %v1748_v14 = vsel %vm1623_vm7, %v6560_v16, %v1745_v55  ;;  %v1942_v24 = vadd.s32 1, %v5293_v46  ;;  %v6888_v22 = vand.u32 3, %v1766_v10  ;;  %v6890_v53 = vshll.u32 %v1940_v35, 8 }
 0x2de   :  { %v1750_v32 = vmul.f32 %v1748_v14, %v1748_v14  ;;  %v1874_v7 = vsel %vm1872_vm14, %v1873_v13, %v1869_v6  ;;  %v2087_v4 = vand.u32 2147483647, %v6879_v19  ;;  %v2091_v30 = vshrl.u32 %v2090_v27, 23 }
 0x2df   :  { %v1875_v15 = vadd.s32 %v1874_v7, %v1870_v45  ;;  %vm1943_vm13 = vcmp.gt.s32.totalorder %v1942_v24, 0  ;;  %vm1779_vm3 = vcmp.lt.s32.totalorder %v6587_v62, 0  ;;  %vm1772_vm4 = vcmp.eq.s32.totalorder %v6888_v22, 2 }
 0x2e0   :  { %v1751_v0 = vmul.f32 -0.001358992, %v1750_v32  ;;  %v1758_v61 = vmul.f32 -0.00019511016, %v1750_v32  ;;  %v1944_v49 = vsel %vm1943_vm13, %v1942_v24, 0  ;;  %vm1769_vm6 = vcmp.eq.s32.totalorder %v6888_v22, 0 }
 0x2e1   :  { %v1876_v56 = vadd.s32 536870912, %v1875_v15  ;;  %v1946_v38 = vand.u32 31, %v1944_v49  ;;  %vm4239_vm8 = vcmp.eq.s32.totalorder %v6886_v47, 0  ;;  %vm4242_vm1 = vcmp.eq.s32.totalorder %v6886_v47, 2 }
 0x2e2   :  { %v1752_v59 = vadd.f32 0.041655596, %v1751_v0  ;;  %v1759_v23 = vadd.f32 0.008332121, %v1758_v61  ;;  %v1871_v39 = vadd.s32 %v1866_v17, %v1847_v2  ;;  %v6901_v60 = vand.u32 65535, %v6890_v53 }
 0x2e3   :  { %v1877_v29 = vshrl.u32 %v1876_v56, 30  ;;  %v6894_v58 = vsub.s32 32, %v1946_v38  ;;  %v5296_v37 = vadd.s32 4294967169, %v2091_v30  ;;  %v6905_v63 = vand.u32 8388607, %v2087_v4 }
 0x2e4   :  { %v1753_v26 = vmul.f32 %v1752_v59, %v1750_v32  ;;  %v1760_v3 = vmul.f32 %v1759_v23, %v1750_v32  ;;  %vm1768_vm15 = vcmp.lt.s32.totalorder %v6888_v22, 2  ;;  %vm4238_vm11 = vcmp.lt.s32.totalorder %v6886_v47, 2 }
 0x2e5   :  { %v1878_v34 = vshll.u32 %v1877_v29, 30  ;;  %v6911_v40 = vshrl.u32 %v1944_v49, 5  ;;  %vm1765_vm12 = vweird.f32 %v6560_v16  ;;  %v1901_v2 = vsub.s32 4, %v1877_v29 }
 0x2e6   :  { %v1754_v25 = vadd.f32 -0.4999988, %v1753_v26  ;;  %v1761_v41 = vadd.f32 -0.16666654, %v1760_v3  ;;  %v1950_v9 = vshrl.u32 %v5430_v44, %v6894_v58  ;;  %v1953_v17 = vshrl.u32 %v5431_v48, %v6894_v58 }
 0x2e7   :  { %v6909_v28 = vsub.s32 %v1875_v15, %v1878_v34  ;;  %v1956_v36 = vshrl.u32 %v5432_v51, %v6894_v58  ;;  %vm5196_vm10 = vcmp.ge.f32.partialorder %v6551_v12, 0.0  ;;  %vm6925_vm2 = vcmp.le.f32.partialorder %v1777_v20, 0.7853982 }
 0x2e8   :  { %v1755_v33 = vmul.f32 %v1754_v25, %v1750_v32  ;;  %v1762_v18 = vmul.f32 %v1761_v41, %v1750_v32  ;;  %v1949_v46 = vshll.u32 %v5429_v42, %v1946_v38  ;;  %v1952_v13 = vshll.u32 %v5430_v44, %v1946_v38 }
 0x2e9   :  { %vm1880_vm0 = vcmp.lt.s32.totalorder %v6909_v28, 0  ;;  %v1881_v1 = vsub.s32 0, %v6909_v28  ;;  %v6932_v32 = vshrl.u32 %v6890_v53, 16  ;;  %v6934_v10 = vadd.s32 1, %v5296_v37 }
 0x2ea   :  { %v1756_v8 = vadd.f32 1.0, %v1755_v33  ;;  %v1763_v6 = vadd.f32 1.0, %v1762_v18  ;;  %v1955_v35 = vshll.u32 %v5431_v48, %v1946_v38  ;;  %v1902_v20 = vsel %vm1779_vm3, %v1901_v2, %v1877_v29 }
 0x2eb   :  { %v1882_v7 = vsel %vm1880_vm0, %v1881_v1, %v6909_v28  ;;  %v1959_v0 = vshrl.u32 %v5433_v54, %v6894_v58  ;;  %vm1964_vm7 = vcmp.lt.s32.totalorder %v6911_v40, 1  ;;  %v1951_v15 = vor.u32 %v1950_v9, %v1949_v46 }
 0x2ec   :  { %v1764_v45 = vmul.f32 %v1763_v6, %v1748_v14  ;;  %v1773_v24 = vxor.u32 2147483648, %v1756_v8  ;;  %v1883_v27 = vclz %v1882_v7  ;;  %v1954_v49 = vor.u32 %v1953_v17, %v1952_v13 }
 0x2ed   :  { %v1957_v59 = vor.u32 %v1956_v36, %v1955_v35  ;;  %v1958_v56 = vshll.u32 %v5432_v51, %v1946_v38  ;;  %v1961_v30 = vshll.u32 %v5433_v54, %v1946_v38  ;;  %v1962_v25 = vshrl.u32 %v5434_v57, %v6894_v58 }
 0x2ee   :  { %v1770_v61 = vxor.u32 2147483648, %v1764_v45  ;;  %v1774_v14 = vsel %vm1772_vm4, %v1773_v24, %v1764_v45  ;;  %v5291_v23 = vadd.s32 4294967294, %v1883_v27  ;;  %v4244_v29 = vsel %vm4242_vm1, %v1773_v24, %v1764_v45 }
 0x2ef   :  { %v1960_v38 = vor.u32 %v1959_v0, %v1958_v56  ;;  %v1963_v2 = vor.u32 %v1962_v25, %v1961_v30  ;;  %v1948_v22 = vshrl.u32 %v5429_v42, %v6894_v58  ;;  %v1904_v6 = vsel %vm6925_vm2, 0, %v1902_v20 }
 0x2f0   :  { %v1771_v26 = vsel %vm1769_vm6, %v1756_v8, %v1770_v61  ;;  %v4241_v3 = vsel %vm4239_vm8, %v1756_v8, %v1770_v61  ;;  %vm5292_vm14 = vcmp.lt.s32.totalorder %v5291_v23, 0  ;;  %vm1966_vm13 = vcmp.lt.s32.totalorder %v6911_v40, 3 }
 0x2f1   :  { %v1775_v41 = vsel %vm1768_vm15, %v1771_v26, %v1774_v14  ;;  %v4245_v34 = vsel %vm4238_vm11, %v4241_v3, %v4244_v29  ;;  %v1886_v18 = vsel %vm5292_vm14, 0, %v5291_v23  ;;  %vm1967_vm4 = vcmp.lt.s32.totalorder %v6911_v40, 4 }
 0x2f2   :  { %v1776_v37 = vsel %vm1765_vm12, nan, %v1775_v41  ;;  %v4246_v33 = vsel %vm1765_vm12, nan, %v4245_v34  ;;  %v1887_v17 = vsub.s32 32, %v1886_v18  ;;  %v1891_v36 = vsub.s32 4294967266, %v1886_v18 }
 0x2f3   :  { %v5180_v9 = vsel %vm5730_vm5, %v1776_v37, %v4246_v33  ;;  %v1888_v8 = vshll.u32 %v6909_v28, %v1886_v18  ;;  %v1972_v12 = vsel %vm1964_vm7, %v1951_v15, %v1954_v49  ;;  %v1969_v58 = vsel %vm1967_vm4, %v1957_v59, 2102212464 }
 0x2f4   :  { %v5212_v47 = vsel %vm5196_vm10, %v5180_v9, 0.0  ;;  %v1889_v16 = vshrl.u32 %v1871_v39, %v1887_v17  ;;  %v1892_v1 = vadd.s32 127, %v1891_v36  ;;  %v1973_v46 = vsel %vm1967_vm4, %v1960_v38, 920167782 }
 0x2f5   :  { %5229 = vst.msk [vmem:[%s7606_s2 + $0x48] sm:$0xff] %vm5219_vm9, %v5212_v47  ;;  %v1976_v28 = vsel %vm1964_vm7, %v1954_v49, %v1957_v59  ;;  %v1977_v13 = vsel %vm1967_vm4, %v1963_v2, 1326507024  ;;  %vm1965_vm6 = vcmp.lt.s32.totalorder %v6911_v40, 2  ;;  %v1974_v7 = vsel %vm1966_vm13, %v1957_v59, %v1973_v46 }
 0x2f6   :  { %v1890_v45 = vor.u32 %v1889_v16, %v1888_v8  ;;  %v1893_v24 = vshll.u32 %v1892_v1, 23  ;;  %v1921_v39 = vadd.s32 3, %v1904_v6  ;;  %v1968_v35 = vsel %vm1964_vm7, %v1948_v22, %v1951_v15 }
 0x2f7   :  { %v1975_v27 = vsel %vm1965_vm6, %v1972_v12, %v1974_v7  ;;  %v1978_v20 = vsel %vm1966_vm13, %v1960_v38, %v1977_v13  ;;  %v1970_v61 = vsel %vm1966_vm13, %v1954_v49, %v1969_v58  ;;  %vm2098_vm8 = vcmp.gt.s32.totalorder %v6934_v10, 0 }
 0x2f8   :  { %v1894_v0 = vor.u32 4788187, %v1893_v24  ;;  %v1979_v14 = vsel %vm1965_vm6, %v1976_v28, %v1978_v20  ;;  %v2005_v23 = vand.u32 65535, %v1975_v27  ;;  %v2006_v30 = vshrl.u32 %v1975_v27, 16 }
 0x2f9   :  { %v1983_v56 = vand.u32 65535, %v1979_v14  ;;  %v1984_v59 = vshrl.u32 %v1979_v14, 16  ;;  %v1897_v26 = vcvt.s32.f32 %v1890_v45  ;;  %v2095_v29 = vor.u32 8388608, %v6905_v63 }
 0x2fa   :  { %v1895_v15 = vand.u32 2147483647, %v1894_v0  ;;  %v2009_v3 = vmul.u32 %v2005_v23, %v6932_v32  ;;  %v6998_v25 = vand.u32 3, %v1921_v39  ;;  %v7000_v41 = vand.u32 3, %v1904_v6 }
 0x2fb   :  { %v1986_v49 = vmul.u32 %v1984_v59, %v6901_v60  ;;  %v1987_v34 = vmul.u32 %v1983_v56, %v6932_v32  ;;  %v7006_v37 = vsel %vm1965_vm6, %v1968_v35, %v1970_v61  ;;  %v2008_v33 = vmul.u32 %v2006_v30, %v6901_v60 }
 0x2fc   :  { %v1898_v38 = vmul.f32 %v1897_v26, %v1895_v15  ;;  %v2099_v18 = vsel %vm2098_vm8, %v6934_v10, 0  ;;  %v1985_v2 = vmul.u32 %v1983_v56, %v6901_v60  ;;  %v1988_v9 = vmul.u32 %v1984_v59, %v6932_v32 }
 0x2fd   :  { %v1989_v17 = vshll.u32 %v1986_v49, 16  ;;  %v2007_v36 = vmul.u32 %v2005_v23, %v6901_v60  ;;  %v2010_v47 = vmul.u32 %v2006_v30, %v6932_v32  ;;  %v2011_v8 = vshll.u32 %v2008_v33, 16 }
 0x2fe   :  { %v1899_v22 = vxor.u32 2147483648, %v1898_v38  ;;  %v2013_v6 = vshll.u32 %v2009_v3, 16  ;;  %v1991_v16 = vshll.u32 %v1987_v34, 16  ;;  %v2101_v1 = vand.u32 31, %v2099_v18 }
 0x2ff   :  { %vm1993_vm1 = vc.u32 %v1985_v2, %v1989_v17  ;;  %v1995_v40 = vadd.s32 %v1989_v17, %v1985_v2  ;;  %vm2015_vm15 = vc.u32 %v2007_v36, %v2011_v8  ;;  %v2017_v58 = vadd.s32 %v2011_v8, %v2007_v36 }
 0x300   :  { %v1900_v12 = vsel %vm1779_vm3, %v1899_v22, %v1898_v38  ;;  %v1994_v10 = vsel %vm1993_vm1, 1, %v5435_v52  ;;  %v2016_v32 = vsel %vm2015_vm15, 1, %v5435_v52  ;;  %v1990_v24 = vshrl.u32 %v1986_v49, 16 }
 0x301   :  { %v7020_v60 = vsel %vm6925_vm2, %v6587_v62, %v1900_v12  ;;  %v1996_v46 = vadd.s32 %v1994_v10, %v1988_v9  ;;  %vm1997_vm11 = vc.u32 %v1995_v40, %v1991_v16  ;;  %v2018_v45 = vadd.s32 %v2016_v32, %v2010_v47 }
 0x302   :  { %v1905_v28 = vmul.f32 %v7020_v60, %v7020_v60  ;;  %v1998_v13 = vsel %vm1997_vm11, 1, %v5435_v52  ;;  %vm2019_vm3 = vc.u32 %v2017_v58, %v2013_v6  ;;  %v7027_v35 = vsub.s32 32, %v2101_v1 }
 0x303   :  { %v2000_v7 = vadd.s32 %v1998_v13, %v1996_v46  ;;  %v2020_v39 = vsel %vm2019_vm3, 1, %v5435_v52  ;;  %v2012_v20 = vshrl.u32 %v2008_v33, 16  ;;  %v1992_v61 = vshrl.u32 %v1987_v34, 16 }
 0x304   :  { %v1906_v55 = vmul.f32 -0.001358992, %v1905_v28  ;;  %v1913_v27 = vmul.f32 -0.00019511016, %v1905_v28  ;;  %v2022_v0 = vadd.s32 %v2020_v39, %v2018_v45  ;;  %v2025_v23 = vmul.u32 %v6890_v53, %v7006_v37 }
 0x305   :  { %v2001_v14 = vadd.s32 %v2000_v7, %v1990_v24  ;;  %v7031_v56 = vshrl.u32 %v2099_v18, 5  ;;  %v2014_v15 = vshrl.u32 %v2009_v3, 16  ;;  %v7035_v38 = vadd.s32 %v2017_v58, %v2013_v6 }
 0x306   :  { %v1907_v59 = vadd.f32 0.041655596, %v1906_v55  ;;  %v1914_v30 = vadd.f32 0.008332121, %v1913_v27  ;;  %v2023_v26 = vadd.s32 %v2022_v0, %v2012_v20  ;;  %v2108_v2 = vshrl.u32 %v5431_v48, %v7027_v35 }
 0x307   :  { %v7033_v49 = vadd.s32 %v2001_v14, %v1992_v61  ;;  %v2111_v34 = vshrl.u32 %v5432_v51, %v7027_v35  ;;  %v2105_v53 = vshrl.u32 %v5430_v44, %v7027_v35  ;;  %v2107_v3 = vshll.u32 %v5430_v44, %v2101_v1 }
 0x308   :  { %v1908_v33 = vmul.f32 %v1907_v59, %v1905_v28  ;;  %v1915_v9 = vmul.f32 %v1914_v30, %v1905_v28  ;;  %v2024_v17 = vadd.s32 %v2023_v26, %v2014_v15  ;;  %v2110_v37 = vshll.u32 %v5431_v48, %v2101_v1 }
 0x309   :  { %vm2027_vm12 = vc.u32 %v7033_v49, %v7035_v38  ;;  %v2113_v18 = vshll.u32 %v5432_v51, %v2101_v1  ;;  %v2114_v8 = vshrl.u32 %v5433_v54, %v7027_v35  ;;  %vm4393_vm0 = vcmp.eq.s32.totalorder %v7000_v41, 0 }
 0x30a   :  { %v1909_v36 = vadd.f32 -0.4999988, %v1908_v33  ;;  %v1916_v22 = vadd.f32 -0.16666654, %v1915_v9  ;;  %v2028_v47 = vadd.s32 1, %v2024_v17  ;;  %v7051_v6 = vor.u32 %v2108_v2, %v2107_v3 }
 0x30b   :  { %v7053_v16 = vor.u32 %v2111_v34, %v2110_v37  ;;  %v2116_v40 = vshll.u32 %v5433_v54, %v2101_v1  ;;  %v2117_v12 = vshrl.u32 %v5434_v57, %v7027_v35  ;;  %vm4392_vm10 = vcmp.lt.s32.totalorder %v7000_v41, 2 }
 0x30c   :  { %v1910_v10 = vmul.f32 %v1909_v36, %v1905_v28  ;;  %v1917_v58 = vmul.f32 %v1916_v22, %v1905_v28  ;;  %v2029_v46 = vsel %vm2027_vm12, %v2028_v47, %v2024_v17  ;;  %v2115_v32 = vor.u32 %v2114_v8, %v2113_v18 }
 0x30d   :  { %vm1920_vm2 = vweird.f32 %v6587_v62  ;;  %vm4396_vm7 = vcmp.eq.s32.totalorder %v7000_v41, 2  ;;  %v2030_v13 = vadd.s32 %v2029_v46, %v2025_v23  ;;  %v2104_v45 = vshll.u32 %v5429_v42, %v2101_v1 }
 0x30e   :  { %v2118_v24 = vor.u32 %v2117_v12, %v2116_v40  ;;  %v1911_v7 = vadd.f32 1.0, %v1910_v10  ;;  %v1918_v39 = vadd.f32 1.0, %v1917_v58  ;;  %vm1923_vm14 = vcmp.lt.s32.totalorder %v6998_v25, 2 }
 0x30f   :  { %vm1924_vm13 = vcmp.eq.s32.totalorder %v6998_v25, 0  ;;  %vm5197_vm4 = vcmp.ge.f32.partialorder %v6572_v21, 0.0  ;;  %v2031_v28 = vadd.s32 536870912, %v2030_v13  ;;  %v7068_v55 = vor.u32 %v2105_v53, %v2104_v45 }
 0x310   :  { %vm2119_vm6 = vcmp.lt.s32.totalorder %v7031_v56, 1  ;;  %vm2122_vm8 = vcmp.lt.s32.totalorder %v7031_v56, 4  ;;  %v1919_v27 = vmul.f32 %v1918_v39, %v7020_v60  ;;  %v1928_v20 = vxor.u32 2147483648, %v1911_v7 }
 0x311   :  { %v2128_v1 = vsel %vm2122_vm8, %v2115_v32, 920167782  ;;  %v2131_v0 = vsel %vm2119_vm6, %v7051_v6, %v7053_v16  ;;  %vm1927_vm1 = vcmp.eq.s32.totalorder %v6998_v25, 2  ;;  %v7080_v61 = vshrl.u32 %v2031_v28, 30 }
 0x312   :  { %vm2121_vm15 = vcmp.lt.s32.totalorder %v7031_v56, 3  ;;  %v2132_v14 = vsel %vm2122_vm8, %v2118_v24, 1326507024  ;;  %v1925_v23 = vxor.u32 2147483648, %v1919_v27  ;;  %vm2120_vm11 = vcmp.lt.s32.totalorder %v7031_v56, 2 }
 0x313   :  { %v2133_v60 = vsel %vm2121_vm15, %v2115_v32, %v2132_v14  ;;  %v7090_v59 = vshll.u32 %v2095_v29, 8  ;;  %v2033_v30 = vshll.u32 %v7080_v61, 30  ;;  %v2127_v15 = vsel %vm2119_vm6, %v7068_v55, %v7051_v6 }
 0x314   :  { %v2129_v26 = vsel %vm2121_vm15, %v7053_v16, %v2128_v1  ;;  %v2134_v2 = vsel %vm2120_vm11, %v2131_v0, %v2133_v60  ;;  %v1926_v34 = vsel %vm1924_vm13, %v1911_v7, %v1925_v23  ;;  %v1929_v63 = vsel %vm1927_vm1, %v1928_v20, %v1919_v27  ;;  %v7133_v1 = vpop.f32.mrf.mxu3 }
 0x315   :  { %v4395_v29 = vsel %vm4393_vm0, %v1911_v7, %v1925_v23  ;;  %v4398_v33 = vsel %vm4396_vm7, %v1928_v20, %v1919_v27  ;;  %v1930_v9 = vsel %vm1923_vm14, %v1926_v34, %v1929_v63  ;;  %v2034_v53 = vsub.s32 %v2030_v13, %v2033_v30 }
 0x316   :  { %v4399_v17 = vsel %vm4392_vm10, %v4395_v29, %v4398_v33  ;;  %v2138_v3 = vand.u32 65535, %v2134_v2  ;;  %v1931_v37 = vsel %vm1920_vm2, nan, %v1930_v9  ;;  %v2136_v36 = vand.u32 65535, %v7090_v59 }
 0x317   :  { %v4400_v18 = vsel %vm1920_vm2, nan, %v4399_v17  ;;  %v2139_v22 = vshrl.u32 %v2134_v2, 16  ;;  %vm2035_vm3 = vcmp.lt.s32.totalorder %v2034_v53, 0  ;;  %v2036_v25 = vsub.s32 0, %v2034_v53  ;;  %v7147_v17 = vld [vmem:[#allocation4] ss:$0 sm:$0xff] }
 0x318   :  { %v5181_v47 = vsel %vm5730_vm5, %v1931_v37, %v4400_v18  ;;  %v2137_v8 = vshrl.u32 %v7090_v59, 16  ;;  %v2130_v58 = vsel %vm2120_vm11, %v2127_v15, %v2129_v26  ;;  %v2140_v46 = vmul.u32 %v2138_v3, %v2136_v36 }
 0x319   :  { %v5213_v41 = vsel %vm5197_vm4, %v5181_v47, 0.0  ;;  %v2141_v40 = vmul.u32 %v2139_v22, %v2136_v36  ;;  %v2037_v62 = vsel %vm2035_vm3, %v2036_v25, %v2034_v53  ;;  %v2160_v7 = vand.u32 65535, %v2130_v58 }
 0x31a   :  { %5230 = vst.msk [vmem:[%s7606_s2 + $0x50] sm:$0xff] %vm5219_vm9, %v5213_v41  ;;  %v7126_v12 = vmul.u32 %v2138_v3, %v2137_v8  ;;  %v2038_v10 = vclz %v2037_v62  ;;  %v2143_v45 = vmul.u32 %v2139_v22, %v2137_v8  ;;  %v2161_v39 = vshrl.u32 %v2130_v58, 16 }
 0x31b   :  { %v2144_v32 = vshll.u32 %v2141_v40, 16  ;;  %vm1934_vm10 = vcmp.lt.s32.totalorder %v6859_v31, 0  ;;  %v2026_v0 = vadd.s32 %v7035_v38, %v7033_v49  ;;  %vm7140_vm7 = vcmp.le.f32.partialorder %v1932_v11, 0.7853982 }
 0x31c   :  { %v5294_v13 = vadd.s32 4294967294, %v2038_v10  ;;  %v2146_v21 = vshll.u32 %v7126_v12, 16  ;;  %v2056_v15 = vsub.s32 4, %v7080_v61  ;;  %v2163_v26 = vmul.u32 %v2161_v39, %v2136_v36 }
 0x31d   :  { %vm2148_vm12 = vc.u32 %v2140_v46, %v2144_v32  ;;  %v2150_v24 = vadd.s32 %v2144_v32, %v2140_v46  ;;  %v2164_v2 = vmul.u32 %v2160_v7, %v2137_v8  ;;  %v2103_v49 = vshrl.u32 %v5429_v42, %v7027_v35 }
 0x31e   :  { %vm5295_vm0 = vcmp.lt.s32.totalorder %v5294_v13, 0  ;;  %v2149_v28 = vsel %vm2148_vm12, 1, %v5435_v52  ;;  %v2162_v38 = vmul.u32 %v2160_v7, %v2136_v36  ;;  %v2166_v9 = vshll.u32 %v2163_v26, 16 }
 0x31f   :  { %v2041_v27 = vsel %vm5295_vm0, 0, %v5294_v13  ;;  %v2151_v20 = vadd.s32 %v2149_v28, %v2143_v45  ;;  %vm2152_vm2 = vc.u32 %v2150_v24, %v2146_v21  ;;  %v7151_v11 = vmul.f32 %v7147_v17, %v7133_v1  ;;  %v7167_v24 = vpop.f32.mrf.mxu3 }
 0x320   :  { %v2042_v14 = vsub.s32 32, %v2041_v27  ;;  %v2046_v23 = vsub.s32 4294967266, %v2041_v27  ;;  %v2153_v60 = vsel %vm2152_vm2, 1, %v5435_v52  ;;  %v2043_v34 = vshll.u32 %v2034_v53, %v2041_v27 }
 0x321   :  { %v2155_v33 = vadd.s32 %v2153_v60, %v2151_v20  ;;  %v2124_v53 = vsel %vm2122_vm8, %v7053_v16, 2102212464  ;;  %v2145_v18 = vshrl.u32 %v2141_v40, 16  ;;  %v2165_v22 = vmul.u32 %v2161_v39, %v2137_v8 }
 0x322   :  { %v2044_v63 = vshrl.u32 %v2026_v0, %v2042_v14  ;;  %v2047_v29 = vadd.s32 127, %v2046_v23  ;;  %v2168_v47 = vshll.u32 %v2164_v2, 16  ;;  %vm2170_vm14 = vc.u32 %v2162_v38, %v2166_v9 }
 0x323   :  { %v2172_v25 = vadd.s32 %v2166_v9, %v2162_v38  ;;  %v2057_v36 = vsel %vm1934_vm10, %v2056_v15, %v7080_v61  ;;  %v2156_v41 = vadd.s32 %v2155_v33, %v2145_v18  ;;  %v2171_v62 = vsel %vm2170_vm14, 1, %v5435_v52 }
 0x324   :  { %v2045_v3 = vor.u32 %v2044_v63, %v2043_v34  ;;  %v2048_v37 = vshll.u32 %v2047_v29, 23  ;;  %v2173_v10 = vadd.s32 %v2171_v62, %v2165_v22  ;;  %v2242_v58 = vand.u32 2147483647, %v7151_v11 }
 0x325   :  { %vm2174_vm13 = vc.u32 %v2172_v25, %v2168_v47  ;;  %v2245_v46 = vand.u32 2139095040, %v7151_v11  ;;  %v2147_v8 = vshrl.u32 %v7126_v12, 16  ;;  %v2123_v13 = vsel %vm2119_vm6, %v2103_v49, %v7068_v55 }
 0x326   :  { %v2049_v35 = vor.u32 4788187, %v2048_v37  ;;  %v2052_v40 = vcvt.s32.f32 %v2045_v3  ;;  %v2175_v32 = vsel %vm2174_vm13, 1, %v5435_v52  ;;  %v2167_v61 = vshrl.u32 %v2163_v26, 16 }
 0x327   :  { %v2177_v45 = vadd.s32 %v2175_v32, %v2173_v10  ;;  %v2246_v21 = vshrl.u32 %v2245_v46, 23  ;;  %v2059_v39 = vsel %vm7140_vm7, 0, %v2057_v36  ;;  %v2125_v28 = vsel %vm2121_vm15, %v7051_v6, %v2124_v53 }
 0x328   :  { %v2050_v16 = vand.u32 2147483647, %v2049_v35  ;;  %v2157_v12 = vadd.s32 %v2156_v41, %v2147_v8  ;;  %v2169_v27 = vshrl.u32 %v2164_v2, 16  ;;  %v2249_v55 = vand.u32 8388607, %v2242_v58 }
 0x329   :  { %v2178_v20 = vadd.s32 %v2177_v45, %v2167_v61  ;;  %v5299_v0 = vadd.s32 4294967169, %v2246_v21  ;;  %v2176_v23 = vadd.s32 %v2172_v25, %v2168_v47  ;;  %v7178_v60 = vmul.f32 %v7147_v17, %v7167_v24 }
 0x32a   :  { %v2053_v7 = vmul.f32 %v2052_v40, %v2050_v16  ;;  %v2126_v15 = vsel %vm2120_vm11, %v2123_v13, %v2125_v28  ;;  %v2076_v2 = vadd.s32 3, %v2059_v39  ;;  %v2250_v33 = vor.u32 8388608, %v2249_v55 }
 0x32b   :  { %v2179_v26 = vadd.s32 %v2178_v20, %v2169_v27  ;;  %v2252_v34 = vadd.s32 1, %v5299_v0  ;;  %vm2182_vm4 = vc.u32 %v2157_v12, %v2176_v23  ;;  %v2180_v56 = vmul.u32 %v7090_v59, %v2126_v15 }
 0x32c   :  { %v2054_v14 = vxor.u32 2147483648, %v2053_v7  ;;  %v2400_v9 = vand.u32 2139095040, %v7178_v60  ;;  %v2397_v53 = vand.u32 2147483647, %v7178_v60  ;;  %v7194_v47 = vand.u32 3, %v2076_v2 }
 0x32d   :  { %v2183_v29 = vadd.s32 1, %v2179_v26  ;;  %vm2253_vm6 = vcmp.gt.s32.totalorder %v2252_v34, 0  ;;  %v7196_v25 = vshll.u32 %v2250_v33, 8  ;;  %v7198_v10 = vand.u32 3, %v2059_v39 }
 0x32e   :  { %v2055_v6 = vsel %vm1934_vm10, %v2054_v14, %v2053_v7  ;;  %v2254_v38 = vsel %vm2253_vm6, %v2252_v34, 0  ;;  %v2401_v62 = vshrl.u32 %v2400_v9, 23  ;;  %v7204_v46 = vand.u32 8388607, %v2397_v53 }
 0x32f   :  { %v7187_v63 = vsel %vm7140_vm7, %v6859_v31, %v2055_v6  ;;  %v2184_v3 = vsel %vm2182_vm4, %v2183_v29, %v2179_v26  ;;  %v2256_v37 = vand.u32 31, %v2254_v38  ;;  %vm2089_vm8 = vcmp.lt.s32.totalorder %v6879_v19, 0 }
 0x330   :  { %v2060_v49 = vmul.f32 %v7187_v63, %v7187_v63  ;;  %v2185_v30 = vadd.s32 %v2184_v3, %v2180_v56  ;;  %v7207_v32 = vadd.s32 %v2176_v23, %v2157_v12  ;;  %v7209_v13 = vshrl.u32 %v2254_v38, 5 }
 0x331   :  { %v7200_v59 = vsub.s32 32, %v2256_v37  ;;  %v7212_v61 = vand.u32 65535, %v7196_v25  ;;  %v7215_v45 = vshrl.u32 %v7196_v25, 16  ;;  %vm2082_vm1 = vcmp.eq.s32.totalorder %v7194_v47, 2 }
 0x332   :  { %v2061_v18 = vmul.f32 -0.001358992, %v2060_v49  ;;  %v2068_v22 = vmul.f32 -0.00019511016, %v2060_v49  ;;  %v2186_v41 = vadd.s32 536870912, %v2185_v30  ;;  %v7218_v28 = vadd.s32 4294967169, %v2401_v62 }
 0x333   :  { %vm2079_vm15 = vcmp.eq.s32.totalorder %v7194_v47, 0  ;;  %vm4547_vm11 = vcmp.eq.s32.totalorder %v7198_v10, 0  ;;  %vm4550_vm3 = vcmp.eq.s32.totalorder %v7198_v10, 2  ;;  %v2259_v12 = vshll.u32 %v5429_v42, %v2256_v37 }
 0x334   :  { %v2062_v35 = vadd.f32 0.041655596, %v2061_v18  ;;  %v2069_v36 = vadd.f32 0.008332121, %v2068_v22  ;;  %v2187_v8 = vshrl.u32 %v2186_v41, 30  ;;  %v2260_v27 = vshrl.u32 %v5430_v44, %v7200_v59 }
 0x335   :  { %v2263_v20 = vshrl.u32 %v5431_v48, %v7200_v59  ;;  %v2405_v0 = vor.u32 8388608, %v7204_v46  ;;  %vm2078_vm12 = vcmp.lt.s32.totalorder %v7194_v47, 2  ;;  %vm4546_vm0 = vcmp.lt.s32.totalorder %v7198_v10, 2 }
 0x336   :  { %v2063_v16 = vmul.f32 %v2062_v35, %v2060_v49  ;;  %v2070_v40 = vmul.f32 %v2069_v36, %v2060_v49  ;;  %v2188_v39 = vshll.u32 %v2187_v8, 30  ;;  %v2262_v15 = vshll.u32 %v5430_v44, %v2256_v37 }
 0x337   :  { %vm2075_vm10 = vweird.f32 %v6859_v31  ;;  %v2211_v26 = vsub.s32 4, %v2187_v8  ;;  %v2266_v34 = vshrl.u32 %v5432_v51, %v7200_v59  ;;  %v2269_v6 = vshrl.u32 %v5433_v54, %v7200_v59 }
 0x338   :  { %v2064_v21 = vadd.f32 -0.4999988, %v2063_v16  ;;  %v2071_v7 = vadd.f32 -0.16666654, %v2070_v40  ;;  %v7231_v23 = vsub.s32 %v2185_v30, %v2188_v39  ;;  %v2272_v2 = vshrl.u32 %v5434_v57, %v7200_v59 }
 0x339   :  { %vm5198_vm7 = vcmp.ge.f32.partialorder %v6847_v43, 0.0  ;;  %v2261_v56 = vor.u32 %v2260_v27, %v2259_v12  ;;  %v2264_v38 = vor.u32 %v2263_v20, %v2262_v15  ;;  %v2265_v9 = vshll.u32 %v5431_v48, %v2256_v37 }
 0x33a   :  { %v2065_v55 = vmul.f32 %v2064_v21, %v2060_v49  ;;  %v2072_v14 = vmul.f32 %v2071_v7, %v2060_v49  ;;  %vm2190_vm2 = vcmp.lt.s32.totalorder %v7231_v23, 0  ;;  %v2191_v49 = vsub.s32 0, %v7231_v23 }
 0x33b   :  { %v2268_v3 = vshll.u32 %v5432_v51, %v2256_v37  ;;  %v2271_v35 = vshll.u32 %v5433_v54, %v2256_v37  ;;  %v2267_v41 = vor.u32 %v2266_v34, %v2265_v9  ;;  %vm2274_vm14 = vcmp.lt.s32.totalorder %v7209_v13, 1 }
 0x33c   :  { %v2066_v29 = vadd.f32 1.0, %v2065_v55  ;;  %v2073_v33 = vadd.f32 1.0, %v2072_v14  ;;  %v2192_v30 = vsel %vm2190_vm2, %v2191_v49, %v7231_v23  ;;  %v2212_v40 = vsel %vm2089_vm8, %v2211_v26, %v2187_v8 }
 0x33d   :  { %v2193_v36 = vclz %v2192_v30  ;;  %v2270_v62 = vor.u32 %v2269_v6, %v2268_v3  ;;  %v2273_v21 = vor.u32 %v2272_v2, %v2271_v35  ;;  %vm2275_vm13 = vcmp.lt.s32.totalorder %v7209_v13, 2 }
 0x33e   :  { %v2074_v18 = vmul.f32 %v2073_v33, %v7187_v63  ;;  %v2083_v22 = vxor.u32 2147483648, %v2066_v29  ;;  %vm7257_vm4 = vcmp.le.f32.partialorder %v2087_v4, 0.7853982  ;;  %vm2276_vm6 = vcmp.lt.s32.totalorder %v7209_v13, 3 }
 0x33f   :  { %v5297_v37 = vadd.s32 4294967294, %v2193_v36  ;;  %vm2277_vm2 = vcmp.lt.s32.totalorder %v7209_v13, 4  ;;  %v2282_v4 = vsel %vm2274_vm14, %v2261_v56, %v2264_v38  ;;  %v2286_v31 = vsel %vm2274_vm14, %v2264_v38, %v2267_v41 }
 0x340   :  { %v2080_v16 = vxor.u32 2147483648, %v2074_v18  ;;  %v2084_v63 = vsel %vm2082_vm1, %v2083_v22, %v2074_v18  ;;  %v4552_v12 = vsel %vm4550_vm3, %v2083_v22, %v2074_v18  ;;  %v2283_v55 = vsel %vm2277_vm2, %v2270_v62, 920167782 }
 0x341   :  { %vm5298_vm1 = vcmp.lt.s32.totalorder %v5297_v37, 0  ;;  %v2284_v34 = vsel %vm2276_vm6, %v2267_v41, %v2283_v55  ;;  %v2287_v49 = vsel %vm2277_vm2, %v2273_v21, 1326507024  ;;  %v2258_v18 = vshrl.u32 %v5429_v42, %v7200_v59 }
 0x342   :  { %v2081_v8 = vsel %vm2079_vm15, %v2066_v29, %v2080_v16  ;;  %v4549_v39 = vsel %vm4547_vm11, %v2066_v29, %v2080_v16  ;;  %v2196_v26 = vsel %vm5298_vm1, 0, %v5297_v37  ;;  %v2285_v33 = vsel %vm2275_vm13, %v2282_v4, %v2284_v34 }
 0x343   :  { %v2085_v27 = vsel %vm2078_vm12, %v2081_v8, %v2084_v63  ;;  %v4553_v20 = vsel %vm4546_vm0, %v4549_v39, %v4552_v12  ;;  %v2197_v6 = vsub.s32 32, %v2196_v26  ;;  %v2198_v10 = vshll.u32 %v7231_v23, %v2196_v26 }
 0x344   :  { %v2086_v14 = vsel %vm2075_vm10, nan, %v2085_v27  ;;  %v4554_v15 = vsel %vm2075_vm10, nan, %v4553_v20  ;;  %v2201_v2 = vsub.s32 4294967266, %v2196_v26  ;;  %v2288_v43 = vsel %vm2276_vm6, %v2270_v62, %v2287_v49 }
 0x345   :  { %v5182_v47 = vsel %vm5730_vm5, %v2086_v14, %v4554_v15  ;;  %v2199_v23 = vshrl.u32 %v7207_v32, %v2197_v6  ;;  %v2315_v3 = vand.u32 65535, %v2285_v33  ;;  %v2279_v22 = vsel %vm2277_vm2, %v2267_v41, 2102212464 }
 0x346   :  { %v5214_v29 = vsel %vm5198_vm7, %v5182_v47, 0.0  ;;  %v2202_v9 = vadd.s32 127, %v2201_v2  ;;  %v2289_v30 = vsel %vm2275_vm13, %v2286_v31, %v2288_v43  ;;  %v2316_v35 = vshrl.u32 %v2285_v33, 16 }
 0x347   :  { %5231 = vst.msk [vmem:[%s7606_s2 + $0x58] sm:$0xff] %vm5219_vm9, %v5214_v29  ;;  %v2200_v36 = vor.u32 %v2199_v23, %v2198_v10  ;;  %v2293_v21 = vand.u32 65535, %v2289_v30  ;;  %v2294_v63 = vshrl.u32 %v2289_v30, 16  ;;  %v2214_v32 = vsel %vm7257_vm4, 0, %v2212_v40 }
 0x348   :  { %v2203_v16 = vshll.u32 %v2202_v9, 23  ;;  %v2278_v62 = vsel %vm2274_vm14, %v2258_v18, %v2261_v56  ;;  %v2318_v37 = vmul.u32 %v2316_v35, %v7212_v61  ;;  %v2319_v59 = vmul.u32 %v2315_v3, %v7215_v45 }
 0x349   :  { %v2280_v41 = vsel %vm2276_vm6, %v2264_v38, %v2279_v22  ;;  %v2296_v39 = vmul.u32 %v2294_v63, %v7212_v61  ;;  %v2407_v12 = vadd.s32 1, %v7218_v28  ;;  %v2297_v4 = vmul.u32 %v2293_v21, %v7215_v45 }
 0x34a   :  { %v2204_v8 = vor.u32 4788187, %v2203_v16  ;;  %v2317_v27 = vmul.u32 %v2315_v3, %v7212_v61  ;;  %v2320_v40 = vmul.u32 %v2316_v35, %v7215_v45  ;;  %v2321_v20 = vshll.u32 %v2318_v37, 16 }
 0x34b   :  { %v2207_v55 = vcvt.s32.f32 %v2200_v36  ;;  %v2295_v14 = vmul.u32 %v2293_v21, %v7212_v61  ;;  %v2299_v15 = vshll.u32 %v2296_v39, 16  ;;  %v2298_v26 = vmul.u32 %v2294_v63, %v7215_v45 }
 0x34c   :  { %v2205_v56 = vand.u32 2147483647, %v2204_v8  ;;  %v2301_v34 = vshll.u32 %v2297_v4, 16  ;;  %v2323_v38 = vshll.u32 %v2319_v59, 16  ;;  %vm2325_vm15 = vc.u32 %v2317_v27, %v2321_v20 }
 0x34d   :  { %vm2303_vm11 = vc.u32 %v2295_v14, %v2299_v15  ;;  %v2305_v28 = vadd.s32 %v2299_v15, %v2295_v14  ;;  %v2326_v6 = vsel %vm2325_vm15, 1, %v5435_v52  ;;  %v2327_v2 = vadd.s32 %v2321_v20, %v2317_v27 }
 0x34e   :  { %v2208_v47 = vmul.f32 %v2207_v55, %v2205_v56  ;;  %v2304_v10 = vsel %vm2303_vm11, 1, %v5435_v52  ;;  %v2328_v29 = vadd.s32 %v2326_v6, %v2320_v40  ;;  %vm2408_vm3 = vcmp.gt.s32.totalorder %v2407_v12, 0 }
 0x34f   :  { %v2306_v31 = vadd.s32 %v2304_v10, %v2298_v26  ;;  %vm2307_vm12 = vc.u32 %v2305_v28, %v2301_v34  ;;  %v2409_v61 = vsel %vm2408_vm3, %v2407_v12, 0  ;;  %v2231_v49 = vadd.s32 3, %v2214_v32 }
 0x350   :  { %v2209_v33 = vxor.u32 2147483648, %v2208_v47  ;;  %v2300_v23 = vshrl.u32 %v2296_v39, 16  ;;  %v2308_v45 = vsel %vm2307_vm12, 1, %v5435_v52  ;;  %vm2329_vm0 = vc.u32 %v2327_v2, %v2323_v38 }
 0x351   :  { %v2310_v43 = vadd.s32 %v2308_v45, %v2306_v31  ;;  %v2330_v3 = vsel %vm2329_vm0, 1, %v5435_v52  ;;  %v2411_v18 = vand.u32 31, %v2409_v61  ;;  %v2281_v30 = vsel %vm2275_vm13, %v2278_v62, %v2280_v41 }
 0x352   :  { %v2210_v9 = vsel %vm2089_vm8, %v2209_v33, %v2208_v47  ;;  %v2322_v35 = vshrl.u32 %v2318_v37, 16  ;;  %v2332_v36 = vadd.s32 %v2330_v3, %v2328_v29  ;;  %v2302_v21 = vshrl.u32 %v2297_v4, 16 }
 0x353   :  { %v7331_v22 = vsel %vm7257_vm4, %v6879_v19, %v2210_v9  ;;  %v2311_v63 = vadd.s32 %v2310_v43, %v2300_v23  ;;  %v7337_v8 = vsub.s32 32, %v2411_v18  ;;  %v7339_v39 = vand.u32 3, %v2231_v49 }
 0x354   :  { %v2215_v16 = vmul.f32 %v7331_v22, %v7331_v22  ;;  %v7341_v12 = vand.u32 3, %v2214_v32  ;;  %v2324_v27 = vshrl.u32 %v2319_v59, 16  ;;  %v2333_v7 = vadd.s32 %v2332_v36, %v2322_v35 }
 0x355   :  { %v7343_v56 = vadd.s32 %v2311_v63, %v2302_v21  ;;  %v7345_v13 = vadd.s32 %v2327_v2, %v2323_v38  ;;  %v2335_v37 = vmul.u32 %v7196_v25, %v2281_v30  ;;  %v7348_v41 = vshrl.u32 %v2409_v61, 5 }
 0x356   :  { %v2216_v40 = vmul.f32 -0.001358992, %v2215_v16  ;;  %v2223_v20 = vmul.f32 -0.00019511016, %v2215_v16  ;;  %v2334_v62 = vadd.s32 %v2333_v7, %v2324_v27  ;;  %v2418_v4 = vshrl.u32 %v5431_v48, %v7337_v8 }
 0x357   :  { %vm2337_vm8 = vc.u32 %v7343_v56, %v7345_v13  ;;  %v2421_v32 = vshrl.u32 %v5432_v51, %v7337_v8  ;;  %v2417_v15 = vshll.u32 %v5430_v44, %v2411_v18  ;;  %v2420_v26 = vshll.u32 %v5431_v48, %v2411_v18 }
 0x358   :  { %v2217_v55 = vadd.f32 0.041655596, %v2216_v40  ;;  %v2224_v14 = vadd.f32 0.008332121, %v2223_v20  ;;  %v2338_v59 = vadd.s32 1, %v2334_v62  ;;  %v2423_v25 = vshll.u32 %v5432_v51, %v2411_v18 }
 0x359   :  { %v2415_v47 = vshrl.u32 %v5430_v44, %v7337_v8  ;;  %v2424_v28 = vshrl.u32 %v5433_v54, %v7337_v8  ;;  %v7363_v10 = vor.u32 %v2418_v4, %v2417_v15  ;;  %v2426_v2 = vshll.u32 %v5433_v54, %v2411_v18 }
 0x35a   :  { %v2218_v34 = vmul.f32 %v2217_v55, %v2215_v16  ;;  %v2225_v38 = vmul.f32 %v2224_v14, %v2215_v16  ;;  %v2339_v6 = vsel %vm2337_vm8, %v2338_v59, %v2334_v62  ;;  %v2427_v29 = vshrl.u32 %v5434_v57, %v7337_v8 }
 0x35b   :  { %v2340_v61 = vadd.s32 %v2339_v6, %v2335_v37  ;;  %v7368_v49 = vor.u32 %v2421_v32, %v2420_v26  ;;  %vm4701_vm10 = vcmp.eq.s32.totalorder %v7341_v12, 0  ;;  %v2414_v23 = vshll.u32 %v5429_v42, %v2411_v18 }
 0x35c   :  { %v2219_v33 = vadd.f32 -0.4999988, %v2218_v34  ;;  %v2226_v31 = vadd.f32 -0.16666654, %v2225_v38  ;;  %v2425_v45 = vor.u32 %v2424_v28, %v2423_v25  ;;  %v2428_v9 = vor.u32 %v2427_v29, %v2426_v2 }
 0x35d   :  { %vm4700_vm7 = vcmp.lt.s32.totalorder %v7341_v12, 2  ;;  %v2341_v30 = vadd.s32 536870912, %v2340_v61  ;;  %vm2432_vm14 = vcmp.lt.s32.totalorder %v7348_v41, 4  ;;  %vm2230_vm13 = vweird.f32 %v6879_v19 }
 0x35e   :  { %v2220_v43 = vmul.f32 %v2219_v33, %v2215_v16  ;;  %v2227_v3 = vmul.f32 %v2226_v31, %v2215_v16  ;;  %v7375_v35 = vor.u32 %v2415_v47, %v2414_v23  ;;  %vm2429_vm4 = vcmp.lt.s32.totalorder %v7348_v41, 1 }
 0x35f   :  { %vm2431_vm6 = vcmp.lt.s32.totalorder %v7348_v41, 3  ;;  %v2442_v18 = vsel %vm2432_vm14, %v2428_v9, 1326507024  ;;  %v7381_v63 = vshrl.u32 %v2341_v30, 30  ;;  %v2441_v16 = vsel %vm2429_vm4, %v7363_v10, %v7368_v49 }
 0x360   :  { %v2221_v36 = vadd.f32 1.0, %v2220_v43  ;;  %v2228_v21 = vadd.f32 1.0, %v2227_v3  ;;  %vm2233_vm2 = vcmp.lt.s32.totalorder %v7339_v39, 2  ;;  %vm4704_vm1 = vcmp.eq.s32.totalorder %v7341_v12, 2 }
 0x361   :  { %v2438_v27 = vsel %vm2432_vm14, %v2425_v45, 920167782  ;;  %v2443_v7 = vsel %vm2431_vm6, %v2425_v45, %v2442_v18  ;;  %v2343_v62 = vshll.u32 %v7381_v63, 30  ;;  %vm2430_vm15 = vcmp.lt.s32.totalorder %v7348_v41, 2 }
 0x362   :  { %v2229_v40 = vmul.f32 %v2228_v21, %v7331_v22  ;;  %v2238_v20 = vxor.u32 2147483648, %v2221_v36  ;;  %vm2234_vm11 = vcmp.eq.s32.totalorder %v7339_v39, 0  ;;  %vm2237_vm3 = vcmp.eq.s32.totalorder %v7339_v39, 2 }
 0x363   :  { %v2444_v37 = vsel %vm2430_vm15, %v2441_v16, %v2443_v7  ;;  %v7402_v4 = vshll.u32 %v2405_v0, 8  ;;  %v2344_v14 = vsub.s32 %v2340_v61, %v2343_v62  ;;  %v2437_v22 = vsel %vm2429_vm4, %v7375_v35, %v7363_v10 }
 0x364   :  { %v2235_v55 = vxor.u32 2147483648, %v2229_v40  ;;  %v2439_v32 = vsel %vm2431_vm6, %v7368_v49, %v2438_v27  ;;  %v2239_v59 = vsel %vm2237_vm3, %v2238_v20, %v2229_v40  ;;  %v4706_v15 = vsel %vm4704_vm1, %v2238_v20, %v2229_v40 }
 0x365   :  { %v2448_v26 = vand.u32 65535, %v2444_v37  ;;  %v2449_v25 = vshrl.u32 %v2444_v37, 16  ;;  %vm2345_vm12 = vcmp.lt.s32.totalorder %v2344_v14, 0  ;;  %v2346_v34 = vsub.s32 0, %v2344_v14 }
 0x366   :  { %v2236_v46 = vsel %vm2234_vm11, %v2221_v36, %v2235_v55  ;;  %v4703_v0 = vsel %vm4701_vm10, %v2221_v36, %v2235_v55  ;;  %vm5199_vm0 = vcmp.ge.f32.partialorder %v6869_v50, 0.0  ;;  %v2446_v28 = vand.u32 65535, %v7402_v4 }
 0x367   :  { %v2240_v38 = vsel %vm2233_vm2, %v2236_v46, %v2239_v59  ;;  %v4707_v47 = vsel %vm4700_vm7, %v4703_v0, %v4706_v15  ;;  %v2347_v29 = vsel %vm2345_vm12, %v2346_v34, %v2344_v14  ;;  %v2447_v33 = vshrl.u32 %v7402_v4, 16  ;;  %v7438_v46 = vpop.f32.mrf.mxu3 }
 0x368   :  { %v2241_v6 = vsel %vm2230_vm13, nan, %v2240_v38  ;;  %v4708_v2 = vsel %vm2230_vm13, nan, %v4707_v47  ;;  %v2348_v31 = vclz %v2347_v29  ;;  %v2440_v12 = vsel %vm2430_vm15, %v2437_v22, %v2439_v32 }
 0x369   :  { %v5183_v39 = vsel %vm5730_vm5, %v2241_v6, %v4708_v2  ;;  %v2451_v61 = vmul.u32 %v2449_v25, %v2446_v28  ;;  %v2452_v23 = vmul.u32 %v2448_v26, %v2447_v33  ;;  %v2450_v45 = vmul.u32 %v2448_v26, %v2446_v28 }
 0x36a   :  { %v5215_v50 = vsel %vm5199_vm0, %v5183_v39, 0.0  ;;  %v5300_v19 = vadd.s32 4294967294, %v2348_v31  ;;  %v2470_v43 = vand.u32 65535, %v2440_v12  ;;  %v2471_v3 = vshrl.u32 %v2440_v12, 16 }
 0x36b   :  { %5232 = vst.msk [vmem:[%s7606_s2 + $0x60] sm:$0xff] %vm5219_vm9, %v5215_v50  ;;  %v2454_v9 = vshll.u32 %v2451_v61, 16  ;;  %v2453_v30 = vmul.u32 %v2449_v25, %v2447_v33  ;;  %v2456_v36 = vshll.u32 %v2452_v23, 16  ;;  %v2336_v16 = vadd.s32 %v7345_v13, %v7343_v56 }
 0x36c   :  { %vm5301_vm8 = vcmp.lt.s32.totalorder %v5300_v19, 0  ;;  %v2473_v62 = vmul.u32 %v2471_v3, %v2446_v28  ;;  %v2474_v37 = vmul.u32 %v2470_v43, %v2447_v33  ;;  %v2472_v26 = vmul.u32 %v2470_v43, %v2446_v28 }
 0x36d   :  { %v2351_v18 = vsel %vm5301_vm8, 0, %v5300_v19  ;;  %vm2458_vm10 = vc.u32 %v2450_v45, %v2454_v9  ;;  %v2460_v21 = vadd.s32 %v2454_v9, %v2450_v45  ;;  %v2413_v13 = vshrl.u32 %v5429_v42, %v7337_v8 }
 0x36e   :  { %v2352_v27 = vsub.s32 32, %v2351_v18  ;;  %v2356_v7 = vsub.s32 4294967266, %v2351_v18  ;;  %v2459_v40 = vsel %vm2458_vm10, 1, %v5435_v52  ;;  %v2353_v55 = vshll.u32 %v2344_v14, %v2351_v18 }
 0x36f   :  { %v2461_v20 = vadd.s32 %v2459_v40, %v2453_v30  ;;  %vm2462_vm7 = vc.u32 %v2460_v21, %v2456_v36  ;;  %v2476_v25 = vshll.u32 %v2473_v62, 16  ;;  %v2455_v34 = vshrl.u32 %v2451_v61, 16 }
 0x370   :  { %v2354_v22 = vshrl.u32 %v2336_v16, %v2352_v27  ;;  %v2357_v32 = vadd.s32 127, %v2356_v7  ;;  %v2463_v59 = vsel %vm2462_vm7, 1, %v5435_v52  ;;  %v2475_v38 = vmul.u32 %v2471_v3, %v2447_v33 }
 0x371   :  { %v2465_v15 = vadd.s32 %v2463_v59, %v2461_v20  ;;  %v2478_v47 = vshll.u32 %v2474_v37, 16  ;;  %vm2480_vm13 = vc.u32 %v2472_v26, %v2476_v25  ;;  %v2482_v6 = vadd.s32 %v2476_v25, %v2472_v26 }
 0x372   :  { %v2355_v0 = vor.u32 %v2354_v22, %v2353_v55  ;;  %v2358_v56 = vshll.u32 %v2357_v32, 23  ;;  %v2481_v29 = vsel %vm2480_vm13, 1, %v5435_v52  ;;  %v7445_v28 = vmul.f32 %v7147_v17, %v7438_v46 }
 0x373   :  { %v2466_v2 = vadd.s32 %v2465_v15, %v2455_v34  ;;  %v2366_v39 = vsub.s32 4, %v7381_v63  ;;  %v2434_v31 = vsel %vm2432_vm14, %v7368_v49, 2102212464  ;;  %v2483_v8 = vadd.s32 %v2481_v29, %v2475_v38 }
 0x374   :  { %v2359_v14 = vor.u32 4788187, %v2358_v56  ;;  %vm2484_vm2 = vc.u32 %v2482_v6, %v2478_v47  ;;  %v2362_v12 = vcvt.s32.f32 %v2355_v0  ;;  %v2457_v61 = vshrl.u32 %v2452_v23, 16 }
 0x375   :  { %v2485_v50 = vsel %vm2484_vm2, 1, %v5435_v52  ;;  %vm2244_vm1 = vcmp.lt.s32.totalorder %v7151_v11, 0  ;;  %v2477_v19 = vshrl.u32 %v2473_v62, 16  ;;  %v2555_v17 = vand.u32 2139095040, %v7445_v28 }
 0x376   :  { %v2360_v33 = vand.u32 2147483647, %v2359_v14  ;;  %v2487_v45 = vadd.s32 %v2485_v50, %v2483_v8  ;;  %v2433_v43 = vsel %vm2429_vm4, %v2413_v13, %v7375_v35  ;;  %v2435_v49 = vsel %vm2431_vm6, %v7363_v10, %v2434_v31 }
 0x377   :  { %v2467_v3 = vadd.s32 %v2466_v2, %v2457_v61  ;;  %v2367_v23 = vsel %vm2244_vm1, %v2366_v39, %v7381_v63  ;;  %v2479_v30 = vshrl.u32 %v2474_v37, 16  ;;  %v2556_v36 = vshrl.u32 %v2555_v17, 23 }
 0x378   :  { %v2363_v9 = vmul.f32 %v2362_v12, %v2360_v33  ;;  %v2488_v18 = vadd.s32 %v2487_v45, %v2477_v19  ;;  %v2486_v16 = vadd.s32 %v2482_v6, %v2478_v47  ;;  %vm2243_vm14 = vcmp.le.f32.partialorder %v2242_v58, 0.7853982 }
 0x379   :  { %v2436_v35 = vsel %vm2430_vm15, %v2433_v43, %v2435_v49  ;;  %v5305_v7 = vadd.s32 4294967169, %v2556_v36  ;;  %v2369_v40 = vsel %vm2243_vm14, 0, %v2367_v23  ;;  %v2552_v26 = vand.u32 2147483647, %v7445_v28 }
 0x37a   :  { %v2364_v21 = vxor.u32 2147483648, %v2363_v9  ;;  %v2489_v27 = vadd.s32 %v2488_v18, %v2479_v30  ;;  %vm2492_vm4 = vc.u32 %v2467_v3, %v2486_v16  ;;  %v2490_v55 = vmul.u32 %v7402_v4, %v2436_v35 }
 0x37b   :  { %v2562_v62 = vadd.s32 1, %v5305_v7  ;;  %v2386_v22 = vadd.s32 3, %v2369_v40  ;;  %v4853_v38 = vand.u32 3, %v2369_v40  ;;  %v2559_v4 = vand.u32 8388607, %v2552_v26 }
 0x37c   :  { %v2365_v10 = vsel %vm2244_vm1, %v2364_v21, %v2363_v9  ;;  %v2493_v20 = vadd.s32 1, %v2489_v27  ;;  %v2491_v12 = vadd.s32 %v2486_v16, %v2467_v3  ;;  %vm2385_vm10 = vweird.f32 %v7151_v11 }
 0x37d   :  { %v2368_v63 = vsel %vm2243_vm14, %v7151_v11, %v2365_v10  ;;  %vm2563_vm6 = vcmp.gt.s32.totalorder %v2562_v62, 0  ;;  %v2387_v34 = vand.u32 3, %v2386_v22  ;;  %vm4855_vm3 = vcmp.eq.s32.totalorder %v4853_v38, 0 }
 0x37e   :  { %v2370_v37 = vmul.f32 %v2368_v63, %v2368_v63  ;;  %v2494_v32 = vsel %vm2492_vm4, %v2493_v20, %v2489_v27  ;;  %v2564_v15 = vsel %vm2563_vm6, %v2562_v62, 0  ;;  %vm4858_vm12 = vcmp.eq.s32.totalorder %v4853_v38, 2 }
 0x37f   :  { %v2495_v59 = vadd.s32 %v2494_v32, %v2490_v55  ;;  %v2566_v25 = vand.u32 31, %v2564_v15  ;;  %vm2389_vm15 = vcmp.eq.s32.totalorder %v2387_v34, 0  ;;  %vm2392_vm11 = vcmp.eq.s32.totalorder %v2387_v34, 2 }
 0x380   :  { %v2371_v58 = vmul.f32 -0.001358992, %v2370_v37  ;;  %v2378_v41 = vmul.f32 -0.00019511016, %v2370_v37  ;;  %vm2388_vm0 = vcmp.lt.s32.totalorder %v2387_v34, 2  ;;  %vm4854_vm8 = vcmp.lt.s32.totalorder %v4853_v38, 2 }
 0x381   :  { %v2496_v13 = vadd.s32 536870912, %v2495_v59  ;;  %v7476_v2 = vsub.s32 32, %v2566_v25  ;;  %v2560_v50 = vor.u32 8388608, %v2559_v4  ;;  %v7480_v19 = vshrl.u32 %v2564_v15, 5 }
 0x382   :  { %v2372_v0 = vadd.f32 0.041655596, %v2371_v58  ;;  %v2379_v56 = vadd.f32 0.008332121, %v2378_v41  ;;  %vm5200_vm13 = vcmp.ge.f32.partialorder %v7133_v1, 0.0  ;;  %v2569_v3 = vshll.u32 %v5429_v42, %v2566_v25 }
 0x383   :  { %v7472_v14 = vshrl.u32 %v2496_v13, 30  ;;  %v2570_v45 = vshrl.u32 %v5430_v44, %v7476_v2  ;;  %v2573_v17 = vshrl.u32 %v5431_v48, %v7476_v2  ;;  %v2576_v23 = vshrl.u32 %v5432_v51, %v7476_v2 }
 0x384   :  { %v2373_v47 = vmul.f32 %v2372_v0, %v2370_v37  ;;  %v2380_v6 = vmul.f32 %v2379_v56, %v2370_v37  ;;  %v2579_v30 = vshrl.u32 %v5433_v54, %v7476_v2  ;;  %v2582_v18 = vshrl.u32 %v5434_v57, %v7476_v2 }
 0x385   :  { %v2498_v31 = vshll.u32 %v7472_v14, 30  ;;  %v2572_v35 = vshll.u32 %v5430_v44, %v2566_v25  ;;  %v2575_v7 = vshll.u32 %v5431_v48, %v2566_v25  ;;  %v2578_v10 = vshll.u32 %v5432_v51, %v2566_v25 }
 0x386   :  { %v2374_v29 = vadd.f32 -0.4999988, %v2373_v47  ;;  %v2381_v39 = vadd.f32 -0.16666654, %v2380_v6  ;;  %v2581_v40 = vshll.u32 %v5433_v54, %v2566_v25  ;;  %v2571_v62 = vor.u32 %v2570_v45, %v2569_v3 }
 0x387   :  { %v2499_v61 = vsub.s32 %v2495_v59, %v2498_v31  ;;  %v7500_v55 = vshll.u32 %v2560_v50, 8  ;;  %v7502_v57 = vor.u32 %v2576_v23, %v2575_v7  ;;  %vm2584_vm1 = vcmp.lt.s32.totalorder %v7480_v19, 1 }
 0x388   :  { %v2375_v8 = vmul.f32 %v2374_v29, %v2370_v37  ;;  %v2382_v33 = vmul.f32 %v2381_v39, %v2370_v37  ;;  %v7498_v37 = vor.u32 %v2573_v17, %v2572_v35  ;;  %v2583_v32 = vor.u32 %v2582_v18, %v2581_v40 }
 0x389   :  { %vm2500_vm7 = vcmp.lt.s32.totalorder %v2499_v61, 0  ;;  %v2501_v49 = vsub.s32 0, %v2499_v61  ;;  %vm2585_vm14 = vcmp.lt.s32.totalorder %v7480_v19, 2  ;;  %vm2587_vm4 = vcmp.lt.s32.totalorder %v7480_v19, 4 }
 0x38a   :  { %v2376_v9 = vadd.f32 1.0, %v2375_v8  ;;  %v2383_v43 = vadd.f32 1.0, %v2382_v33  ;;  %vm2586_vm6 = vcmp.lt.s32.totalorder %v7480_v19, 3  ;;  %v2592_v11 = vsel %vm2584_vm1, %v2571_v62, %v7498_v37 }
 0x38b   :  { %v2502_v16 = vsel %vm2500_vm7, %v2501_v49, %v2499_v61  ;;  %v2596_v39 = vsel %vm2584_vm1, %v7498_v37, %v7502_v57  ;;  %v2597_v31 = vsel %vm2587_vm4, %v2583_v32, 1326507024  ;;  %v2601_v45 = vand.u32 65535, %v7500_v55 }
 0x38c   :  { %v2384_v36 = vmul.f32 %v2383_v43, %v2368_v63  ;;  %v2393_v21 = vxor.u32 2147483648, %v2376_v9  ;;  %v2503_v27 = vclz %v2502_v16  ;;  %v2580_v63 = vor.u32 %v2579_v30, %v2578_v10 }
 0x38d   :  { %v2602_v17 = vshrl.u32 %v7500_v55, 16  ;;  %v2521_v30 = vsub.s32 4, %v7472_v14  ;;  %v2568_v18 = vshrl.u32 %v5429_v42, %v7476_v2 }
 0x38e   :  { %v2390_v20 = vxor.u32 2147483648, %v2384_v36  ;;  %v5303_v22 = vadd.s32 4294967294, %v2503_v27  ;;  %v2394_v58 = vsel %vm2392_vm11, %v2393_v21, %v2384_v36  ;;  %v4860_v51 = vsel %vm4858_vm12, %v2393_v21, %v2384_v36 }
 0x38f   :  { %v2593_v38 = vsel %vm2587_vm4, %v2580_v63, 920167782  ;;  %vm7551_vm11 = vcmp.le.f32.partialorder %v2397_v53, 0.7853982  ;;  %v2588_v53 = vsel %vm2584_vm1, %v2568_v18, %v2571_v62  ;;  %v2589_v62 = vsel %vm2587_vm4, %v7502_v57, 2102212464 }
 0x390   :  { %v2391_v44 = vsel %vm2389_vm15, %v2376_v9, %v2390_v20  ;;  %v4857_v48 = vsel %vm4855_vm3, %v2376_v9, %v2390_v20  ;;  %vm5304_vm2 = vcmp.lt.s32.totalorder %v5303_v22, 0  ;;  %v2594_v1 = vsel %vm2586_vm6, %v7502_v57, %v2593_v38 }
 0x391   :  { %v2395_v54 = vsel %vm2388_vm0, %v2391_v44, %v2394_v58  ;;  %v4861_v41 = vsel %vm4854_vm8, %v4857_v48, %v4860_v51  ;;  %v2506_v25 = vsel %vm5304_vm2, 0, %v5303_v22  ;;  %v2595_v29 = vsel %vm2585_vm14, %v2592_v11, %v2594_v1 }
 0x392   :  { %v2396_v59 = vsel %vm2385_vm10, nan, %v2395_v54  ;;  %v4862_v15 = vsel %vm2385_vm10, nan, %v4861_v41  ;;  %v2507_v56 = vsub.s32 32, %v2506_v25  ;;  %v2511_v13 = vsub.s32 4294967266, %v2506_v25 }
 0x393   :  { %v5184_v0 = vsel %vm5730_vm5, %v2396_v59, %v4862_v15  ;;  %v2508_v47 = vshll.u32 %v2499_v61, %v2506_v25  ;;  %v2625_v61 = vand.u32 65535, %v2595_v29  ;;  %vm2399_vm15 = vcmp.lt.s32.totalorder %v7178_v60, 0 }
 0x394   :  { %v5216_v34 = vsel %vm5200_vm13, %v5184_v0, 0.0  ;;  %v2509_v6 = vshrl.u32 %v2491_v12, %v2507_v56  ;;  %v2512_v4 = vadd.s32 127, %v2511_v13  ;;  %v2598_v12 = vsel %vm2586_vm6, %v2580_v63, %v2597_v31 }
 0x395   :  { %5233 = vst.msk [vmem:[%s7606_s2 + $0x68] sm:$0xff] %vm5219_vm9, %v5216_v34  ;;  %v2599_v50 = vsel %vm2585_vm14, %v2596_v39, %v2598_v12  ;;  %v2626_v9 = vshrl.u32 %v2595_v29, 16  ;;  %v2629_v21 = vmul.u32 %v2625_v61, %v2602_v17  ;;  %v2627_v10 = vmul.u32 %v2625_v61, %v2601_v45 }
 0x396   :  { %v2510_v8 = vor.u32 %v2509_v6, %v2508_v47  ;;  %v2513_v33 = vshll.u32 %v2512_v4, 23  ;;  %v2603_v3 = vand.u32 65535, %v2599_v50  ;;  %v2604_v23 = vshrl.u32 %v2599_v50, 16 }
 0x397   :  { %v2628_v36 = vmul.u32 %v2626_v9, %v2601_v45  ;;  %v2630_v40 = vmul.u32 %v2626_v9, %v2602_v17  ;;  %v2633_v48 = vshll.u32 %v2629_v21, 16  ;;  %v2590_v38 = vsel %vm2586_vm6, %v7498_v37, %v2589_v62 }
 0x398   :  { %v2514_v49 = vor.u32 4788187, %v2513_v33  ;;  %v2517_v35 = vcvt.s32.f32 %v2510_v8  ;;  %v2606_v27 = vmul.u32 %v2604_v23, %v2601_v45  ;;  %v2607_v7 = vmul.u32 %v2603_v3, %v2602_v17 }
 0x399   :  { %v2631_v20 = vshll.u32 %v2628_v36, 16  ;;  %v2605_v63 = vmul.u32 %v2603_v3, %v2601_v45  ;;  %v2608_v32 = vmul.u32 %v2604_v23, %v2602_v17  ;;  %v2632_v34 = vshrl.u32 %v2628_v36, 16 }
 0x39a   :  { %v2515_v16 = vand.u32 2147483647, %v2514_v49  ;;  %v2609_v44 = vshll.u32 %v2606_v27, 16  ;;  %v2611_v58 = vshll.u32 %v2607_v7, 16  ;;  %v2610_v47 = vshrl.u32 %v2606_v27, 16 }
 0x39b   :  { %vm2635_vm3 = vc.u32 %v2627_v10, %v2631_v20  ;;  %v2637_v42 = vadd.s32 %v2631_v20, %v2627_v10  ;;  %v2522_v4 = vsel %vm2399_vm15, %v2521_v30, %v7472_v14  ;;  %v2634_v1 = vshrl.u32 %v2629_v21, 16 }
 0x39c   :  { %v2518_v22 = vmul.f32 %v2517_v35, %v2515_v16  ;;  %vm2613_vm12 = vc.u32 %v2605_v63, %v2609_v44  ;;  %v2615_v51 = vadd.s32 %v2609_v44, %v2605_v63  ;;  %v2636_v54 = vsel %vm2635_vm3, 1, %v5435_v52 }
 0x39d   :  { %v2614_v41 = vsel %vm2613_vm12, 1, %v5435_v52  ;;  %v2638_v59 = vadd.s32 %v2636_v54, %v2630_v40  ;;  %vm2639_vm0 = vc.u32 %v2637_v42, %v2633_v48  ;;  %v2612_v8 = vshrl.u32 %v2607_v7, 16 }
 0x39e   :  { %v2519_v2 = vxor.u32 2147483648, %v2518_v22  ;;  %v2616_v25 = vadd.s32 %v2614_v41, %v2608_v32  ;;  %vm2617_vm8 = vc.u32 %v2615_v51, %v2611_v58  ;;  %v2640_v0 = vsel %vm2639_vm0, 1, %v5435_v52 }
 0x39f   :  { %v2618_v13 = vsel %vm2617_vm8, 1, %v5435_v52  ;;  %v2642_v11 = vadd.s32 %v2640_v0, %v2638_v59  ;;  %v2591_v52 = vsel %vm2585_vm14, %v2588_v53, %v2590_v38  ;;  %v2641_v37 = vadd.s32 %v2637_v42, %v2633_v48 }
 0x3a0   :  { %v2520_v15 = vsel %vm2399_vm15, %v2519_v2, %v2518_v22  ;;  %v2620_v6 = vadd.s32 %v2618_v13, %v2616_v25  ;;  %v2524_v17 = vsel %vm7551_vm11, 0, %v2522_v4  ;;  %v2645_v3 = vmul.u32 %v7500_v55, %v2591_v52 }
 0x3a1   :  { %v2523_v56 = vsel %vm7551_vm11, %v7178_v60, %v2520_v15  ;;  %v2643_v29 = vadd.s32 %v2642_v11, %v2632_v34  ;;  %v2541_v36 = vadd.s32 3, %v2524_v17  ;;  %v5007_v27 = vand.u32 3, %v2524_v17 }
 0x3a2   :  { %v2525_v57 = vmul.f32 %v2523_v56, %v2523_v56  ;;  %v2621_v33 = vadd.s32 %v2620_v6, %v2610_v47  ;;  %vm2540_vm15 = vweird.f32 %v7178_v60  ;;  %vm5201_vm11 = vcmp.ge.f32.partialorder %v7167_v24, 0.0 }
 0x3a3   :  { %v2644_v12 = vadd.s32 %v2643_v29, %v2634_v1  ;;  %v2542_v10 = vand.u32 3, %v2541_v36  ;;  %vm5008_vm7 = vcmp.lt.s32.totalorder %v5007_v27, 2  ;;  %vm5009_vm13 = vcmp.eq.s32.totalorder %v5007_v27, 0 }
 0x3a4   :  { %v2526_v39 = vmul.f32 -0.001358992, %v2525_v57  ;;  %v2533_v31 = vmul.f32 -0.00019511016, %v2525_v57  ;;  %v2622_v45 = vadd.s32 %v2621_v33, %v2612_v8  ;;  %vm5012_vm1 = vcmp.eq.s32.totalorder %v5007_v27, 2 }
 0x3a5   :  { %v2648_v9 = vadd.s32 1, %v2644_v12  ;;  %vm2547_vm2 = vcmp.eq.s32.totalorder %v2542_v10, 2  ;;  %vm2543_vm14 = vcmp.lt.s32.totalorder %v2542_v10, 2  ;;  %vm2544_vm4 = vcmp.eq.s32.totalorder %v2542_v10, 0 }
 0x3a6   :  { %v2527_v61 = vadd.f32 0.041655596, %v2526_v39  ;;  %v2534_v50 = vadd.f32 0.008332121, %v2533_v31  ;;  %vm2647_vm10 = vc.u32 %v2622_v45, %v2641_v37  ;;  %vm2554_vm12 = vcmp.lt.s32.totalorder %v7445_v28, 0 }
 0x3a7   :  { %v2649_v23 = vsel %vm2647_vm10, %v2648_v9, %v2644_v12  ;;  %vm2553_vm0 = vcmp.le.f32.partialorder %v2552_v26, 0.7853982 }
 0x3a8   :  { %v2528_v49 = vmul.f32 %v2527_v61, %v2525_v57  ;;  %v2535_v14 = vmul.f32 %v2534_v50, %v2525_v57  ;;  %v2650_v19 = vadd.s32 %v2649_v23, %v2645_v3 }
 0x3aa   :  { %v2529_v30 = vadd.f32 -0.4999988, %v2528_v49  ;;  %v2536_v18 = vadd.f32 -0.16666654, %v2535_v14  ;;  %v2651_v35 = vadd.s32 536870912, %v2650_v19 }
 0x3ac   :  { %v2530_v21 = vmul.f32 %v2529_v30, %v2525_v57  ;;  %v2537_v16 = vmul.f32 %v2536_v18, %v2525_v57  ;;  %v2652_v43 = vshrl.u32 %v2651_v35, 30 }
 0x3ae   :  { %v2531_v7 = vadd.f32 1.0, %v2530_v21  ;;  %v2538_v53 = vadd.f32 1.0, %v2537_v16  ;;  %v2653_v22 = vshll.u32 %v2652_v43, 30  ;;  %v2676_v8 = vsub.s32 4, %v2652_v43 }
 0x3b0   :  { %v2539_v40 = vmul.f32 %v2538_v53, %v2523_v56  ;;  %v2548_v20 = vxor.u32 2147483648, %v2531_v7  ;;  %v2654_v63 = vsub.s32 %v2650_v19, %v2653_v22  ;;  %v2646_v56 = vadd.s32 %v2641_v37, %v2622_v45 }
 0x3b1   :  { %v2677_v50 = vsel %vm2554_vm12, %v2676_v8, %v2652_v43 }
 0x3b2   :  { %v2545_v55 = vxor.u32 2147483648, %v2539_v40  ;;  %v2549_v32 = vsel %vm2547_vm2, %v2548_v20, %v2539_v40  ;;  %v5014_v44 = vsel %vm5012_vm1, %v2548_v20, %v2539_v40  ;;  %vm2655_vm6 = vcmp.lt.s32.totalorder %v2654_v63, 0 }
 0x3b3   :  { %v2656_v42 = vsub.s32 0, %v2654_v63  ;;  %v2679_v17 = vsel %vm2553_vm0, 0, %v2677_v50 }
 0x3b4   :  { %v2546_v58 = vsel %vm2544_vm4, %v2531_v7, %v2545_v55  ;;  %v5011_v48 = vsel %vm5009_vm13, %v2531_v7, %v2545_v55  ;;  %v2696_v23 = vadd.s32 3, %v2679_v17  ;;  %v5161_v19 = vand.u32 3, %v2679_v17 }
 0x3b5   :  { %v2550_v2 = vsel %vm2543_vm14, %v2546_v58, %v2549_v32  ;;  %v5015_v51 = vsel %vm5008_vm7, %v5011_v48, %v5014_v44  ;;  %v2657_v41 = vsel %vm2655_vm6, %v2656_v42, %v2654_v63  ;;  %vm2695_vm14 = vweird.f32 %v7445_v28 }
 0x3b6   :  { %v2551_v54 = vsel %vm2540_vm15, nan, %v2550_v2  ;;  %v5016_v62 = vsel %vm2540_vm15, nan, %v5015_v51  ;;  %v2658_v15 = vclz %v2657_v41  ;;  %v2697_v21 = vand.u32 3, %v2696_v23 }
 0x3b7   :  { %v5185_v59 = vsel %vm5730_vm5, %v2551_v54, %v5016_v62  ;;  %vm5162_vm8 = vcmp.lt.s32.totalorder %v5161_v19, 2  ;;  %vm5163_vm10 = vcmp.eq.s32.totalorder %v5161_v19, 0  ;;  %vm5166_vm1 = vcmp.eq.s32.totalorder %v5161_v19, 2 }
 0x3b8   :  { %v5217_v25 = vsel %vm5201_vm11, %v5185_v59, 0.0  ;;  %v5306_v0 = vadd.s32 4294967294, %v2658_v15  ;;  %vm2698_vm7 = vcmp.lt.s32.totalorder %v2697_v21, 2  ;;  %vm2699_vm13 = vcmp.eq.s32.totalorder %v2697_v21, 0 }
 0x3b9   :  { %5234 = vst.msk [vmem:[%s7606_s2 + $0x70] sm:$0xff] %vm5219_vm9, %v5217_v25  ;;  %vm2702_vm2 = vcmp.eq.s32.totalorder %v2697_v21, 2  ;;  %vm5202_vm4 = vcmp.ge.f32.partialorder %v7438_v46, 0.0 }
 0x3ba   :  { %vm5307_vm3 = vcmp.lt.s32.totalorder %v5306_v0, 0 }
 0x3bb   :  { %v2661_v60 = vsel %vm5307_vm3, 0, %v5306_v0 }
 0x3bc   :  { %v2662_v13 = vsub.s32 32, %v2661_v60  ;;  %v2666_v34 = vsub.s32 4294967266, %v2661_v60  ;;  %v2663_v11 = vshll.u32 %v2654_v63, %v2661_v60 }
 0x3be   :  { %v2664_v57 = vshrl.u32 %v2646_v56, %v2662_v13  ;;  %v2667_v38 = vadd.s32 127, %v2666_v34 }
 0x3c0   :  { %v2665_v47 = vor.u32 %v2664_v57, %v2663_v11  ;;  %v2668_v6 = vshll.u32 %v2667_v38, 23 }
 0x3c2   :  { %v2669_v4 = vor.u32 4788187, %v2668_v6  ;;  %v2672_v1 = vcvt.s32.f32 %v2665_v47 }
 0x3c4   :  { %v2670_v24 = vand.u32 2147483647, %v2669_v4 }
 0x3c6   :  { %v2673_v29 = vmul.f32 %v2672_v1, %v2670_v24 }
 0x3c8   :  { %v2674_v39 = vxor.u32 2147483648, %v2673_v29 }
 0x3ca   :  { %v2675_v31 = vsel %vm2554_vm12, %v2674_v39, %v2673_v29 }
 0x3cb   :  { %v2678_v33 = vsel %vm2553_vm0, %v7445_v28, %v2675_v31 }
 0x3cc   :  { %v2680_v52 = vmul.f32 %v2678_v33, %v2678_v33 }
 0x3ce   :  { %v2681_v12 = vmul.f32 -0.001358992, %v2680_v52  ;;  %v2688_v61 = vmul.f32 -0.00019511016, %v2680_v52 }
 0x3d0   :  { %v2682_v45 = vadd.f32 0.041655596, %v2681_v12  ;;  %v2689_v37 = vadd.f32 0.008332121, %v2688_v61 }
 0x3d2   :  { %v2683_v9 = vmul.f32 %v2682_v45, %v2680_v52  ;;  %v2690_v49 = vmul.f32 %v2689_v37, %v2680_v52 }
 0x3d4   :  { %v2684_v14 = vadd.f32 -0.4999988, %v2683_v9  ;;  %v2691_v3 = vadd.f32 -0.16666654, %v2690_v49 }
 0x3d6   :  { %v2685_v30 = vmul.f32 %v2684_v14, %v2680_v52  ;;  %v2692_v18 = vmul.f32 %v2691_v3, %v2680_v52 }
 0x3d8   :  { %v2686_v36 = vadd.f32 1.0, %v2685_v30  ;;  %v2693_v26 = vadd.f32 1.0, %v2692_v18 }
 0x3da   :  { %v2694_v16 = vmul.f32 %v2693_v26, %v2678_v33  ;;  %v2703_v35 = vxor.u32 2147483648, %v2686_v36 }
 0x3dc   :  { %v2700_v27 = vxor.u32 2147483648, %v2694_v16  ;;  %v2704_v53 = vsel %vm2702_vm2, %v2703_v35, %v2694_v16  ;;  %v5168_v43 = vsel %vm5166_vm1, %v2703_v35, %v2694_v16 }
 0x3de   :  { %v2701_v7 = vsel %vm2699_vm13, %v2686_v36, %v2700_v27  ;;  %v5165_v10 = vsel %vm5163_vm10, %v2686_v36, %v2700_v27 }
 0x3df   :  { %v2705_v40 = vsel %vm2698_vm7, %v2701_v7, %v2704_v53  ;;  %v5169_v20 = vsel %vm5162_vm8, %v5165_v10, %v5168_v43 }
 0x3e0   :  { %v2706_v22 = vsel %vm2695_vm14, nan, %v2705_v40  ;;  %v5170_v55 = vsel %vm2695_vm14, nan, %v5169_v20 }
 0x3e1   :  { %v5186_v63 = vsel %vm5730_vm5, %v2706_v22, %v5170_v55 }
 0x3e2   :  { %v5218_v32 = vsel %vm5202_vm4, %v5186_v63, 0.0 }
 0x3e3   :  { %5235 = vst.msk [vmem:[%s7606_s2 + $0x78] sm:$0xff] %vm5219_vm9, %v5218_v32 }
 0x3e4   :  { %5240 = vsyncpa [#allocation3], 1 }
 0x3e5   :  { %5241 = vsyncpa [#allocation5], 1 }

</bundles_post_ra>
